<compile_context>
chip_gen: v7x
topology: tpu7x:2x2x1
jax: 0.10.0
libtpu: 0.0.40
codegen_flags: <defaults>
</compile_context>

<pallas_src>
import jax
import jax.numpy as jnp
from jax.experimental import pallas as pl
from jax.experimental.pallas import tpu as pltpu

N_IDEAS = 5
N_GEN = 10
IMG = 28 * 28          # 784
IMG_PAD = 896          # 7 * 128 -> lane-dense per-generator slab
GP = N_GEN * IMG_PAD   # 8960


def _round_up(a, m):
    return ((a + m - 1) // m) * m


def gnet_kernel(x_ref, lab_ref, w_ref, b_ref, o_ref):
    """Fused step for one batch tile.

    x_ref   : (tb, N_IDEAS)   noise
    lab_ref : (tb, N_GEN)     mixing label (f32)
    w_ref   : (N_IDEAS, GP)   all 10 generator weights, packed, padded, *0.5
    b_ref   : (1, GP)         all 10 generator biases,  packed, padded, *0.5
    o_ref   : (tb, IMG_PAD)   padded output block
    """
    x = x_ref[...]              # (tb, 5)
    lab = lab_ref[...]          # (tb, 10)

    # sigmoid(h) = 0.5 * tanh(h/2) + 0.5 ; W,b are pre-scaled by 0.5, so the
    # affine folds into the mix:
    #   out = sum_g lab_g * sigmoid(h_g)
    #       = sum_g (0.5*lab_g) * tanh(h_half_g) + 0.5 * sum_g lab_g
    lab_half = lab * 0.5                                     # (tb, 10) tiny
    bias_term = jnp.sum(lab_half, axis=1, keepdims=True)     # (tb, 1)

    acc = None
    for g in range(N_GEN):                                   # static, unrolled
        lo = g * IMG_PAD
        w_g = w_ref[:, lo:lo + IMG_PAD]                      # (5, 896), aligned
        h = b_ref[:, lo:lo + IMG_PAD]                        # (1, 896)
        for k in range(N_IDEAS):                             # 5 VPU FMAs
            h = h + x[:, k:k + 1] * w_g[k:k + 1, :]          # -> (tb, 896)
        t = jnp.tanh(h)                                      # EUP
        contrib = lab_half[:, g:g + 1] * t                   # label-weighted
        acc = contrib if acc is None else acc + contrib

    o_ref[...] = acc + bias_term


def g_net_forward(x, label, w_stack, b_stack, *, block_b=128):
    """x: (B, N_IDEAS) f32, label: (B, N_GEN) (any numeric dtype),
    w_stack: (N_GEN, N_IDEAS, IMG) f32, b_stack: (N_GEN, 1, IMG) f32.
    Returns (B, 1, 28, 28) f32, matching the PyTorch forward."""
    B = x.shape[0]
    label_f = label.astype(jnp.float32)

    # Pack + pad parameters into lane-dense slabs, pre-scaled by 0.5 for the
    # tanh-sigmoid identity (done once, outside the kernel).
    w_half = w_stack * 0.5
    b_half = b_stack * 0.5
    w_pad = jnp.pad(w_half, ((0, 0), (0, 0), (0, IMG_PAD - IMG)))    # (10,5,896)
    w_packed = jnp.transpose(w_pad, (1, 0, 2)).reshape(N_IDEAS, GP)  # (5,8960)
    b_pad = jnp.pad(b_half, ((0, 0), (0, 0), (0, IMG_PAD - IMG)))    # (10,1,896)
    b_packed = b_pad.reshape(1, GP)                                  # (1,8960)

    # Batch tiling: guarantee >= 2 grid steps once B >= 16 so the "parallel"
    # axis can shard across v7x's two TensorCores; keep tiles sublane-full.
    tb = min(block_b, max(8, _round_up(pl.cdiv(B, 2), 8)))
    n_tiles = pl.cdiv(B, tb)
    Bp = n_tiles * tb                                 # multiple of 8 by construction
    if Bp != B:
        x = jnp.pad(x, ((0, Bp - B), (0, 0)))
        label_f = jnp.pad(label_f, ((0, Bp - B), (0, 0)))

    cost = pl.CostEstimate(
        flops=Bp * GP * 13,                 # 5 FMAs + mix mul/add + affine add
        transcendentals=Bp * GP,            # one tanh per element
        bytes_accessed=4 * (Bp * N_IDEAS + Bp * N_GEN
                            + N_IDEAS * GP + GP + Bp * IMG_PAD),
    )

    out_pad = pl.pallas_call(
        gnet_kernel,
        out_shape=jax.ShapeDtypeStruct((Bp, IMG_PAD), jnp.float32),
        grid=(n_tiles,),
        in_specs=[
            pl.BlockSpec((tb, N_IDEAS), lambda i: (i, 0)),     # x tile
            pl.BlockSpec((tb, N_GEN), lambda i: (i, 0)),       # label tile
            pl.BlockSpec((N_IDEAS, GP), lambda i: (0, 0)),     # packed W (whole)
            pl.BlockSpec((1, GP), lambda i: (0, 0)),           # packed b (whole)
        ],
        out_specs=pl.BlockSpec((tb, IMG_PAD), lambda i: (i, 0)),
        compiler_params=pltpu.CompilerParams(
            dimension_semantics=("parallel",),
        ),
        cost_estimate=cost,
    )(x, label_f, w_packed, b_packed)

    # Drop batch padding and the 784->896 lane padding, then view as images.
    return out_pad[:B, :IMG].reshape(B, 1, 28, 28)


def init_params(key):
    """Deterministic init mimicking nn.Linear default: U(-1/sqrt(in), 1/sqrt(in))."""
    kw, kb = jax.random.split(key)
    bound = 1.0 / jnp.sqrt(jnp.float32(N_IDEAS))
    # Stored already transposed: (N_GEN, N_IDEAS, IMG) so x @ W[g] works directly.
    w_stack = jax.random.uniform(
        kw, (N_GEN, N_IDEAS, IMG), jnp.float32, minval=-bound, maxval=bound)
    b_stack = jax.random.uniform(
        kb, (N_GEN, 1, IMG), jnp.float32, minval=-bound, maxval=bound)
    return w_stack, b_stack


def reference_forward(x, label, w_stack, b_stack):
    """Pure-JAX reference of the PyTorch forward (for correctness check)."""
    y = jax.nn.sigmoid(
        jnp.einsum("bi,gip->gbp", x, w_stack) + b_stack[:, 0][:, None, :])
    y = jnp.transpose(y, (1, 0, 2))                       # (B, N_GEN, IMG)
    out = jnp.einsum("bg,bgp->bp", label.astype(jnp.float32), y)
    return out.reshape(-1, 1, 28, 28)


if __name__ == "__main__":
    key = jax.random.PRNGKey(0)
    k_params, k_x, k_lab = jax.random.split(key, 3)

    w_stack, b_stack = init_params(k_params)

    B = 4
    x = jax.random.normal(k_x, (B, N_IDEAS), jnp.float32)
    # one-hot label (as typically fed to this GAN generator)
    lab_idx = jax.random.randint(k_lab, (B,), 0, N_GEN)
    label = jax.nn.one_hot(lab_idx, N_GEN, dtype=jnp.float32)

    out = g_net_forward(x, label, w_stack, b_stack)
    out = jax.block_until_ready(out)

    ref = reference_forward(x, label, w_stack, b_stack)
    assert out.shape == (B, 1, 28, 28)
    # tanh-based sigmoid is exact; only f32 rounding differences remain.
    assert jnp.allclose(out, ref, atol=1e-4, rtol=1e-4)

    print("KERNEL_OK")
</pallas_src>

<mosaic_0001>
module attributes {stable_mosaic.version = 11 : i64} {
  func.func @gnet_kernel(%arg0: i32, %arg1: memref<8x5xf32, #tpu.memory_space<vmem>>, %arg2: memref<8x10xf32, #tpu.memory_space<vmem>>, %arg3: memref<5x8960xf32, #tpu.memory_space<vmem>>, %arg4: memref<1x8960xf32, #tpu.memory_space<vmem>>, %arg5: memref<8x896xf32, #tpu.memory_space<vmem>>) attributes {dimension_semantics = [#tpu.dimension_semantics<parallel>], iteration_bounds = array<i64: 1>, scalar_prefetch = 0 : i64, scratch_operands = 0 : i64, tpu.core_type = #tpu.core_type<tc>, window_params = [{transform_indices = @transform_0, window_bounds = array<i64: 8, 5>}, {transform_indices = @transform_1, window_bounds = array<i64: 8, 10>}, {pipeline_mode = #tpu.pipeline_mode<synchronous>, transform_indices = @transform_2, window_bounds = array<i64: 5, 8960>}, {pipeline_mode = #tpu.pipeline_mode<synchronous>, transform_indices = @transform_3, window_bounds = array<i64: 1, 8960>}, {transform_indices = @transform_4, window_bounds = array<i64: 8, 896>}]} {
    %c0 = arith.constant 0 : index
    %c0_0 = arith.constant 0 : index
    %0 = vector.load %arg1[%c0, %c0_0] : memref<8x5xf32, #tpu.memory_space<vmem>>, vector<8x5xf32>
    %c0_1 = arith.constant 0 : index
    %c0_2 = arith.constant 0 : index
    %1 = vector.load %arg2[%c0_1, %c0_2] : memref<8x10xf32, #tpu.memory_space<vmem>>, vector<8x10xf32>
    %cst = arith.constant 5.000000e-01 : f32
    %2 = vector.broadcast %cst : f32 to vector<8x10xf32>
    %3 = arith.mulf %1, %2 : vector<8x10xf32>
    %cst_3 = arith.constant dense<0.000000e+00> : vector<8xf32>
    %4 = vector.multi_reduction <add>, %3, %cst_3 [1] : vector<8x10xf32> to vector<8xf32>
    %5 = vector.shape_cast %4 : vector<8xf32> to vector<8x1xf32>
    %c0_4 = arith.constant 0 : index
    %c0_5 = arith.constant 0 : index
    %6 = vector.load %arg3[%c0_4, %c0_5] : memref<5x8960xf32, #tpu.memory_space<vmem>>, vector<5x896xf32>
    %c0_6 = arith.constant 0 : index
    %c0_7 = arith.constant 0 : index
    %7 = vector.load %arg4[%c0_6, %c0_7] : memref<1x8960xf32, #tpu.memory_space<vmem>>, vector<1x896xf32>
    %8 = vector.extract_strided_slice %0 {offsets = [0, 0], sizes = [8, 1], strides = [1, 1]} : vector<8x5xf32> to vector<8x1xf32>
    %9 = vector.extract_strided_slice %6 {offsets = [0, 0], sizes = [1, 896], strides = [1, 1]} : vector<5x896xf32> to vector<1x896xf32>
    %10 = vector.broadcast %8 : vector<8x1xf32> to vector<8x896xf32>
    %11 = vector.broadcast %9 : vector<1x896xf32> to vector<8x896xf32>
    %12 = arith.mulf %10, %11 : vector<8x896xf32>
    %13 = vector.broadcast %7 : vector<1x896xf32> to vector<8x896xf32>
    %14 = arith.addf %13, %12 : vector<8x896xf32>
    %15 = vector.extract_strided_slice %0 {offsets = [0, 1], sizes = [8, 1], strides = [1, 1]} : vector<8x5xf32> to vector<8x1xf32>
    %16 = vector.extract_strided_slice %6 {offsets = [1, 0], sizes = [1, 896], strides = [1, 1]} : vector<5x896xf32> to vector<1x896xf32>
    %17 = vector.broadcast %15 : vector<8x1xf32> to vector<8x896xf32>
    %18 = vector.broadcast %16 : vector<1x896xf32> to vector<8x896xf32>
    %19 = arith.mulf %17, %18 : vector<8x896xf32>
    %20 = arith.addf %14, %19 : vector<8x896xf32>
    %21 = vector.extract_strided_slice %0 {offsets = [0, 2], sizes = [8, 1], strides = [1, 1]} : vector<8x5xf32> to vector<8x1xf32>
    %22 = vector.extract_strided_slice %6 {offsets = [2, 0], sizes = [1, 896], strides = [1, 1]} : vector<5x896xf32> to vector<1x896xf32>
    %23 = vector.broadcast %21 : vector<8x1xf32> to vector<8x896xf32>
    %24 = vector.broadcast %22 : vector<1x896xf32> to vector<8x896xf32>
    %25 = arith.mulf %23, %24 : vector<8x896xf32>
    %26 = arith.addf %20, %25 : vector<8x896xf32>
    %27 = vector.extract_strided_slice %0 {offsets = [0, 3], sizes = [8, 1], strides = [1, 1]} : vector<8x5xf32> to vector<8x1xf32>
    %28 = vector.extract_strided_slice %6 {offsets = [3, 0], sizes = [1, 896], strides = [1, 1]} : vector<5x896xf32> to vector<1x896xf32>
    %29 = vector.broadcast %27 : vector<8x1xf32> to vector<8x896xf32>
    %30 = vector.broadcast %28 : vector<1x896xf32> to vector<8x896xf32>
    %31 = arith.mulf %29, %30 : vector<8x896xf32>
    %32 = arith.addf %26, %31 : vector<8x896xf32>
    %33 = vector.extract_strided_slice %0 {offsets = [0, 4], sizes = [8, 1], strides = [1, 1]} : vector<8x5xf32> to vector<8x1xf32>
    %34 = vector.extract_strided_slice %6 {offsets = [4, 0], sizes = [1, 896], strides = [1, 1]} : vector<5x896xf32> to vector<1x896xf32>
    %35 = vector.broadcast %33 : vector<8x1xf32> to vector<8x896xf32>
    %36 = vector.broadcast %34 : vector<1x896xf32> to vector<8x896xf32>
    %37 = arith.mulf %35, %36 : vector<8x896xf32>
    %38 = arith.addf %32, %37 : vector<8x896xf32>
    %39 = math.tanh %38 : vector<8x896xf32>
    %40 = vector.extract_strided_slice %3 {offsets = [0, 0], sizes = [8, 1], strides = [1, 1]} : vector<8x10xf32> to vector<8x1xf32>
    %41 = vector.broadcast %40 : vector<8x1xf32> to vector<8x896xf32>
    %42 = arith.mulf %41, %39 : vector<8x896xf32>
    %c0_8 = arith.constant 0 : index
    %c896 = arith.constant 896 : index
    %43 = vector.load %arg3[%c0_8, %c896] : memref<5x8960xf32, #tpu.memory_space<vmem>>, vector<5x896xf32>
    %c0_9 = arith.constant 0 : index
    %c896_10 = arith.constant 896 : index
    %44 = vector.load %arg4[%c0_9, %c896_10] : memref<1x8960xf32, #tpu.memory_space<vmem>>, vector<1x896xf32>
    %45 = vector.extract_strided_slice %0 {offsets = [0, 0], sizes = [8, 1], strides = [1, 1]} : vector<8x5xf32> to vector<8x1xf32>
    %46 = vector.extract_strided_slice %43 {offsets = [0, 0], sizes = [1, 896], strides = [1, 1]} : vector<5x896xf32> to vector<1x896xf32>
    %47 = vector.broadcast %45 : vector<8x1xf32> to vector<8x896xf32>
    %48 = vector.broadcast %46 : vector<1x896xf32> to vector<8x896xf32>
    %49 = arith.mulf %47, %48 : vector<8x896xf32>
    %50 = vector.broadcast %44 : vector<1x896xf32> to vector<8x896xf32>
    %51 = arith.addf %50, %49 : vector<8x896xf32>
    %52 = vector.extract_strided_slice %0 {offsets = [0, 1], sizes = [8, 1], strides = [1, 1]} : vector<8x5xf32> to vector<8x1xf32>
    %53 = vector.extract_strided_slice %43 {offsets = [1, 0], sizes = [1, 896], strides = [1, 1]} : vector<5x896xf32> to vector<1x896xf32>
    %54 = vector.broadcast %52 : vector<8x1xf32> to vector<8x896xf32>
    %55 = vector.broadcast %53 : vector<1x896xf32> to vector<8x896xf32>
    %56 = arith.mulf %54, %55 : vector<8x896xf32>
    %57 = arith.addf %51, %56 : vector<8x896xf32>
    %58 = vector.extract_strided_slice %0 {offsets = [0, 2], sizes = [8, 1], strides = [1, 1]} : vector<8x5xf32> to vector<8x1xf32>
    %59 = vector.extract_strided_slice %43 {offsets = [2, 0], sizes = [1, 896], strides = [1, 1]} : vector<5x896xf32> to vector<1x896xf32>
    %60 = vector.broadcast %58 : vector<8x1xf32> to vector<8x896xf32>
    %61 = vector.broadcast %59 : vector<1x896xf32> to vector<8x896xf32>
    %62 = arith.mulf %60, %61 : vector<8x896xf32>
    %63 = arith.addf %57, %62 : vector<8x896xf32>
    %64 = vector.extract_strided_slice %0 {offsets = [0, 3], sizes = [8, 1], strides = [1, 1]} : vector<8x5xf32> to vector<8x1xf32>
    %65 = vector.extract_strided_slice %43 {offsets = [3, 0], sizes = [1, 896], strides = [1, 1]} : vector<5x896xf32> to vector<1x896xf32>
    %66 = vector.broadcast %64 : vector<8x1xf32> to vector<8x896xf32>
    %67 = vector.broadcast %65 : vector<1x896xf32> to vector<8x896xf32>
    %68 = arith.mulf %66, %67 : vector<8x896xf32>
    %69 = arith.addf %63, %68 : vector<8x896xf32>
    %70 = vector.extract_strided_slice %0 {offsets = [0, 4], sizes = [8, 1], strides = [1, 1]} : vector<8x5xf32> to vector<8x1xf32>
    %71 = vector.extract_strided_slice %43 {offsets = [4, 0], sizes = [1, 896], strides = [1, 1]} : vector<5x896xf32> to vector<1x896xf32>
    %72 = vector.broadcast %70 : vector<8x1xf32> to vector<8x896xf32>
    %73 = vector.broadcast %71 : vector<1x896xf32> to vector<8x896xf32>
    %74 = arith.mulf %72, %73 : vector<8x896xf32>
    %75 = arith.addf %69, %74 : vector<8x896xf32>
    %76 = math.tanh %75 : vector<8x896xf32>
    %77 = vector.extract_strided_slice %3 {offsets = [0, 1], sizes = [8, 1], strides = [1, 1]} : vector<8x10xf32> to vector<8x1xf32>
    %78 = vector.broadcast %77 : vector<8x1xf32> to vector<8x896xf32>
    %79 = arith.mulf %78, %76 : vector<8x896xf32>
    %80 = arith.addf %42, %79 : vector<8x896xf32>
    %c0_11 = arith.constant 0 : index
    %c1792 = arith.constant 1792 : index
    %81 = vector.load %arg3[%c0_11, %c1792] : memref<5x8960xf32, #tpu.memory_space<vmem>>, vector<5x896xf32>
    %c0_12 = arith.constant 0 : index
    %c1792_13 = arith.constant 1792 : index
    %82 = vector.load %arg4[%c0_12, %c1792_13] : memref<1x8960xf32, #tpu.memory_space<vmem>>, vector<1x896xf32>
    %83 = vector.extract_strided_slice %0 {offsets = [0, 0], sizes = [8, 1], strides = [1, 1]} : vector<8x5xf32> to vector<8x1xf32>
    %84 = vector.extract_strided_slice %81 {offsets = [0, 0], sizes = [1, 896], strides = [1, 1]} : vector<5x896xf32> to vector<1x896xf32>
    %85 = vector.broadcast %83 : vector<8x1xf32> to vector<8x896xf32>
    %86 = vector.broadcast %84 : vector<1x896xf32> to vector<8x896xf32>
    %87 = arith.mulf %85, %86 : vector<8x896xf32>
    %88 = vector.broadcast %82 : vector<1x896xf32> to vector<8x896xf32>
    %89 = arith.addf %88, %87 : vector<8x896xf32>
    %90 = vector.extract_strided_slice %0 {offsets = [0, 1], sizes = [8, 1], strides = [1, 1]} : vector<8x5xf32> to vector<8x1xf32>
    %91 = vector.extract_strided_slice %81 {offsets = [1, 0], sizes = [1, 896], strides = [1, 1]} : vector<5x896xf32> to vector<1x896xf32>
    %92 = vector.broadcast %90 : vector<8x1xf32> to vector<8x896xf32>
    %93 = vector.broadcast %91 : vector<1x896xf32> to vector<8x896xf32>
    %94 = arith.mulf %92, %93 : vector<8x896xf32>
    %95 = arith.addf %89, %94 : vector<8x896xf32>
    %96 = vector.extract_strided_slice %0 {offsets = [0, 2], sizes = [8, 1], strides = [1, 1]} : vector<8x5xf32> to vector<8x1xf32>
    %97 = vector.extract_strided_slice %81 {offsets = [2, 0], sizes = [1, 896], strides = [1, 1]} : vector<5x896xf32> to vector<1x896xf32>
    %98 = vector.broadcast %96 : vector<8x1xf32> to vector<8x896xf32>
    %99 = vector.broadcast %97 : vector<1x896xf32> to vector<8x896xf32>
    %100 = arith.mulf %98, %99 : vector<8x896xf32>
    %101 = arith.addf %95, %100 : vector<8x896xf32>
    %102 = vector.extract_strided_slice %0 {offsets = [0, 3], sizes = [8, 1], strides = [1, 1]} : vector<8x5xf32> to vector<8x1xf32>
    %103 = vector.extract_strided_slice %81 {offsets = [3, 0], sizes = [1, 896], strides = [1, 1]} : vector<5x896xf32> to vector<1x896xf32>
    %104 = vector.broadcast %102 : vector<8x1xf32> to vector<8x896xf32>
    %105 = vector.broadcast %103 : vector<1x896xf32> to vector<8x896xf32>
    %106 = arith.mulf %104, %105 : vector<8x896xf32>
    %107 = arith.addf %101, %106 : vector<8x896xf32>
    %108 = vector.extract_strided_slice %0 {offsets = [0, 4], sizes = [8, 1], strides = [1, 1]} : vector<8x5xf32> to vector<8x1xf32>
    %109 = vector.extract_strided_slice %81 {offsets = [4, 0], sizes = [1, 896], strides = [1, 1]} : vector<5x896xf32> to vector<1x896xf32>
    %110 = vector.broadcast %108 : vector<8x1xf32> to vector<8x896xf32>
    %111 = vector.broadcast %109 : vector<1x896xf32> to vector<8x896xf32>
    %112 = arith.mulf %110, %111 : vector<8x896xf32>
    %113 = arith.addf %107, %112 : vector<8x896xf32>
    %114 = math.tanh %113 : vector<8x896xf32>
    %115 = vector.extract_strided_slice %3 {offsets = [0, 2], sizes = [8, 1], strides = [1, 1]} : vector<8x10xf32> to vector<8x1xf32>
    %116 = vector.broadcast %115 : vector<8x1xf32> to vector<8x896xf32>
    %117 = arith.mulf %116, %114 : vector<8x896xf32>
    %118 = arith.addf %80, %117 : vector<8x896xf32>
    %c0_14 = arith.constant 0 : index
    %c2688 = arith.constant 2688 : index
    %119 = vector.load %arg3[%c0_14, %c2688] : memref<5x8960xf32, #tpu.memory_space<vmem>>, vector<5x896xf32>
    %c0_15 = arith.constant 0 : index
    %c2688_16 = arith.constant 2688 : index
    %120 = vector.load %arg4[%c0_15, %c2688_16] : memref<1x8960xf32, #tpu.memory_space<vmem>>, vector<1x896xf32>
    %121 = vector.extract_strided_slice %0 {offsets = [0, 0], sizes = [8, 1], strides = [1, 1]} : vector<8x5xf32> to vector<8x1xf32>
    %122 = vector.extract_strided_slice %119 {offsets = [0, 0], sizes = [1, 896], strides = [1, 1]} : vector<5x896xf32> to vector<1x896xf32>
    %123 = vector.broadcast %121 : vector<8x1xf32> to vector<8x896xf32>
    %124 = vector.broadcast %122 : vector<1x896xf32> to vector<8x896xf32>
    %125 = arith.mulf %123, %124 : vector<8x896xf32>
    %126 = vector.broadcast %120 : vector<1x896xf32> to vector<8x896xf32>
    %127 = arith.addf %126, %125 : vector<8x896xf32>
    %128 = vector.extract_strided_slice %0 {offsets = [0, 1], sizes = [8, 1], strides = [1, 1]} : vector<8x5xf32> to vector<8x1xf32>
    %129 = vector.extract_strided_slice %119 {offsets = [1, 0], sizes = [1, 896], strides = [1, 1]} : vector<5x896xf32> to vector<1x896xf32>
    %130 = vector.broadcast %128 : vector<8x1xf32> to vector<8x896xf32>
    %131 = vector.broadcast %129 : vector<1x896xf32> to vector<8x896xf32>
    %132 = arith.mulf %130, %131 : vector<8x896xf32>
    %133 = arith.addf %127, %132 : vector<8x896xf32>
    %134 = vector.extract_strided_slice %0 {offsets = [0, 2], sizes = [8, 1], strides = [1, 1]} : vector<8x5xf32> to vector<8x1xf32>
    %135 = vector.extract_strided_slice %119 {offsets = [2, 0], sizes = [1, 896], strides = [1, 1]} : vector<5x896xf32> to vector<1x896xf32>
    %136 = vector.broadcast %134 : vector<8x1xf32> to vector<8x896xf32>
    %137 = vector.broadcast %135 : vector<1x896xf32> to vector<8x896xf32>
    %138 = arith.mulf %136, %137 : vector<8x896xf32>
    %139 = arith.addf %133, %138 : vector<8x896xf32>
    %140 = vector.extract_strided_slice %0 {offsets = [0, 3], sizes = [8, 1], strides = [1, 1]} : vector<8x5xf32> to vector<8x1xf32>
    %141 = vector.extract_strided_slice %119 {offsets = [3, 0], sizes = [1, 896], strides = [1, 1]} : vector<5x896xf32> to vector<1x896xf32>
    %142 = vector.broadcast %140 : vector<8x1xf32> to vector<8x896xf32>
    %143 = vector.broadcast %141 : vector<1x896xf32> to vector<8x896xf32>
    %144 = arith.mulf %142, %143 : vector<8x896xf32>
    %145 = arith.addf %139, %144 : vector<8x896xf32>
    %146 = vector.extract_strided_slice %0 {offsets = [0, 4], sizes = [8, 1], strides = [1, 1]} : vector<8x5xf32> to vector<8x1xf32>
    %147 = vector.extract_strided_slice %119 {offsets = [4, 0], sizes = [1, 896], strides = [1, 1]} : vector<5x896xf32> to vector<1x896xf32>
    %148 = vector.broadcast %146 : vector<8x1xf32> to vector<8x896xf32>
    %149 = vector.broadcast %147 : vector<1x896xf32> to vector<8x896xf32>
    %150 = arith.mulf %148, %149 : vector<8x896xf32>
    %151 = arith.addf %145, %150 : vector<8x896xf32>
    %152 = math.tanh %151 : vector<8x896xf32>
    %153 = vector.extract_strided_slice %3 {offsets = [0, 3], sizes = [8, 1], strides = [1, 1]} : vector<8x10xf32> to vector<8x1xf32>
    %154 = vector.broadcast %153 : vector<8x1xf32> to vector<8x896xf32>
    %155 = arith.mulf %154, %152 : vector<8x896xf32>
    %156 = arith.addf %118, %155 : vector<8x896xf32>
    %c0_17 = arith.constant 0 : index
    %c3584 = arith.constant 3584 : index
    %157 = vector.load %arg3[%c0_17, %c3584] : memref<5x8960xf32, #tpu.memory_space<vmem>>, vector<5x896xf32>
    %c0_18 = arith.constant 0 : index
    %c3584_19 = arith.constant 3584 : index
    %158 = vector.load %arg4[%c0_18, %c3584_19] : memref<1x8960xf32, #tpu.memory_space<vmem>>, vector<1x896xf32>
    %159 = vector.extract_strided_slice %0 {offsets = [0, 0], sizes = [8, 1], strides = [1, 1]} : vector<8x5xf32> to vector<8x1xf32>
    %160 = vector.extract_strided_slice %157 {offsets = [0, 0], sizes = [1, 896], strides = [1, 1]} : vector<5x896xf32> to vector<1x896xf32>
    %161 = vector.broadcast %159 : vector<8x1xf32> to vector<8x896xf32>
    %162 = vector.broadcast %160 : vector<1x896xf32> to vector<8x896xf32>
    %163 = arith.mulf %161, %162 : vector<8x896xf32>
    %164 = vector.broadcast %158 : vector<1x896xf32> to vector<8x896xf32>
    %165 = arith.addf %164, %163 : vector<8x896xf32>
    %166 = vector.extract_strided_slice %0 {offsets = [0, 1], sizes = [8, 1], strides = [1, 1]} : vector<8x5xf32> to vector<8x1xf32>
    %167 = vector.extract_strided_slice %157 {offsets = [1, 0], sizes = [1, 896], strides = [1, 1]} : vector<5x896xf32> to vector<1x896xf32>
    %168 = vector.broadcast %166 : vector<8x1xf32> to vector<8x896xf32>
    %169 = vector.broadcast %167 : vector<1x896xf32> to vector<8x896xf32>
    %170 = arith.mulf %168, %169 : vector<8x896xf32>
    %171 = arith.addf %165, %170 : vector<8x896xf32>
    %172 = vector.extract_strided_slice %0 {offsets = [0, 2], sizes = [8, 1], strides = [1, 1]} : vector<8x5xf32> to vector<8x1xf32>
    %173 = vector.extract_strided_slice %157 {offsets = [2, 0], sizes = [1, 896], strides = [1, 1]} : vector<5x896xf32> to vector<1x896xf32>
    %174 = vector.broadcast %172 : vector<8x1xf32> to vector<8x896xf32>
    %175 = vector.broadcast %173 : vector<1x896xf32> to vector<8x896xf32>
    %176 = arith.mulf %174, %175 : vector<8x896xf32>
    %177 = arith.addf %171, %176 : vector<8x896xf32>
    %178 = vector.extract_strided_slice %0 {offsets = [0, 3], sizes = [8, 1], strides = [1, 1]} : vector<8x5xf32> to vector<8x1xf32>
    %179 = vector.extract_strided_slice %157 {offsets = [3, 0], sizes = [1, 896], strides = [1, 1]} : vector<5x896xf32> to vector<1x896xf32>
    %180 = vector.broadcast %178 : vector<8x1xf32> to vector<8x896xf32>
    %181 = vector.broadcast %179 : vector<1x896xf32> to vector<8x896xf32>
    %182 = arith.mulf %180, %181 : vector<8x896xf32>
    %183 = arith.addf %177, %182 : vector<8x896xf32>
    %184 = vector.extract_strided_slice %0 {offsets = [0, 4], sizes = [8, 1], strides = [1, 1]} : vector<8x5xf32> to vector<8x1xf32>
    %185 = vector.extract_strided_slice %157 {offsets = [4, 0], sizes = [1, 896], strides = [1, 1]} : vector<5x896xf32> to vector<1x896xf32>
    %186 = vector.broadcast %184 : vector<8x1xf32> to vector<8x896xf32>
    %187 = vector.broadcast %185 : vector<1x896xf32> to vector<8x896xf32>
    %188 = arith.mulf %186, %187 : vector<8x896xf32>
    %189 = arith.addf %183, %188 : vector<8x896xf32>
    %190 = math.tanh %189 : vector<8x896xf32>
    %191 = vector.extract_strided_slice %3 {offsets = [0, 4], sizes = [8, 1], strides = [1, 1]} : vector<8x10xf32> to vector<8x1xf32>
    %192 = vector.broadcast %191 : vector<8x1xf32> to vector<8x896xf32>
    %193 = arith.mulf %192, %190 : vector<8x896xf32>
    %194 = arith.addf %156, %193 : vector<8x896xf32>
    %c0_20 = arith.constant 0 : index
    %c4480 = arith.constant 4480 : index
    %195 = vector.load %arg3[%c0_20, %c4480] : memref<5x8960xf32, #tpu.memory_space<vmem>>, vector<5x896xf32>
    %c0_21 = arith.constant 0 : index
    %c4480_22 = arith.constant 4480 : index
    %196 = vector.load %arg4[%c0_21, %c4480_22] : memref<1x8960xf32, #tpu.memory_space<vmem>>, vector<1x896xf32>
    %197 = vector.extract_strided_slice %0 {offsets = [0, 0], sizes = [8, 1], strides = [1, 1]} : vector<8x5xf32> to vector<8x1xf32>
    %198 = vector.extract_strided_slice %195 {offsets = [0, 0], sizes = [1, 896], strides = [1, 1]} : vector<5x896xf32> to vector<1x896xf32>
    %199 = vector.broadcast %197 : vector<8x1xf32> to vector<8x896xf32>
    %200 = vector.broadcast %198 : vector<1x896xf32> to vector<8x896xf32>
    %201 = arith.mulf %199, %200 : vector<8x896xf32>
    %202 = vector.broadcast %196 : vector<1x896xf32> to vector<8x896xf32>
    %203 = arith.addf %202, %201 : vector<8x896xf32>
    %204 = vector.extract_strided_slice %0 {offsets = [0, 1], sizes = [8, 1], strides = [1, 1]} : vector<8x5xf32> to vector<8x1xf32>
    %205 = vector.extract_strided_slice %195 {offsets = [1, 0], sizes = [1, 896], strides = [1, 1]} : vector<5x896xf32> to vector<1x896xf32>
    %206 = vector.broadcast %204 : vector<8x1xf32> to vector<8x896xf32>
    %207 = vector.broadcast %205 : vector<1x896xf32> to vector<8x896xf32>
    %208 = arith.mulf %206, %207 : vector<8x896xf32>
    %209 = arith.addf %203, %208 : vector<8x896xf32>
    %210 = vector.extract_strided_slice %0 {offsets = [0, 2], sizes = [8, 1], strides = [1, 1]} : vector<8x5xf32> to vector<8x1xf32>
    %211 = vector.extract_strided_slice %195 {offsets = [2, 0], sizes = [1, 896], strides = [1, 1]} : vector<5x896xf32> to vector<1x896xf32>
    %212 = vector.broadcast %210 : vector<8x1xf32> to vector<8x896xf32>
    %213 = vector.broadcast %211 : vector<1x896xf32> to vector<8x896xf32>
    %214 = arith.mulf %212, %213 : vector<8x896xf32>
    %215 = arith.addf %209, %214 : vector<8x896xf32>
    %216 = vector.extract_strided_slice %0 {offsets = [0, 3], sizes = [8, 1], strides = [1, 1]} : vector<8x5xf32> to vector<8x1xf32>
    %217 = vector.extract_strided_slice %195 {offsets = [3, 0], sizes = [1, 896], strides = [1, 1]} : vector<5x896xf32> to vector<1x896xf32>
    %218 = vector.broadcast %216 : vector<8x1xf32> to vector<8x896xf32>
    %219 = vector.broadcast %217 : vector<1x896xf32> to vector<8x896xf32>
    %220 = arith.mulf %218, %219 : vector<8x896xf32>
    %221 = arith.addf %215, %220 : vector<8x896xf32>
    %222 = vector.extract_strided_slice %0 {offsets = [0, 4], sizes = [8, 1], strides = [1, 1]} : vector<8x5xf32> to vector<8x1xf32>
    %223 = vector.extract_strided_slice %195 {offsets = [4, 0], sizes = [1, 896], strides = [1, 1]} : vector<5x896xf32> to vector<1x896xf32>
    %224 = vector.broadcast %222 : vector<8x1xf32> to vector<8x896xf32>
    %225 = vector.broadcast %223 : vector<1x896xf32> to vector<8x896xf32>
    %226 = arith.mulf %224, %225 : vector<8x896xf32>
    %227 = arith.addf %221, %226 : vector<8x896xf32>
    %228 = math.tanh %227 : vector<8x896xf32>
    %229 = vector.extract_strided_slice %3 {offsets = [0, 5], sizes = [8, 1], strides = [1, 1]} : vector<8x10xf32> to vector<8x1xf32>
    %230 = vector.broadcast %229 : vector<8x1xf32> to vector<8x896xf32>
    %231 = arith.mulf %230, %228 : vector<8x896xf32>
    %232 = arith.addf %194, %231 : vector<8x896xf32>
    %c0_23 = arith.constant 0 : index
    %c5376 = arith.constant 5376 : index
    %233 = vector.load %arg3[%c0_23, %c5376] : memref<5x8960xf32, #tpu.memory_space<vmem>>, vector<5x896xf32>
    %c0_24 = arith.constant 0 : index
    %c5376_25 = arith.constant 5376 : index
    %234 = vector.load %arg4[%c0_24, %c5376_25] : memref<1x8960xf32, #tpu.memory_space<vmem>>, vector<1x896xf32>
    %235 = vector.extract_strided_slice %0 {offsets = [0, 0], sizes = [8, 1], strides = [1, 1]} : vector<8x5xf32> to vector<8x1xf32>
    %236 = vector.extract_strided_slice %233 {offsets = [0, 0], sizes = [1, 896], strides = [1, 1]} : vector<5x896xf32> to vector<1x896xf32>
    %237 = vector.broadcast %235 : vector<8x1xf32> to vector<8x896xf32>
    %238 = vector.broadcast %236 : vector<1x896xf32> to vector<8x896xf32>
    %239 = arith.mulf %237, %238 : vector<8x896xf32>
    %240 = vector.broadcast %234 : vector<1x896xf32> to vector<8x896xf32>
    %241 = arith.addf %240, %239 : vector<8x896xf32>
    %242 = vector.extract_strided_slice %0 {offsets = [0, 1], sizes = [8, 1], strides = [1, 1]} : vector<8x5xf32> to vector<8x1xf32>
    %243 = vector.extract_strided_slice %233 {offsets = [1, 0], sizes = [1, 896], strides = [1, 1]} : vector<5x896xf32> to vector<1x896xf32>
    %244 = vector.broadcast %242 : vector<8x1xf32> to vector<8x896xf32>
    %245 = vector.broadcast %243 : vector<1x896xf32> to vector<8x896xf32>
    %246 = arith.mulf %244, %245 : vector<8x896xf32>
    %247 = arith.addf %241, %246 : vector<8x896xf32>
    %248 = vector.extract_strided_slice %0 {offsets = [0, 2], sizes = [8, 1], strides = [1, 1]} : vector<8x5xf32> to vector<8x1xf32>
    %249 = vector.extract_strided_slice %233 {offsets = [2, 0], sizes = [1, 896], strides = [1, 1]} : vector<5x896xf32> to vector<1x896xf32>
    %250 = vector.broadcast %248 : vector<8x1xf32> to vector<8x896xf32>
    %251 = vector.broadcast %249 : vector<1x896xf32> to vector<8x896xf32>
    %252 = arith.mulf %250, %251 : vector<8x896xf32>
    %253 = arith.addf %247, %252 : vector<8x896xf32>
    %254 = vector.extract_strided_slice %0 {offsets = [0, 3], sizes = [8, 1], strides = [1, 1]} : vector<8x5xf32> to vector<8x1xf32>
    %255 = vector.extract_strided_slice %233 {offsets = [3, 0], sizes = [1, 896], strides = [1, 1]} : vector<5x896xf32> to vector<1x896xf32>
    %256 = vector.broadcast %254 : vector<8x1xf32> to vector<8x896xf32>
    %257 = vector.broadcast %255 : vector<1x896xf32> to vector<8x896xf32>
    %258 = arith.mulf %256, %257 : vector<8x896xf32>
    %259 = arith.addf %253, %258 : vector<8x896xf32>
    %260 = vector.extract_strided_slice %0 {offsets = [0, 4], sizes = [8, 1], strides = [1, 1]} : vector<8x5xf32> to vector<8x1xf32>
    %261 = vector.extract_strided_slice %233 {offsets = [4, 0], sizes = [1, 896], strides = [1, 1]} : vector<5x896xf32> to vector<1x896xf32>
    %262 = vector.broadcast %260 : vector<8x1xf32> to vector<8x896xf32>
    %263 = vector.broadcast %261 : vector<1x896xf32> to vector<8x896xf32>
    %264 = arith.mulf %262, %263 : vector<8x896xf32>
    %265 = arith.addf %259, %264 : vector<8x896xf32>
    %266 = math.tanh %265 : vector<8x896xf32>
    %267 = vector.extract_strided_slice %3 {offsets = [0, 6], sizes = [8, 1], strides = [1, 1]} : vector<8x10xf32> to vector<8x1xf32>
    %268 = vector.broadcast %267 : vector<8x1xf32> to vector<8x896xf32>
    %269 = arith.mulf %268, %266 : vector<8x896xf32>
    %270 = arith.addf %232, %269 : vector<8x896xf32>
    %c0_26 = arith.constant 0 : index
    %c6272 = arith.constant 6272 : index
    %271 = vector.load %arg3[%c0_26, %c6272] : memref<5x8960xf32, #tpu.memory_space<vmem>>, vector<5x896xf32>
    %c0_27 = arith.constant 0 : index
    %c6272_28 = arith.constant 6272 : index
    %272 = vector.load %arg4[%c0_27, %c6272_28] : memref<1x8960xf32, #tpu.memory_space<vmem>>, vector<1x896xf32>
    %273 = vector.extract_strided_slice %0 {offsets = [0, 0], sizes = [8, 1], strides = [1, 1]} : vector<8x5xf32> to vector<8x1xf32>
    %274 = vector.extract_strided_slice %271 {offsets = [0, 0], sizes = [1, 896], strides = [1, 1]} : vector<5x896xf32> to vector<1x896xf32>
    %275 = vector.broadcast %273 : vector<8x1xf32> to vector<8x896xf32>
    %276 = vector.broadcast %274 : vector<1x896xf32> to vector<8x896xf32>
    %277 = arith.mulf %275, %276 : vector<8x896xf32>
    %278 = vector.broadcast %272 : vector<1x896xf32> to vector<8x896xf32>
    %279 = arith.addf %278, %277 : vector<8x896xf32>
    %280 = vector.extract_strided_slice %0 {offsets = [0, 1], sizes = [8, 1], strides = [1, 1]} : vector<8x5xf32> to vector<8x1xf32>
    %281 = vector.extract_strided_slice %271 {offsets = [1, 0], sizes = [1, 896], strides = [1, 1]} : vector<5x896xf32> to vector<1x896xf32>
    %282 = vector.broadcast %280 : vector<8x1xf32> to vector<8x896xf32>
    %283 = vector.broadcast %281 : vector<1x896xf32> to vector<8x896xf32>
    %284 = arith.mulf %282, %283 : vector<8x896xf32>
    %285 = arith.addf %279, %284 : vector<8x896xf32>
    %286 = vector.extract_strided_slice %0 {offsets = [0, 2], sizes = [8, 1], strides = [1, 1]} : vector<8x5xf32> to vector<8x1xf32>
    %287 = vector.extract_strided_slice %271 {offsets = [2, 0], sizes = [1, 896], strides = [1, 1]} : vector<5x896xf32> to vector<1x896xf32>
    %288 = vector.broadcast %286 : vector<8x1xf32> to vector<8x896xf32>
    %289 = vector.broadcast %287 : vector<1x896xf32> to vector<8x896xf32>
    %290 = arith.mulf %288, %289 : vector<8x896xf32>
    %291 = arith.addf %285, %290 : vector<8x896xf32>
    %292 = vector.extract_strided_slice %0 {offsets = [0, 3], sizes = [8, 1], strides = [1, 1]} : vector<8x5xf32> to vector<8x1xf32>
    %293 = vector.extract_strided_slice %271 {offsets = [3, 0], sizes = [1, 896], strides = [1, 1]} : vector<5x896xf32> to vector<1x896xf32>
    %294 = vector.broadcast %292 : vector<8x1xf32> to vector<8x896xf32>
    %295 = vector.broadcast %293 : vector<1x896xf32> to vector<8x896xf32>
    %296 = arith.mulf %294, %295 : vector<8x896xf32>
    %297 = arith.addf %291, %296 : vector<8x896xf32>
    %298 = vector.extract_strided_slice %0 {offsets = [0, 4], sizes = [8, 1], strides = [1, 1]} : vector<8x5xf32> to vector<8x1xf32>
    %299 = vector.extract_strided_slice %271 {offsets = [4, 0], sizes = [1, 896], strides = [1, 1]} : vector<5x896xf32> to vector<1x896xf32>
    %300 = vector.broadcast %298 : vector<8x1xf32> to vector<8x896xf32>
    %301 = vector.broadcast %299 : vector<1x896xf32> to vector<8x896xf32>
    %302 = arith.mulf %300, %301 : vector<8x896xf32>
    %303 = arith.addf %297, %302 : vector<8x896xf32>
    %304 = math.tanh %303 : vector<8x896xf32>
    %305 = vector.extract_strided_slice %3 {offsets = [0, 7], sizes = [8, 1], strides = [1, 1]} : vector<8x10xf32> to vector<8x1xf32>
    %306 = vector.broadcast %305 : vector<8x1xf32> to vector<8x896xf32>
    %307 = arith.mulf %306, %304 : vector<8x896xf32>
    %308 = arith.addf %270, %307 : vector<8x896xf32>
    %c0_29 = arith.constant 0 : index
    %c7168 = arith.constant 7168 : index
    %309 = vector.load %arg3[%c0_29, %c7168] : memref<5x8960xf32, #tpu.memory_space<vmem>>, vector<5x896xf32>
    %c0_30 = arith.constant 0 : index
    %c7168_31 = arith.constant 7168 : index
    %310 = vector.load %arg4[%c0_30, %c7168_31] : memref<1x8960xf32, #tpu.memory_space<vmem>>, vector<1x896xf32>
    %311 = vector.extract_strided_slice %0 {offsets = [0, 0], sizes = [8, 1], strides = [1, 1]} : vector<8x5xf32> to vector<8x1xf32>
    %312 = vector.extract_strided_slice %309 {offsets = [0, 0], sizes = [1, 896], strides = [1, 1]} : vector<5x896xf32> to vector<1x896xf32>
    %313 = vector.broadcast %311 : vector<8x1xf32> to vector<8x896xf32>
    %314 = vector.broadcast %312 : vector<1x896xf32> to vector<8x896xf32>
    %315 = arith.mulf %313, %314 : vector<8x896xf32>
    %316 = vector.broadcast %310 : vector<1x896xf32> to vector<8x896xf32>
    %317 = arith.addf %316, %315 : vector<8x896xf32>
    %318 = vector.extract_strided_slice %0 {offsets = [0, 1], sizes = [8, 1], strides = [1, 1]} : vector<8x5xf32> to vector<8x1xf32>
    %319 = vector.extract_strided_slice %309 {offsets = [1, 0], sizes = [1, 896], strides = [1, 1]} : vector<5x896xf32> to vector<1x896xf32>
    %320 = vector.broadcast %318 : vector<8x1xf32> to vector<8x896xf32>
    %321 = vector.broadcast %319 : vector<1x896xf32> to vector<8x896xf32>
    %322 = arith.mulf %320, %321 : vector<8x896xf32>
    %323 = arith.addf %317, %322 : vector<8x896xf32>
    %324 = vector.extract_strided_slice %0 {offsets = [0, 2], sizes = [8, 1], strides = [1, 1]} : vector<8x5xf32> to vector<8x1xf32>
    %325 = vector.extract_strided_slice %309 {offsets = [2, 0], sizes = [1, 896], strides = [1, 1]} : vector<5x896xf32> to vector<1x896xf32>
    %326 = vector.broadcast %324 : vector<8x1xf32> to vector<8x896xf32>
    %327 = vector.broadcast %325 : vector<1x896xf32> to vector<8x896xf32>
    %328 = arith.mulf %326, %327 : vector<8x896xf32>
    %329 = arith.addf %323, %328 : vector<8x896xf32>
    %330 = vector.extract_strided_slice %0 {offsets = [0, 3], sizes = [8, 1], strides = [1, 1]} : vector<8x5xf32> to vector<8x1xf32>
    %331 = vector.extract_strided_slice %309 {offsets = [3, 0], sizes = [1, 896], strides = [1, 1]} : vector<5x896xf32> to vector<1x896xf32>
    %332 = vector.broadcast %330 : vector<8x1xf32> to vector<8x896xf32>
    %333 = vector.broadcast %331 : vector<1x896xf32> to vector<8x896xf32>
    %334 = arith.mulf %332, %333 : vector<8x896xf32>
    %335 = arith.addf %329, %334 : vector<8x896xf32>
    %336 = vector.extract_strided_slice %0 {offsets = [0, 4], sizes = [8, 1], strides = [1, 1]} : vector<8x5xf32> to vector<8x1xf32>
    %337 = vector.extract_strided_slice %309 {offsets = [4, 0], sizes = [1, 896], strides = [1, 1]} : vector<5x896xf32> to vector<1x896xf32>
    %338 = vector.broadcast %336 : vector<8x1xf32> to vector<8x896xf32>
    %339 = vector.broadcast %337 : vector<1x896xf32> to vector<8x896xf32>
    %340 = arith.mulf %338, %339 : vector<8x896xf32>
    %341 = arith.addf %335, %340 : vector<8x896xf32>
    %342 = math.tanh %341 : vector<8x896xf32>
    %343 = vector.extract_strided_slice %3 {offsets = [0, 8], sizes = [8, 1], strides = [1, 1]} : vector<8x10xf32> to vector<8x1xf32>
    %344 = vector.broadcast %343 : vector<8x1xf32> to vector<8x896xf32>
    %345 = arith.mulf %344, %342 : vector<8x896xf32>
    %346 = arith.addf %308, %345 : vector<8x896xf32>
    %c0_32 = arith.constant 0 : index
    %c8064 = arith.constant 8064 : index
    %347 = vector.load %arg3[%c0_32, %c8064] : memref<5x8960xf32, #tpu.memory_space<vmem>>, vector<5x896xf32>
    %c0_33 = arith.constant 0 : index
    %c8064_34 = arith.constant 8064 : index
    %348 = vector.load %arg4[%c0_33, %c8064_34] : memref<1x8960xf32, #tpu.memory_space<vmem>>, vector<1x896xf32>
    %349 = vector.extract_strided_slice %0 {offsets = [0, 0], sizes = [8, 1], strides = [1, 1]} : vector<8x5xf32> to vector<8x1xf32>
    %350 = vector.extract_strided_slice %347 {offsets = [0, 0], sizes = [1, 896], strides = [1, 1]} : vector<5x896xf32> to vector<1x896xf32>
    %351 = vector.broadcast %349 : vector<8x1xf32> to vector<8x896xf32>
    %352 = vector.broadcast %350 : vector<1x896xf32> to vector<8x896xf32>
    %353 = arith.mulf %351, %352 : vector<8x896xf32>
    %354 = vector.broadcast %348 : vector<1x896xf32> to vector<8x896xf32>
    %355 = arith.addf %354, %353 : vector<8x896xf32>
    %356 = vector.extract_strided_slice %0 {offsets = [0, 1], sizes = [8, 1], strides = [1, 1]} : vector<8x5xf32> to vector<8x1xf32>
    %357 = vector.extract_strided_slice %347 {offsets = [1, 0], sizes = [1, 896], strides = [1, 1]} : vector<5x896xf32> to vector<1x896xf32>
    %358 = vector.broadcast %356 : vector<8x1xf32> to vector<8x896xf32>
    %359 = vector.broadcast %357 : vector<1x896xf32> to vector<8x896xf32>
    %360 = arith.mulf %358, %359 : vector<8x896xf32>
    %361 = arith.addf %355, %360 : vector<8x896xf32>
    %362 = vector.extract_strided_slice %0 {offsets = [0, 2], sizes = [8, 1], strides = [1, 1]} : vector<8x5xf32> to vector<8x1xf32>
    %363 = vector.extract_strided_slice %347 {offsets = [2, 0], sizes = [1, 896], strides = [1, 1]} : vector<5x896xf32> to vector<1x896xf32>
    %364 = vector.broadcast %362 : vector<8x1xf32> to vector<8x896xf32>
    %365 = vector.broadcast %363 : vector<1x896xf32> to vector<8x896xf32>
    %366 = arith.mulf %364, %365 : vector<8x896xf32>
    %367 = arith.addf %361, %366 : vector<8x896xf32>
    %368 = vector.extract_strided_slice %0 {offsets = [0, 3], sizes = [8, 1], strides = [1, 1]} : vector<8x5xf32> to vector<8x1xf32>
    %369 = vector.extract_strided_slice %347 {offsets = [3, 0], sizes = [1, 896], strides = [1, 1]} : vector<5x896xf32> to vector<1x896xf32>
    %370 = vector.broadcast %368 : vector<8x1xf32> to vector<8x896xf32>
    %371 = vector.broadcast %369 : vector<1x896xf32> to vector<8x896xf32>
    %372 = arith.mulf %370, %371 : vector<8x896xf32>
    %373 = arith.addf %367, %372 : vector<8x896xf32>
    %374 = vector.extract_strided_slice %0 {offsets = [0, 4], sizes = [8, 1], strides = [1, 1]} : vector<8x5xf32> to vector<8x1xf32>
    %375 = vector.extract_strided_slice %347 {offsets = [4, 0], sizes = [1, 896], strides = [1, 1]} : vector<5x896xf32> to vector<1x896xf32>
    %376 = vector.broadcast %374 : vector<8x1xf32> to vector<8x896xf32>
    %377 = vector.broadcast %375 : vector<1x896xf32> to vector<8x896xf32>
    %378 = arith.mulf %376, %377 : vector<8x896xf32>
    %379 = arith.addf %373, %378 : vector<8x896xf32>
    %380 = math.tanh %379 : vector<8x896xf32>
    %381 = vector.extract_strided_slice %3 {offsets = [0, 9], sizes = [8, 1], strides = [1, 1]} : vector<8x10xf32> to vector<8x1xf32>
    %382 = vector.broadcast %381 : vector<8x1xf32> to vector<8x896xf32>
    %383 = arith.mulf %382, %380 : vector<8x896xf32>
    %384 = arith.addf %346, %383 : vector<8x896xf32>
    %385 = vector.broadcast %5 : vector<8x1xf32> to vector<8x896xf32>
    %386 = arith.addf %384, %385 : vector<8x896xf32>
    %c0_35 = arith.constant 0 : index
    %c0_36 = arith.constant 0 : index
    %387 = vector.load %arg5[%c0_35, %c0_36] : memref<8x896xf32, #tpu.memory_space<vmem>>, vector<8x896xf32>
    tpu.vector_store %arg5[%c0_35, %c0_36], %386 {strides = array<i32>} : memref<8x896xf32, #tpu.memory_space<vmem>>, vector<8x896xf32>,
    return
  }
  func.func @transform_0(%arg0: i32) -> (i32, i32) {
    %c0_i32 = arith.constant 0 : i32
    %c0_i32_0 = arith.constant 0 : i32
    return %arg0, %c0_i32 : i32, i32
  }
  func.func @transform_1(%arg0: i32) -> (i32, i32) {
    %c0_i32 = arith.constant 0 : i32
    %c0_i32_0 = arith.constant 0 : i32
    return %arg0, %c0_i32 : i32, i32
  }
  func.func @transform_2(%arg0: i32) -> (i32, i32) {
    %c0_i32 = arith.constant 0 : i32
    %c0_i32_0 = arith.constant 0 : i32
    %c0_i32_1 = arith.constant 0 : i32
    return %c0_i32, %c0_i32_0 : i32, i32
  }
  func.func @transform_3(%arg0: i32) -> (i32, i32) {
    %c0_i32 = arith.constant 0 : i32
    %c0_i32_0 = arith.constant 0 : i32
    %c0_i32_1 = arith.constant 0 : i32
    return %c0_i32, %c0_i32_0 : i32, i32
  }
  func.func @transform_4(%arg0: i32) -> (i32, i32) {
    %c0_i32 = arith.constant 0 : i32
    %c0_i32_0 = arith.constant 0 : i32
    return %arg0, %c0_i32 : i32, i32
  }
}

</mosaic_0001>

<bundles_post_ra>
// kernel: tpu_custom_call.1
= control target key start
LH: loop header
LB: loop body
LE: loop exit
PB: predicated region body
PF: predicated region fallthrough
CT: control target
= control target key end

     0   :  { %9 = vsyncpa [#allocation3], 0  ;;  %s5756_s0 = inlined_call_operand.hbm [shape: f32[8,5], index: 0, kind: input, shape index: {}]   ;;  %s5757_s1 = inlined_call_operand.hbm [shape: f32[8,10], index: 1, kind: input, shape index: {}]   ;;  %s5758_s2 = inlined_call_operand.hbm [shape: f32[5,8960], index: 2, kind: input, shape index: {}]   ;;  %s5759_s3 = inlined_call_operand.hbm [shape: f32[1,8960], index: 3, kind: input, shape index: {}]   ;;  %s5760_s4 = inlined_call_operand.hbm [shape: f32[8,896], index: 4, kind: output, shape index: {}]  }
   0x1   :  { %10 = vsyncpa [#allocation6], 0 }
   0x2   :  { %11 = vsyncpa [#allocation9], 0 }
   0x3   :  { %12 = vsyncpa [#allocation4], 0  ;;  %s3198_s15 = smov [#allocation5]   ;;  %s3199_s17 = smov [#allocation2]  }
   0x4   :  { %s29_s16 = sshll.u32 %s3198_s15, 4  ;;  %s19_s18 = sshll.u32 %s3199_s17, 4  ;;  %s30_s16 = int_to_ptr.vmem [resolvable:$true] %s29_s16  ;;  %s20_s18 = int_to_ptr.vmem [resolvable:$true] %s19_s18 }
   0x5   :  { %s3080_s21 = scalar_lea.hbm %s5757_s1, 128 }
   0x6   :  { %p3081_p0 = scmp.ne.s32.totalorder %s5757_s1, %s3080_s21  ;;  %p3084_p1 = scmp.lt.u32.totalorder %s3080_s21, %s5757_s1 }
   0x8   :  { %p3086_p2 = pnand %p3084_p1, %p3081_p0 }
   0xa   :  { %3089 = shalt.err (!%p3086_p2)
}
   0xb   :  { %s3090_s26 = scalar_lea.vmem %s30_s16, 128  ;;  %p3095_p4 = scmp.lt.s32.totalorder %s30_s16, %s30_s16 }
   0xc   :  { %p3091_p3 = scmp.ne.s32.totalorder %s30_s16, %s3090_s26  ;;  %p3096_p5 = scmp.lt.s32.totalorder %s3090_s26, %s3090_s26 }
   0xe   :  { %p3097_p6 = por %p3096_p5, %p3095_p4 }
  0x10   :  { %p3098_p7 = pnand %p3097_p6, %p3091_p3 }
  0x12   :  { %3101 = shalt.err (!%p3098_p7)
}
  0x13   :  { %32 = dma.hbm_to_vmem [thread:$0]  %s5757_s1, 128, %s30_s16, [#allocation6]  }
  0x14   :  { %s3102_s5 = scalar_lea.hbm %s5756_s0, 128 }
  0x15   :  { %p3103_p8 = scmp.ne.s32.totalorder %s5756_s0, %s3102_s5  ;;  %p3106_p9 = scmp.lt.u32.totalorder %s3102_s5, %s5756_s0 }
  0x17   :  { %p3108_p10 = pnand %p3106_p9, %p3103_p8 }
  0x19   :  { %3111 = shalt.err (!%p3108_p10)
}
  0x1a   :  { %s3112_s10 = scalar_lea.vmem %s20_s18, 128  ;;  %p3117_p12 = scmp.lt.s32.totalorder %s20_s18, %s20_s18 }
  0x1b   :  { %p3113_p11 = scmp.ne.s32.totalorder %s20_s18, %s3112_s10  ;;  %p3118_p13 = scmp.lt.s32.totalorder %s3112_s10, %s3112_s10 }
  0x1d   :  { %p3119_p0 = por %p3118_p13, %p3117_p12 }
  0x1f   :  { %p3120_p1 = pnand %p3119_p0, %p3113_p11 }
  0x21   :  { %3123 = shalt.err (!%p3120_p1)
}
  0x22   :  { %22 = dma.hbm_to_vmem [thread:$0]  %s5756_s0, 128, %s20_s18, [#allocation3]  }
  0x23   :  { %s3200_s12 = smov [#allocation7]   ;;  %s3201_s14 = smov [#allocation8]  }
  0x24   :  { %s39_s13 = sshll.u32 %s3200_s12, 4  ;;  %s49_s15 = sshll.u32 %s3201_s14, 4  ;;  %s40_s13 = int_to_ptr.vmem [resolvable:$true] %s39_s13  ;;  %s50_s15 = int_to_ptr.vmem [resolvable:$true] %s49_s15 }
  0x25   :  { %s3124_s19 = scalar_lea.hbm %s5758_s2, 8960 }
  0x26   :  { %p3125_p2 = scmp.ne.s32.totalorder %s5758_s2, %s3124_s19  ;;  %p3128_p3 = scmp.lt.u32.totalorder %s3124_s19, %s5758_s2 }
  0x28   :  { %p3130_p4 = pnand %p3128_p3, %p3125_p2 }
  0x2a   :  { %3133 = shalt.err (!%p3130_p4)
}
  0x2b   :  { %s3134_s0 = scalar_lea.vmem %s40_s13, 8960  ;;  %p3139_p6 = scmp.lt.s32.totalorder %s40_s13, %s40_s13 }
  0x2c   :  { %p3135_p5 = scmp.ne.s32.totalorder %s40_s13, %s3134_s0  ;;  %p3140_p7 = scmp.lt.s32.totalorder %s3134_s0, %s3134_s0 }
  0x2e   :  { %p3141_p8 = por %p3140_p7, %p3139_p6 }
  0x30   :  { %p3142_p9 = pnand %p3141_p8, %p3135_p5 }
  0x32   :  { %3145 = shalt.err (!%p3142_p9)
}
  0x33   :  { %42 = dma.hbm_to_vmem [thread:$0]  %s5758_s2, 8960, %s40_s13, [#allocation6]  }
  0x34   :  { %s3146_s27 = scalar_lea.hbm %s5759_s3, 1120 }
  0x35   :  { %p3147_p10 = scmp.ne.s32.totalorder %s5759_s3, %s3146_s27  ;;  %p3150_p11 = scmp.lt.u32.totalorder %s3146_s27, %s5759_s3 }
  0x37   :  { %p3152_p12 = pnand %p3150_p11, %p3147_p10 }
  0x39   :  { %3155 = shalt.err (!%p3152_p12)
}
  0x3a   :  { %s3156_s6 = scalar_lea.vmem %s50_s15, 1120  ;;  %p3161_p0 = scmp.lt.s32.totalorder %s50_s15, %s50_s15 }
  0x3b   :  { %p3157_p13 = scmp.ne.s32.totalorder %s50_s15, %s3156_s6  ;;  %p3162_p1 = scmp.lt.s32.totalorder %s3156_s6, %s3156_s6 }
  0x3d   :  { %p3163_p2 = por %p3162_p1, %p3161_p0 }
  0x3f   :  { %p3164_p3 = pnand %p3163_p2, %p3157_p13 }
  0x41   :  { %3167 = shalt.err (!%p3164_p3)
}
  0x42   :  { %52 = dma.hbm_to_vmem [thread:$0]  %s5759_s3, 1120, %s50_s15, [#allocation9]  }
  0x43   :  { %3190 = dma.done.wait [#allocation3], 128  }
  0x44   :  { %3191 = vsyncadd [#allocation3], 4294967168 }
  0x45   :  { %3192 = dma.done.wait [#allocation6], 9088  }
  0x46   :  { %3193 = vsyncadd [#allocation6], 4294958208 }
  0x47   :  { %3194 = dma.done.wait [#allocation9], 1120  }
  0x48   :  { %3195 = vsyncadd [#allocation9], 4294966176  ;;  %v3202_v0 = vmov 2   ;;  %v3203_v1 = vmov 0   ;;  %v65_v2 = vld [vmem:[#allocation2] sm:$0xff]  ;;  %v66_v3 = vld [vmem:[#allocation5] sm:$0xff]  ;;  %v85_v13 = vlaneseq }
  0x49   :  { %2925 = vset.pattern.permute.xlu1 %v3202_v0  ;;  %2923 = vset.pattern.permute.xlu0 %v3203_v1  ;;  %v3204_v4 = vmov 3   ;;  %v3205_v5 = vmov 1   ;;  %v67_v6 = vmul.f32 0.5, %v66_v3  ;;  %v3206_v7 = vmov 4   ;;  %v3290_v18 = vld [vmem:[#allocation7] sm:$0x1f] }
  0x4a   :  { %210 = vperm.xlu1 %2925, %v65_v2   ;;  %82 = vperm.xlu0 %2923, %v65_v2   ;;  %v3207_v8 = vmov 6   ;;  %v3208_v9 = vmov 8   ;;  %v3209_v10 = vmov 5   ;;  %v3210_v11 = vmov 9   ;;  %v3292_v19 = vld [vmem:[#allocation7 + $0x8] sm:$0x1f] }
  0x4b   :  { %v3211_v12 = vmov 7   ;;  %vm68_vm0 = vcmask 80896   ;;  %v86_v15 = vshrl.u32 %v85_v13, 7  ;;  %v3294_v20 = vld [vmem:[#allocation7 + $0x10] sm:$0x1f]  ;;  %v3598_v59 = vld [vmem:[#allocation8 + $0xe] sm:$0xff] }
  0x4c   :  { %v69_v14 = vsel %vm68_vm0, %v67_v6, 0.0  ;;  %v3298_v22 = vld [vmem:[#allocation7 + $0x18] sm:$0x1f]  ;;  %v3300_v23 = vld [vmem:[#allocation8] sm:$0xff]  ;;  %v3310_v28 = vld [vmem:[#allocation7 + $0x20] sm:$0x1f] }
  0x4d   :  { %v3286_v16 = vsub.s32 0, %v86_v15  ;;  %v3288_v17 = vsub.s32 2, %v86_v15  ;;  %v3296_v21 = vsub.s32 1, %v86_v15  ;;  %v3304_v25 = vsub.s32 3, %v86_v15  ;;  %v3312_v29 = vld [vmem:[#allocation7 + $0x28] sm:$0x1f] }
  0x4e   :  { %2926 = vset.pattern.permute.xlu1 %v3204_v4  ;;  %2924 = vset.pattern.permute.xlu0 %v3205_v5  ;;  %v3306_v26 = vsub.s32 4, %v86_v15  ;;  %v3318_v32 = vsub.s32 5, %v86_v15  ;;  %v3320_v33 = vsub.s32 6, %v86_v15  ;;  %v3322_v34 = vld [vmem:[#allocation7 + $0x30] sm:$0x1f]  ;;  %5832 = vst [vmem:[#allocation21_spill] sm:$0xff] %v3598_v59 }
  0x4f   :  { %256 = vperm.xlu1 %2926, %v65_v2   ;;  %164 = vperm.xlu0 %2924, %v65_v2   ;;  %v88_v24 = vrot.slane %v3290_v18, %v3286_v16  ;;  %v3380_v63 = vld [vmem:[#allocation7 + $0x38] sm:$0x1f]  ;;  %v3492_v3 = vld [vmem:[#allocation7 + $0xa8] sm:$0x1f]  ;;  %v3494_v13 = vld [vmem:[#allocation7 + $0xb0] sm:$0x1f]  ;;  %v5851_v31 = vrot.slane %v3292_v19, %v3286_v16  ;;  %v5852_v41 = vrot.slane %v3294_v20, %v3286_v16 }
  0x50   :  { %v3510_v62 = vld [vmem:[#allocation7 + $0xd0] sm:$0x1f]  ;;  %v3512_v61 = vld [vmem:[#allocation7 + $0xd8] sm:$0x1f]  ;;  %v3560_v15 = vld [vmem:[#allocation7 + $0x80] sm:$0x1f]  ;;  %v5854_v35 = vrot.slane %v3310_v28, %v3286_v16 }
  0x51   :  { %v3556_v56 = vld [vmem:[#allocation7 + $0x70] sm:$0x1f]  ;;  %v3558_v57 = vld [vmem:[#allocation7 + $0x78] sm:$0x1f]  ;;  %5829 = vst [vmem:[#allocation18_spill] sm:$0xff] %v3560_v15  ;;  %s3212_s3 = smov [#allocation10]  }
  0x52   :  { %5827 = vst [vmem:[#allocation16_spill] sm:$0xff] %v3556_v56  ;;  %5828 = vst [vmem:[#allocation17_spill] sm:$0xff] %v3558_v57  ;;  %v3578_v38 = vld [vmem:[#allocation7 + $0x88] sm:$0x1f]  ;;  %v3596_v27 = vld [vmem:[#allocation7 + $0x90] sm:$0x1f] }
  0x53   :  { %2927 = vset.pattern.permute.xlu1 %v3206_v7  ;;  %2928 = vset.pattern.permute.xlu0 %v3203_v1  ;;  %v3384_v1 = vld [vmem:[#allocation8 + $0x7] sm:$0xff]  ;;  %5830 = vst [vmem:[#allocation19_spill] sm:$0xff] %v3578_v38  ;;  %5831 = vst [vmem:[#allocation20_spill] sm:$0xff] %v3596_v27  ;;  %v3610_v53 = vld [vmem:[#allocation7 + $0xa0] sm:$0x1f]  ;;  %s2897_s8 = sshll.u32 %s3212_s3, 4  ;;  %s2898_s8 = int_to_ptr.vmem [resolvable:$true] %s2897_s8 }
  0x54   :  { %302 = vperm.xlu1 %2927, %v65_v2   ;;  %356 = vperm.xlu0 %2928, %v67_v6   ;;  %v3506_v2 = vld [vmem:[#allocation7 + $0xc0] sm:$0x1f]  ;;  %5834 = vst [vmem:[#allocation23_spill] sm:$0xff] %v3610_v53  ;;  %v3692_v48 = vld [vmem:[#allocation7 + $0x150] sm:$0x1f]  ;;  %s3168_s9 = scalar_lea.vmem %s2898_s8, 896  ;;  %p3173_p5 = scmp.lt.s32.totalorder %s2898_s8, %s2898_s8 }
  0x55   :  { %5835 = vst [vmem:[#allocation24_spill] sm:$0xff] %v3692_v48  ;;  %v3704_v55 = vld [vmem:[#allocation7 + $0x160] sm:$0x1f]  ;;  %v3706_v50 = vld [vmem:[#allocation7 + $0x168] sm:$0x1f]  ;;  %p3169_p4 = scmp.ne.s32.totalorder %s2898_s8, %s3168_s9  ;;  %p3174_p6 = scmp.lt.s32.totalorder %s3168_s9, %s3168_s9 }
  0x56   :  { %5837 = vst [vmem:[#allocation26_spill] sm:$0xff] %v3704_v55  ;;  %5838 = vst [vmem:[#allocation27_spill] sm:$0xff] %v3706_v50  ;;  %v3708_v54 = vld [vmem:[#allocation7 + $0x170] sm:$0x1f]  ;;  %v3710_v49 = vld [vmem:[#allocation7 + $0x178] sm:$0x1f]  ;;  %v5863_v55 = vrot.slane %v3300_v23, %v3306_v26 }
  0x57   :  { %5839 = vst [vmem:[#allocation28_spill] sm:$0xff] %v3708_v54  ;;  %5840 = vst [vmem:[#allocation29_spill] sm:$0xff] %v3710_v49  ;;  %v3712_v47 = vld [vmem:[#allocation7 + $0x180] sm:$0x1f]  ;;  %v3758_v43 = vld [vmem:[#allocation7 + $0xe8] sm:$0x1f]  ;;  %v5855_v49 = vrot.slane %v3312_v29, %v3286_v16  ;;  %v5856_v54 = vrot.slane %v3322_v34, %v3286_v16  ;;  %p3175_p7 = por %p3174_p6, %p3173_p5 }
  0x58   :  { %2929 = vset.pattern.permute.xlu1 %v3205_v5  ;;  %2931 = vset.pattern.permute.xlu0 %v3204_v4  ;;  %v3392_v5 = vld [vmem:[#allocation7 + $0x48] sm:$0x1f]  ;;  %v3608_v4 = vld [vmem:[#allocation7 + $0x98] sm:$0x1f]  ;;  %5841 = vst [vmem:[#allocation30_spill] sm:$0xff] %v3712_v47  ;;  %5844 = vst [vmem:[#allocation33_spill] sm:$0xff] %v3758_v43 }
  0x59   :  { %628 = vperm.xlu1 %2929, %v67_v6   ;;  %1186 = vperm.xlu0 %2931, %v67_v6   ;;  %5833 = vst [vmem:[#allocation22_spill] sm:$0xff] %v3608_v4  ;;  %v3714_v51 = vld [vmem:[#allocation8 + $0x2a] sm:$0xff]  ;;  %v3760_v60 = vld [vmem:[#allocation7 + $0xf0] sm:$0x1f]  ;;  %v3808_v58 = vld [vmem:[#allocation7 + $0x108] sm:$0x1f]  ;;  %p3176_p8 = pnand %p3175_p7, %p3169_p4 }
  0x5a   :  { %5842 = vst [vmem:[#allocation31_spill] sm:$0xff] %v3714_v51  ;;  %v3756_v42 = vld [vmem:[#allocation7 + $0xe0] sm:$0x1f]  ;;  %5845 = vst [vmem:[#allocation34_spill] sm:$0xff] %v3760_v60  ;;  %v3778_v39 = vld [vmem:[#allocation7 + $0xf8] sm:$0x1f]  ;;  %v5857_v51 = vrot.slane %v3300_v23, %v3286_v16 }
  0x5b   :  { %5843 = vst [vmem:[#allocation32_spill] sm:$0xff] %v3756_v42  ;;  %5846 = vst [vmem:[#allocation35_spill] sm:$0xff] %v3778_v39  ;;  %v3796_v37 = vld [vmem:[#allocation7 + $0x100] sm:$0x1f]  ;;  %v3798_v46 = vld [vmem:[#allocation8 + $0x1c] sm:$0xff] }
  0x5c   :  { %5847 = vst [vmem:[#allocation36_spill] sm:$0xff] %v3796_v37  ;;  %5848 = vst [vmem:[#allocation37_spill] sm:$0xff] %v3798_v46  ;;  %v3810_v36 = vld [vmem:[#allocation7 + $0x110] sm:$0x1f] }
  0x5d   :  { %2930 = vset.pattern.permute.xlu1 %v3202_v0  ;;  %2934 = vset.pattern.permute.xlu0 %v3207_v8  ;;  %v3382_v0 = vld [vmem:[#allocation7 + $0x40] sm:$0x1f]  ;;  %v3694_v8 = vld [vmem:[#allocation7 + $0x158] sm:$0x1f]  ;;  %5849 = vst [vmem:[#allocation38_spill] sm:$0xff] %v3808_v58  ;;  %5850 = vst [vmem:[#allocation39_spill] sm:$0xff] %v3810_v36 }
  0x5e   :  { %907 = vperm.xlu1 %2930, %v67_v6   ;;  %2023 = vperm.xlu0 %2934, %v67_v6   ;;  %5836 = vst [vmem:[#allocation25_spill] sm:$0xff] %v3694_v8 }
  0x62   :  { %2932 = vset.pattern.permute.xlu1 %v3206_v7  ;;  %2936 = vset.pattern.permute.xlu0 %v3208_v9  ;;  %v3396_v7 = vld [vmem:[#allocation7 + $0x58] sm:$0x1f]  ;;  %v3400_v9 = vld [vmem:[#allocation7 + $0x60] sm:$0x1f] }
  0x63   :  { %1465 = vperm.xlu1 %2932, %v67_v6   ;;  %2581 = vperm.xlu0 %2936, %v67_v6  }
  0x67   :  { %2933 = vset.pattern.permute.xlu1 %v3209_v10  ;;  %2937 = vset.pattern.permute.xlu0 %v3210_v11  ;;  %v3402_v10 = vld [vmem:[#allocation7 + $0x68] sm:$0x1f]  ;;  %v3504_v11 = vld [vmem:[#allocation7 + $0xb8] sm:$0x1f] }
  0x68   :  { %1744 = vperm.xlu1 %2933, %v67_v6   ;;  %2860 = vperm.xlu0 %2937, %v67_v6  }
  0x6c   :  { %2935 = vset.pattern.permute.xlu1 %v3211_v12  ;;  %v3508_v12 = vld [vmem:[#allocation7 + $0xc8] sm:$0x1f] }
  0x6d   :  { %2302 = vperm.xlu1 %2935, %v67_v6   ;;  %v3394_v6 = vld [vmem:[#allocation7 + $0x50] sm:$0x1f] }
  0x91   :  { %70 = vadd.xlane.f32.xlu1 %v69_v14  ;;  %v3514_v14 = vld [vmem:[#allocation8 + $0x15] sm:$0xff] }
  0x92   :  { %5826 = vst [vmem:[#allocation15_spill] sm:$0xff] %v3514_v14 }
  0xc9   :  { %v3828_v30 = vpop.permute.xlu0 %82  ;;  %v3886_v44 = vpop.permute.xlu1 %210 }
  0xca   :  { %v113_v52 = vmul.f32 %v88_v24, %v3828_v30  ;;  %v114_v40 = vmul.f32 %v5851_v31, %v3828_v30  ;;  %v115_v45 = vmul.f32 %v5852_v41, %v3828_v30  ;;  %v5853_v24 = vrot.slane %v3298_v22, %v3286_v16 }
  0xcb   :  { %v117_v41 = vmul.f32 %v5854_v35, %v3828_v30  ;;  %v119_v50 = vmul.f32 %v5856_v54, %v3828_v30  ;;  %v5858_v31 = vrot.slane %v3300_v23, %v3296_v21  ;;  %v5859_v35 = vrot.slane %v3300_v23, %v3288_v17 }
  0xcc   :  { %v116_v46 = vmul.f32 %v5853_v24, %v3828_v30  ;;  %v118_v24 = vmul.f32 %v5855_v49, %v3828_v30  ;;  %v156_v8 = vadd.f32 %v5857_v51, %v113_v52  ;;  %v5860_v49 = vrot.slane %v3300_v23, %v3304_v25 }
  0xcd   :  { %v157_v48 = vadd.f32 %v5858_v31, %v114_v40  ;;  %v158_v53 = vadd.f32 %v5859_v35, %v115_v45  ;;  %v5861_v51 = vrot.slane %v3290_v18, %v3296_v21  ;;  %v5862_v40 = vrot.slane %v3292_v19, %v3296_v21 }
  0xce   :  { %v3888_v47 = vpop.permute.xlu0 %164  ;;  %v159_v4 = vadd.f32 %v5860_v49, %v116_v46  ;;  %v160_v54 = vadd.f32 %v5863_v55, %v117_v41  ;;  %v5864_v45 = vrot.slane %v3300_v23, %v3318_v32  ;;  %v5865_v46 = vrot.slane %v3294_v20, %v3296_v21 }
  0xcf   :  { %v195_v52 = vmul.f32 %v5861_v51, %v3888_v47  ;;  %v196_v31 = vmul.f32 %v5862_v40, %v3888_v47  ;;  %v5866_v51 = vrot.slane %v3298_v22, %v3296_v21  ;;  %v5867_v40 = vrot.slane %v3300_v23, %v3320_v33 }
  0xd0   :  { %v161_v35 = vadd.f32 %v5864_v45, %v118_v24  ;;  %v197_v49 = vmul.f32 %v5865_v46, %v3888_v47  ;;  %v5868_v55 = vrot.slane %v3310_v28, %v3296_v21  ;;  %v5869_v24 = vrot.slane %v3312_v29, %v3296_v21 }
  0xd1   :  { %v198_v59 = vmul.f32 %v5866_v51, %v3888_v47  ;;  %v162_v27 = vadd.f32 %v5867_v40, %v119_v50  ;;  %v5870_v46 = vrot.slane %v3322_v34, %v3296_v21  ;;  %v3965_v51 = vpop.permute.xlu1 %256  ;;  %v203_v15 = vadd.f32 %v196_v31, %v157_v48 }
  0xd2   :  { %v199_v41 = vmul.f32 %v5868_v55, %v3888_v47  ;;  %v200_v45 = vmul.f32 %v5869_v24, %v3888_v47  ;;  %v202_v24 = vadd.f32 %v195_v52, %v156_v8  ;;  %v204_v56 = vadd.f32 %v197_v49, %v158_v53 }
  0xd3   :  { %v201_v38 = vmul.f32 %v5870_v46, %v3888_v47  ;;  %v205_v14 = vadd.f32 %v198_v59, %v159_v4  ;;  %v5871_v50 = vrot.slane %v3290_v18, %v3288_v17  ;;  %v5872_v48 = vrot.slane %v3292_v19, %v3288_v17 }
  0xd4   :  { %v206_v42 = vadd.f32 %v199_v41, %v160_v54  ;;  %v207_v55 = vadd.f32 %v200_v45, %v161_v35  ;;  %v5873_v53 = vrot.slane %v3294_v20, %v3288_v17  ;;  %v5874_v4 = vrot.slane %v3298_v22, %v3288_v17 }
  0xd5   :  { %v241_v23 = vmul.f32 %v5871_v50, %v3886_v44  ;;  %v208_v8 = vadd.f32 %v201_v38, %v162_v27  ;;  %v242_v52 = vmul.f32 %v5872_v48, %v3886_v44  ;;  %v5875_v54 = vrot.slane %v3310_v28, %v3288_v17 }
  0xd6   :  { %v243_v59 = vmul.f32 %v5873_v53, %v3886_v44  ;;  %v244_v31 = vmul.f32 %v5874_v4, %v3886_v44  ;;  %v5876_v35 = vrot.slane %v3312_v29, %v3288_v17  ;;  %v5877_v41 = vrot.slane %v3322_v34, %v3288_v17  ;;  %v4011_v53 = vpop.permute.xlu1 %302 }
  0xd7   :  { %v245_v27 = vmul.f32 %v5875_v54, %v3886_v44  ;;  %v248_v50 = vadd.f32 %v241_v23, %v202_v24  ;;  %v249_v48 = vadd.f32 %v242_v52, %v203_v15  ;;  %v5878_v54 = vrot.slane %v3290_v18, %v3304_v25 }
  0xd8   :  { %v246_v49 = vmul.f32 %v5876_v35, %v3886_v44  ;;  %v247_v45 = vmul.f32 %v5877_v41, %v3886_v44  ;;  %v250_v4 = vadd.f32 %v243_v59, %v204_v56  ;;  %v251_v40 = vadd.f32 %v244_v31, %v205_v14 }
  0xd9   :  { %v287_v38 = vmul.f32 %v5878_v54, %v3965_v51  ;;  %v252_v35 = vadd.f32 %v245_v27, %v206_v42  ;;  %v5879_v23 = vrot.slane %v3292_v19, %v3304_v25  ;;  %v5880_v56 = vrot.slane %v3294_v20, %v3304_v25 }
  0xda   :  { %v253_v57 = vadd.f32 %v246_v49, %v207_v55  ;;  %v254_v58 = vadd.f32 %v247_v45, %v208_v8  ;;  %v5881_v24 = vrot.slane %v3298_v22, %v3304_v25  ;;  %v5882_v42 = vrot.slane %v3310_v28, %v3304_v25 }
  0xdb   :  { %v288_v15 = vmul.f32 %v5879_v23, %v3965_v51  ;;  %v289_v14 = vmul.f32 %v5880_v56, %v3965_v51  ;;  %v5883_v8 = vrot.slane %v3312_v29, %v3304_v25  ;;  %v5884_v31 = vrot.slane %v3322_v34, %v3304_v25 }
  0xdc   :  { %v290_v52 = vmul.f32 %v5881_v24, %v3965_v51  ;;  %v291_v55 = vmul.f32 %v5882_v42, %v3965_v51  ;;  %v294_v49 = vadd.f32 %v287_v38, %v248_v50  ;;  %v5885_v45 = vrot.slane %v3290_v18, %v3306_v26 }
  0xdd   :  { %v292_v59 = vmul.f32 %v5883_v8, %v3965_v51  ;;  %v293_v27 = vmul.f32 %v5884_v31, %v3965_v51  ;;  %v295_v41 = vadd.f32 %v288_v15, %v249_v48  ;;  %v296_v23 = vadd.f32 %v289_v14, %v250_v4 }
  0xde   :  { %v333_v54 = vmul.f32 %v5885_v45, %v4011_v53  ;;  %v297_v56 = vadd.f32 %v290_v52, %v251_v40  ;;  %v5886_v24 = vrot.slane %v3292_v19, %v3306_v26  ;;  %v5887_v8 = vrot.slane %v3380_v63, %v3286_v16 }
  0xdf   :  { %v298_v31 = vadd.f32 %v291_v55, %v252_v35  ;;  %v5888_v38 = vrot.slane %v3294_v20, %v3306_v26  ;;  %v5889_v18 = vrot.slane %v3298_v22, %v3306_v26  ;;  %v5890_v19 = vrot.slane %v3382_v0, %v3286_v16 }
  0xe0   :  { %v334_v42 = vmul.f32 %v5886_v24, %v4011_v53  ;;  %v402_v46 = vmul.f32 %v5887_v8, %v3828_v30  ;;  %v299_v4 = vadd.f32 %v292_v59, %v253_v57  ;;  %v300_v15 = vadd.f32 %v293_v27, %v254_v58 }
  0xe1   :  { %v335_v50 = vmul.f32 %v5888_v38, %v4011_v53  ;;  %v336_v40 = vmul.f32 %v5889_v18, %v4011_v53  ;;  %v403_v48 = vmul.f32 %v5890_v19, %v3828_v30  ;;  %v5891_v35 = vrot.slane %v3310_v28, %v3306_v26 }
  0xe2   :  { %v5892_v20 = vrot.slane %v3312_v29, %v3306_v26  ;;  %v5893_v22 = vrot.slane %v3322_v34, %v3306_v26  ;;  %v340_v45 = vadd.f32 %v333_v54, %v294_v49  ;;  %v5894_v57 = vrot.slane %v3392_v5, %v3286_v16 }
  0xe3   :  { %v337_v14 = vmul.f32 %v5891_v35, %v4011_v53  ;;  %v5895_v28 = vrot.slane %v3394_v6, %v3286_v16  ;;  %v341_v27 = vadd.f32 %v334_v42, %v295_v41  ;;  %v5896_v29 = vrot.slane %v3396_v7, %v3286_v16 }
  0xe4   :  { %v338_v52 = vmul.f32 %v5892_v20, %v4011_v53  ;;  %v339_v55 = vmul.f32 %v5893_v22, %v4011_v53  ;;  %v404_v58 = vmul.f32 %v5894_v57, %v3828_v30  ;;  %v5897_v34 = vrot.slane %v3384_v1, %v3286_v16 }
  0xe5   :  { %v405_v59 = vmul.f32 %v5895_v28, %v3828_v30  ;;  %v406_v24 = vmul.f32 %v5896_v29, %v3828_v30  ;;  %v5898_v54 = vrot.slane %v3380_v63, %v3296_v21  ;;  %v342_v38 = vadd.f32 %v335_v50, %v296_v23 }
  0xe6   :  { %v445_v49 = vadd.f32 %v5897_v34, %v402_v46  ;;  %v343_v18 = vadd.f32 %v336_v40, %v297_v56  ;;  %v5899_v19 = vrot.slane %v3384_v1, %v3296_v21  ;;  %v5900_v42 = vrot.slane %v3382_v0, %v3296_v21 }
  0xe7   :  { %v480_v8 = vmul.f32 %v5898_v54, %v3888_v47  ;;  %v344_v20 = vadd.f32 %v337_v14, %v298_v31  ;;  %v5901_v46 = vrot.slane %v3380_v63, %v3288_v17  ;;  %v5902_v23 = vrot.slane %v3400_v9, %v3286_v16 }
  0xe8   :  { %v446_v41 = vadd.f32 %v5899_v19, %v403_v48  ;;  %v481_v35 = vmul.f32 %v5900_v42, %v3888_v47  ;;  %v5903_v50 = vrot.slane %v3402_v10, %v3286_v16  ;;  %v5904_v48 = vrot.slane %v3384_v1, %v3288_v17 }
  0xe9   :  { %v522_v22 = vmul.f32 %v5901_v46, %v3886_v44  ;;  %v407_v56 = vmul.f32 %v5902_v23, %v3828_v30  ;;  %v5905_v31 = vrot.slane %v3384_v1, %v3304_v25  ;;  %v5906_v28 = vrot.slane %v3392_v5, %v3296_v21 }
  0xea   :  { %v408_v40 = vmul.f32 %v5903_v50, %v3828_v30  ;;  %v447_v57 = vadd.f32 %v5904_v48, %v404_v58  ;;  %v5907_v34 = vrot.slane %v3394_v6, %v3296_v21  ;;  %2938 = vtanh.f32 %v340_v45 }
  0xeb   :  { %v448_v14 = vadd.f32 %v5905_v31, %v405_v59  ;;  %v482_v29 = vmul.f32 %v5906_v28, %v3888_v47  ;;  %v5908_v19 = vrot.slane %v3384_v1, %v3306_v26  ;;  %v5909_v58 = vrot.slane %v3396_v7, %v3296_v21 }
  0xec   :  { %v483_v54 = vmul.f32 %v5907_v34, %v3888_v47  ;;  %v487_v46 = vadd.f32 %v480_v8, %v445_v49  ;;  %v345_v23 = vadd.f32 %v338_v52, %v299_v4  ;;  %v346_v50 = vadd.f32 %v339_v55, %v300_v15 }
  0xed   :  { %v449_v42 = vadd.f32 %v5908_v19, %v406_v24  ;;  %v484_v59 = vmul.f32 %v5909_v58, %v3888_v47  ;;  %2940 = vtanh.f32 %v341_v27  ;;  %v488_v48 = vadd.f32 %v481_v35, %v446_v41 }
  0xee   :  { %v5910_v31 = vrot.slane %v3382_v0, %v3288_v17  ;;  %v5911_v45 = vrot.slane %v3392_v5, %v3288_v17  ;;  %v5912_v34 = vrot.slane %v3384_v1, %v3318_v32  ;;  %v5913_v4 = vrot.slane %v3400_v9, %v3296_v21 }
  0xef   :  { %v5914_v52 = vrot.slane %v3384_v1, %v3320_v33  ;;  %v5915_v27 = vrot.slane %v3402_v10, %v3296_v21  ;;  %v489_v8 = vadd.f32 %v482_v29, %v447_v57  ;;  %v490_v41 = vadd.f32 %v483_v54, %v448_v14 }
  0xf0   :  { %v523_v28 = vmul.f32 %v5910_v31, %v3886_v44  ;;  %v524_v24 = vmul.f32 %v5911_v45, %v3886_v44  ;;  %v450_v19 = vadd.f32 %v5912_v34, %v407_v56  ;;  %v485_v15 = vmul.f32 %v5913_v4, %v3888_v47 }
  0xf1   :  { %v451_v55 = vadd.f32 %v5914_v52, %v408_v40  ;;  %v486_v49 = vmul.f32 %v5915_v27, %v3888_v47  ;;  %2942 = vtanh.f32 %v342_v38  ;;  %v5916_v35 = vrot.slane %v3394_v6, %v3288_v17 }
  0xf2   :  { %v491_v58 = vadd.f32 %v484_v59, %v449_v42  ;;  %v529_v31 = vadd.f32 %v522_v22, %v487_v46  ;;  %v5917_v1 = vrot.slane %v3396_v7, %v3288_v17  ;;  %v5918_v45 = vrot.slane %v3400_v9, %v3288_v17 }
  0xf3   :  { %v525_v56 = vmul.f32 %v5916_v35, %v3886_v44  ;;  %v5919_v38 = vrot.slane %v3402_v10, %v3288_v17  ;;  %v530_v14 = vadd.f32 %v523_v28, %v488_v48  ;;  %2944 = vtanh.f32 %v343_v18 }
  0xf4   :  { %v526_v40 = vmul.f32 %v5917_v1, %v3886_v44  ;;  %v527_v34 = vmul.f32 %v5918_v45, %v3886_v44  ;;  %v5920_v22 = vrot.slane %v3380_v63, %v3304_v25  ;;  %v5921_v54 = vrot.slane %v3382_v0, %v3304_v25 }
  0xf5   :  { %v528_v57 = vmul.f32 %v5919_v38, %v3886_v44  ;;  %v492_v59 = vadd.f32 %v485_v15, %v450_v19  ;;  %v5922_v46 = vrot.slane %v3392_v5, %v3304_v25  ;;  %v493_v52 = vadd.f32 %v486_v49, %v451_v55 }
  0xf6   :  { %v564_v29 = vmul.f32 %v5920_v22, %v3965_v51  ;;  %v565_v42 = vmul.f32 %v5921_v54, %v3965_v51  ;;  %v531_v27 = vadd.f32 %v524_v24, %v489_v8  ;;  %v532_v48 = vadd.f32 %v525_v56, %v490_v41 }
  0xf7   :  { %v566_v4 = vmul.f32 %v5922_v46, %v3965_v51  ;;  %2946 = vtanh.f32 %v344_v20  ;;  %v5923_v18 = vrot.slane %v3380_v63, %v3306_v26  ;;  %v533_v35 = vadd.f32 %v526_v40, %v491_v58  ;;  %v4204_v63 = vpop.eup %2938  ;;  %v4224_v46 = vld [vmem:[#allocation7 + $0x1c0] sm:$0x1f] }
  0xf8   :  { %v571_v1 = vadd.f32 %v564_v29, %v529_v31  ;;  %v5924_v19 = vrot.slane %v3394_v6, %v3304_v25  ;;  %v5925_v45 = vrot.slane %v3396_v7, %v3304_v25  ;;  %v5926_v20 = vrot.slane %v3382_v0, %v3306_v26  ;;  %v4214_v40 = vpop.eup %2940  ;;  %5931 = vst [vmem:[#allocation40_spill] sm:$0xff] %v4224_v46 }
  0xf9   :  { %v606_v28 = vmul.f32 %v5923_v18, %v4011_v53  ;;  %v572_v49 = vadd.f32 %v565_v42, %v530_v14  ;;  %2948 = vtanh.f32 %v345_v23  ;;  %v5927_v8 = vrot.slane %v3400_v9, %v3304_v25 }
  0xfa   :  { %v567_v15 = vmul.f32 %v5924_v19, %v3965_v51  ;;  %v568_v55 = vmul.f32 %v5925_v45, %v3965_v51  ;;  %v607_v24 = vmul.f32 %v5926_v20, %v4011_v53  ;;  %v5928_v56 = vrot.slane %v3392_v5, %v3306_v26 }
  0xfb   :  { %v569_v41 = vmul.f32 %v5927_v8, %v3965_v51  ;;  %v534_v31 = vadd.f32 %v527_v34, %v492_v59  ;;  %v5929_v0 = vrot.slane %v3394_v6, %v3306_v26  ;;  %v535_v14 = vadd.f32 %v528_v57, %v493_v52  ;;  %v4226_v34 = vld [vmem:[#allocation7 + $0x1c8] sm:$0x1f]  ;;  %v2943_v52 = vpop.eup %2942 }
  0xfc   :  { %v608_v58 = vmul.f32 %v5928_v56, %v4011_v53  ;;  %v573_v23 = vadd.f32 %v566_v4, %v531_v27  ;;  %v574_v22 = vadd.f32 %v567_v15, %v532_v48  ;;  %2950 = vtanh.f32 %v346_v50  ;;  %5932 = vst [vmem:[#allocation41_spill] sm:$0xff] %v4226_v34  ;;  %v4232_v4 = vld [vmem:[#allocation7 + $0x1d0] sm:$0x1f] }
  0xfd   :  { %v609_v38 = vmul.f32 %v5929_v0, %v4011_v53  ;;  %v5930_v29 = vrot.slane %v3396_v7, %v3306_v26  ;;  %v575_v42 = vadd.f32 %v568_v55, %v533_v35  ;;  %v613_v5 = vadd.f32 %v606_v28, %v571_v1  ;;  %5934 = vst [vmem:[#allocation42_spill] sm:$0xff] %v4232_v4  ;;  %v4353_v4 = vpop.permute.xlu1 %628 }
  0xfe   :  { %v5933_v6 = vrot.slane %v3402_v10, %v3304_v25  ;;  %v614_v57 = vadd.f32 %v607_v24, %v572_v49  ;;  %v5935_v27 = vrot.slane %v3400_v9, %v3306_v26  ;;  %v5936_v18 = vrot.slane %v3402_v10, %v3306_v26  ;;  %v2945_v24 = vpop.eup %2944 }
  0xff   :  { %v610_v54 = vmul.f32 %v5930_v29, %v4011_v53  ;;  %v576_v35 = vadd.f32 %v569_v41, %v534_v31  ;;  %v615_v15 = vadd.f32 %v608_v58, %v573_v23  ;;  %v616_v45 = vadd.f32 %v609_v38, %v574_v22  ;;  %v4272_v23 = vld [vmem:[#allocation7 + $0x1d8] sm:$0x1f]  ;;  %v4274_v22 = vld [vmem:[#allocation7 + $0x1e0] sm:$0x1f]  ;;  %v4276_v29 = vld [vmem:[#allocation7 + $0x1e8] sm:$0x1f] }
 0x100   :  { %v570_v59 = vmul.f32 %v5933_v6, %v3965_v51  ;;  %v611_v48 = vmul.f32 %v5935_v27, %v4011_v53  ;;  %v612_v28 = vmul.f32 %v5936_v18, %v4011_v53  ;;  %v5937_v55 = vrot.slane %v3492_v3, %v3286_v16  ;;  %5943 = vst [vmem:[#allocation43_spill] sm:$0xff] %v4272_v23  ;;  %v4282_v6 = vld [vmem:[#allocation7 + $0x1f0] sm:$0x1f] }
 0x101   :  { %v617_v9 = vadd.f32 %v610_v54, %v575_v42  ;;  %2952 = vtanh.f32 %v613_v5  ;;  %v5938_v10 = vrot.slane %v3494_v13, %v3286_v16  ;;  %v5939_v8 = vrot.slane %v3504_v11, %v3286_v16  ;;  %5944 = vst [vmem:[#allocation44_spill] sm:$0xff] %v4274_v22  ;;  %5945 = vst [vmem:[#allocation45_spill] sm:$0xff] %v4276_v29  ;;  %v2947_v54 = vpop.eup %2946 }
 0x102   :  { %v577_v19 = vadd.f32 %v570_v59, %v535_v14  ;;  %v960_v20 = vmul.f32 %v5937_v55, %v3828_v30  ;;  %2954 = vtanh.f32 %v614_v57  ;;  %v5940_v56 = vrot.slane %v3506_v2, %v3286_v16  ;;  %5947 = vst [vmem:[#allocation46_spill] sm:$0xff] %v4282_v6 }
 0x103   :  { %v961_v49 = vmul.f32 %v5938_v10, %v3828_v30  ;;  %v962_v41 = vmul.f32 %v5939_v8, %v3828_v30  ;;  %v5941_v31 = vrot.slane %v3508_v12, %v3286_v16  ;;  %v5942_v38 = vrot.slane %v3510_v62, %v3286_v16  ;;  %v2949_v8 = vpop.eup %2948 }
 0x104   :  { %v963_v58 = vmul.f32 %v5940_v56, %v3828_v30  ;;  %v5946_v42 = vrot.slane %v3512_v61, %v3286_v16  ;;  %v618_v18 = vadd.f32 %v611_v48, %v576_v35  ;;  %v619_v55 = vadd.f32 %v612_v28, %v577_v19  ;;  %v5948_v56 = vld [vmem:[#allocation15_spill] sm:$0xff] }
 0x105   :  { %v964_v0 = vmul.f32 %v5941_v31, %v3828_v30  ;;  %v965_v14 = vmul.f32 %v5942_v38, %v3828_v30  ;;  %2956 = vtanh.f32 %v615_v15  ;;  %v5949_v31 = vrot.slane %v5948_v56, %v3286_v16 }
 0x106   :  { %v966_v5 = vmul.f32 %v5946_v42, %v3828_v30  ;;  %2958 = vtanh.f32 %v616_v45  ;;  %v5950_v42 = vrot.slane %v5948_v56, %v3296_v21  ;;  %v5951_v57 = vrot.slane %v5948_v56, %v3288_v17 }
 0x107   :  { %v1003_v38 = vadd.f32 %v5949_v31, %v960_v20  ;;  %2960 = vtanh.f32 %v617_v9  ;;  %v5952_v48 = vrot.slane %v5948_v56, %v3304_v25  ;;  %v5953_v35 = vrot.slane %v5948_v56, %v3306_v26  ;;  %v2951_v20 = vpop.eup %2950 }
 0x108   :  { %v1004_v59 = vadd.f32 %v5950_v42, %v961_v49  ;;  %v1005_v27 = vadd.f32 %v5951_v57, %v962_v41  ;;  %v5954_v15 = vrot.slane %v5948_v56, %v3318_v32  ;;  %v5955_v49 = vrot.slane %v5948_v56, %v3320_v33  ;;  %v357_v42 = vpop.permute.xlu0 %356 }
 0x109   :  { %v1006_v28 = vadd.f32 %v5952_v48, %v963_v58  ;;  %v1007_v19 = vadd.f32 %v5953_v35, %v964_v0  ;;  %v5956_v9 = vrot.slane %v3492_v3, %v3296_v21  ;;  %v5957_v58 = vrot.slane %v3494_v13, %v3296_v21 }
 0x10a   :  { %v1008_v45 = vadd.f32 %v5954_v15, %v965_v14  ;;  %v1009_v31 = vadd.f32 %v5955_v49, %v966_v5  ;;  %v5958_v0 = vrot.slane %v3504_v11, %v3296_v21  ;;  %v5959_v5 = vrot.slane %v3506_v2, %v3296_v21 }
 0x10b   :  { %v1038_v41 = vmul.f32 %v5956_v9, %v3888_v47  ;;  %v1039_v57 = vmul.f32 %v5957_v58, %v3888_v47  ;;  %v5960_v48 = vrot.slane %v3508_v12, %v3296_v21  ;;  %v5961_v15 = vrot.slane %v3510_v62, %v3296_v21 }
 0x10c   :  { %v1040_v14 = vmul.f32 %v5958_v0, %v3888_v47  ;;  %v1041_v56 = vmul.f32 %v5959_v5, %v3888_v47  ;;  %v5962_v9 = vrot.slane %v3512_v61, %v3296_v21  ;;  %v359_v0 = vmul.f32 %v4204_v63, %v357_v42 }
 0x10d   :  { %v1042_v35 = vmul.f32 %v5960_v48, %v3888_v47  ;;  %v1043_v49 = vmul.f32 %v5961_v15, %v3888_v47  ;;  %v360_v10 = vmul.f32 %v4214_v40, %v357_v42  ;;  %v4343_v5 = vmul.f32 %v2943_v52, %v357_v42  ;;  %v2953_v15 = vpop.eup %2952 }
 0x10e   :  { %v1044_v58 = vmul.f32 %v5962_v9, %v3888_v47  ;;  %v4345_v1 = vmul.f32 %v2945_v24, %v357_v42  ;;  %v4347_v7 = vmul.f32 %v2947_v54, %v357_v42  ;;  %v4349_v48 = vmul.f32 %v2949_v8, %v357_v42  ;;  %v2955_v22 = vpop.eup %2954 }
 0x10f   :  { %v4351_v50 = vmul.f32 %v2951_v20, %v357_v42  ;;  %2962 = vtanh.f32 %v618_v18  ;;  %v1045_v6 = vadd.f32 %v1038_v41, %v1003_v38  ;;  %v1046_v29 = vadd.f32 %v1039_v57, %v1004_v59 }
 0x110   :  { %2964 = vtanh.f32 %v619_v55  ;;  %v1047_v9 = vadd.f32 %v1040_v14, %v1005_v27  ;;  %v1048_v63 = vadd.f32 %v1041_v56, %v1006_v28  ;;  %v1049_v23 = vadd.f32 %v1042_v35, %v1007_v19  ;;  %v2957_v28 = vpop.eup %2956 }
 0x111   :  { %v1050_v40 = vadd.f32 %v1043_v49, %v1008_v45  ;;  %v1051_v52 = vadd.f32 %v1044_v58, %v1009_v31  ;;  %v5963_v24 = vrot.slane %v3492_v3, %v3288_v17  ;;  %v5964_v18 = vrot.slane %v3494_v13, %v3288_v17  ;;  %v2959_v42 = vpop.eup %2958 }
 0x112   :  { %v5965_v59 = vrot.slane %v3504_v11, %v3288_v17  ;;  %v5966_v8 = vrot.slane %v3506_v2, %v3288_v17  ;;  %v631_v19 = vmul.f32 %v2953_v15, %v4353_v4  ;;  %v5967_v45 = vrot.slane %v3508_v12, %v3288_v17  ;;  %v2961_v15 = vpop.eup %2960 }
 0x113   :  { %v1080_v54 = vmul.f32 %v5963_v24, %v3886_v44  ;;  %v1081_v55 = vmul.f32 %v5964_v18, %v3886_v44  ;;  %v5968_v31 = vrot.slane %v3510_v62, %v3288_v17  ;;  %v5969_v57 = vrot.slane %v3512_v61, %v3288_v17 }
 0x114   :  { %v1082_v27 = vmul.f32 %v5965_v59, %v3886_v44  ;;  %v1083_v38 = vmul.f32 %v5966_v8, %v3886_v44  ;;  %v1084_v20 = vmul.f32 %v5967_v45, %v3886_v44  ;;  %v632_v56 = vmul.f32 %v2955_v22, %v4353_v4 }
 0x115   :  { %v1085_v41 = vmul.f32 %v5968_v31, %v3886_v44  ;;  %v1086_v14 = vmul.f32 %v5969_v57, %v3886_v44  ;;  %v1087_v35 = vadd.f32 %v1080_v54, %v1045_v6  ;;  %v1088_v49 = vadd.f32 %v1081_v55, %v1046_v29 }
 0x116   :  { %v1089_v58 = vadd.f32 %v1082_v27, %v1047_v9  ;;  %v1090_v24 = vadd.f32 %v1083_v38, %v1048_v63  ;;  %v1091_v18 = vadd.f32 %v1084_v20, %v1049_v23  ;;  %v5970_v8 = vrot.slane %v3492_v3, %v3304_v25 }
 0x117   :  { %v1092_v59 = vadd.f32 %v1085_v41, %v1050_v40  ;;  %v4390_v31 = vmul.f32 %v2957_v28, %v4353_v4  ;;  %v1093_v34 = vadd.f32 %v1086_v14, %v1051_v52  ;;  %v5971_v22 = vrot.slane %v3494_v13, %v3304_v25 }
 0x118   :  { %v1122_v45 = vmul.f32 %v5970_v8, %v3965_v51  ;;  %v5972_v29 = vrot.slane %v3504_v11, %v3304_v25  ;;  %v4401_v9 = vmul.f32 %v2959_v42, %v4353_v4  ;;  %v4403_v63 = vadd.f32 %v631_v19, %v359_v0 }
 0x119   :  { %v1123_v6 = vmul.f32 %v5971_v22, %v3965_v51  ;;  %v5973_v40 = vrot.slane %v3506_v2, %v3304_v25  ;;  %v5974_v54 = vrot.slane %v3508_v12, %v3304_v25  ;;  %v4414_v27 = vmul.f32 %v2961_v15, %v4353_v4  ;;  %v4426_v41 = vpop.eup %2962 }
 0x11a   :  { %v1124_v23 = vmul.f32 %v5972_v29, %v3965_v51  ;;  %v4416_v38 = vadd.f32 %v632_v56, %v360_v10  ;;  %v5976_v0 = vrot.slane %v3510_v62, %v3304_v25  ;;  %v5977_v19 = vrot.slane %v3512_v61, %v3304_v25  ;;  %v4432_v15 = vpop.eup %2964 }
 0x11b   :  { %v1125_v52 = vmul.f32 %v5973_v40, %v3965_v51  ;;  %v1126_v55 = vmul.f32 %v5974_v54, %v3965_v51  ;;  %v1129_v57 = vadd.f32 %v1122_v45, %v1087_v35  ;;  %v1130_v14 = vadd.f32 %v1123_v6, %v1088_v49  ;;  %v5981_v49 = vld [vmem:[#allocation16_spill] sm:$0xff] }
 0x11c   :  { %5975 = vst [vmem:[#allocation15_spill] sm:$0xff] %v4416_v38  ;;  %v1127_v28 = vmul.f32 %v5976_v0, %v3965_v51  ;;  %v1128_v20 = vmul.f32 %v5977_v19, %v3965_v51  ;;  %v1131_v42 = vadd.f32 %v1124_v23, %v1089_v58  ;;  %v5978_v10 = vrot.slane %v3492_v3, %v3306_v26 }
 0x11d   :  { %v1132_v8 = vadd.f32 %v1125_v52, %v1090_v24  ;;  %v5979_v22 = vrot.slane %v3494_v13, %v3306_v26  ;;  %v5980_v40 = vrot.slane %v3504_v11, %v3306_v26  ;;  %v5982_v58 = vrot.slane %v5981_v49, %v3286_v16  ;;  %v5984_v13 = vld [vmem:[#allocation17_spill] sm:$0xff] }
 0x11e   :  { %v1164_v56 = vmul.f32 %v5978_v10, %v4011_v53  ;;  %v1133_v3 = vadd.f32 %v1126_v55, %v1091_v18  ;;  %v1134_v6 = vadd.f32 %v1127_v28, %v1092_v59  ;;  %v5983_v24 = vrot.slane %v3506_v2, %v3306_v26  ;;  %v5988_v55 = vld [vmem:[#allocation18_spill] sm:$0xff] }
 0x11f   :  { %v1165_v29 = vmul.f32 %v5979_v22, %v4011_v53  ;;  %v1166_v35 = vmul.f32 %v5980_v40, %v4011_v53  ;;  %v681_v45 = vmul.f32 %v5982_v58, %v3828_v30  ;;  %v5985_v52 = vrot.slane %v5984_v13, %v3286_v16  ;;  %v5991_v22 = vld [vmem:[#allocation19_spill] sm:$0xff]  ;;  %v5993_v58 = vld [vmem:[#allocation20_spill] sm:$0xff] }
 0x120   :  { %v1167_v23 = vmul.f32 %v5983_v24, %v4011_v53  ;;  %v1135_v0 = vadd.f32 %v1128_v20, %v1093_v34  ;;  %v5986_v11 = vrot.slane %v3508_v12, %v3306_v26  ;;  %v5987_v18 = vrot.slane %v3510_v62, %v3306_v26 }
 0x121   :  { %v682_v54 = vmul.f32 %v5985_v52, %v3828_v30  ;;  %v5989_v2 = vrot.slane %v5988_v55, %v3286_v16  ;;  %v5990_v10 = vrot.slane %v3512_v61, %v3306_v26  ;;  %v1171_v20 = vadd.f32 %v1164_v56, %v1129_v57 }
 0x122   :  { %v1168_v19 = vmul.f32 %v5986_v11, %v4011_v53  ;;  %v1169_v59 = vmul.f32 %v5987_v18, %v4011_v53  ;;  %v5992_v12 = vrot.slane %v5991_v22, %v3286_v16  ;;  %v5994_v62 = vrot.slane %v5993_v58, %v3286_v16  ;;  %v5995_v18 = vld [vmem:[#allocation21_spill] sm:$0xff] }
 0x123   :  { %v683_v28 = vmul.f32 %v5989_v2, %v3828_v30  ;;  %v1170_v34 = vmul.f32 %v5990_v10, %v4011_v53  ;;  %v1172_v52 = vadd.f32 %v1165_v29, %v1130_v14  ;;  %v1173_v11 = vadd.f32 %v1166_v35, %v1131_v42  ;;  %v5998_v10 = vld [vmem:[#allocation22_spill] sm:$0xff] }
 0x124   :  { %v684_v40 = vmul.f32 %v5992_v12, %v3828_v30  ;;  %v685_v24 = vmul.f32 %v5994_v62, %v3828_v30  ;;  %v5996_v2 = vrot.slane %v5995_v18, %v3286_v16  ;;  %v5997_v61 = vrot.slane %v5981_v49, %v3296_v21 }
 0x125   :  { %v1174_v56 = vadd.f32 %v1167_v23, %v1132_v8  ;;  %v5999_v12 = vrot.slane %v5998_v10, %v3286_v16  ;;  %v6000_v62 = vrot.slane %v5995_v18, %v3296_v21  ;;  %v6001_v42 = vrot.slane %v5984_v13, %v3296_v21 }
 0x126   :  { %v724_v46 = vadd.f32 %v5996_v2, %v681_v45  ;;  %v759_v57 = vmul.f32 %v5997_v61, %v3888_v47  ;;  %v1175_v35 = vadd.f32 %v1168_v19, %v1133_v3  ;;  %v6002_v45 = vld [vmem:[#allocation23_spill] sm:$0xff]  ;;  %v6004_v23 = vrot.slane %v5995_v18, %v3288_v17 }
 0x127   :  { %v686_v36 = vmul.f32 %v5999_v12, %v3828_v30  ;;  %v725_v14 = vadd.f32 %v6000_v62, %v682_v54  ;;  %v760_v29 = vmul.f32 %v6001_v42, %v3888_v47  ;;  %v6003_v2 = vrot.slane %v6002_v45, %v3286_v16 }
 0x128   :  { %v726_v61 = vadd.f32 %v6004_v23, %v683_v28  ;;  %v6005_v12 = vrot.slane %v5988_v55, %v3296_v21  ;;  %v6006_v62 = vrot.slane %v5995_v18, %v3304_v25  ;;  %v6007_v3 = vrot.slane %v5995_v18, %v3306_v26 }
 0x129   :  { %v687_v8 = vmul.f32 %v6003_v2, %v3828_v30  ;;  %v6008_v42 = vrot.slane %v5991_v22, %v3296_v21  ;;  %v6009_v28 = vrot.slane %v5993_v58, %v3296_v21  ;;  %v1176_v39 = vadd.f32 %v1169_v59, %v1134_v6 }
 0x12a   :  { %v761_v54 = vmul.f32 %v6005_v12, %v3888_v47  ;;  %v727_v37 = vadd.f32 %v6006_v62, %v684_v40  ;;  %v728_v19 = vadd.f32 %v6007_v3, %v685_v24  ;;  %v1177_v12 = vadd.f32 %v1170_v34, %v1135_v0 }
 0x12b   :  { %v762_v2 = vmul.f32 %v6008_v42, %v3888_v47  ;;  %v763_v23 = vmul.f32 %v6009_v28, %v3888_v47  ;;  %v6010_v40 = vrot.slane %v5981_v49, %v3288_v17  ;;  %v766_v60 = vadd.f32 %v759_v57, %v724_v46 }
 0x12c   :  { %2966 = vtanh.f32 %v1171_v20  ;;  %v6011_v24 = vrot.slane %v5995_v18, %v3318_v32  ;;  %v6012_v42 = vrot.slane %v5998_v10, %v3296_v21  ;;  %v767_v38 = vadd.f32 %v760_v29, %v725_v14 }
 0x12d   :  { %v801_v62 = vmul.f32 %v6010_v40, %v3886_v44  ;;  %v6013_v6 = vrot.slane %v5984_v13, %v3288_v17  ;;  %v6014_v59 = vrot.slane %v5995_v18, %v3320_v33  ;;  %v6015_v34 = vrot.slane %v6002_v45, %v3296_v21 }
 0x12e   :  { %v729_v3 = vadd.f32 %v6011_v24, %v686_v36  ;;  %v764_v43 = vmul.f32 %v6012_v42, %v3888_v47  ;;  %v768_v20 = vadd.f32 %v761_v54, %v726_v61  ;;  %2968 = vtanh.f32 %v1172_v52 }
 0x12f   :  { %v802_v0 = vmul.f32 %v6013_v6, %v3886_v44  ;;  %v730_v46 = vadd.f32 %v6014_v59, %v687_v8  ;;  %v765_v36 = vmul.f32 %v6015_v34, %v3888_v47  ;;  %v6016_v57 = vrot.slane %v5988_v55, %v3288_v17 }
 0x130   :  { %v769_v29 = vadd.f32 %v762_v2, %v727_v37  ;;  %v770_v28 = vadd.f32 %v763_v23, %v728_v19  ;;  %2970 = vtanh.f32 %v1173_v11  ;;  %v6017_v18 = vrot.slane %v5991_v22, %v3288_v17 }
 0x131   :  { %v803_v14 = vmul.f32 %v6016_v57, %v3886_v44  ;;  %v6018_v40 = vrot.slane %v5993_v58, %v3288_v17  ;;  %v808_v61 = vadd.f32 %v801_v62, %v766_v60  ;;  %v6019_v52 = vrot.slane %v5998_v10, %v3288_v17 }
 0x132   :  { %v804_v8 = vmul.f32 %v6017_v18, %v3886_v44  ;;  %v6020_v37 = vrot.slane %v6002_v45, %v3288_v17  ;;  %v771_v19 = vadd.f32 %v764_v43, %v729_v3  ;;  %v809_v2 = vadd.f32 %v802_v0, %v767_v38 }
 0x133   :  { %v805_v24 = vmul.f32 %v6018_v40, %v3886_v44  ;;  %v806_v54 = vmul.f32 %v6019_v52, %v3886_v44  ;;  %2972 = vtanh.f32 %v1174_v56  ;;  %v6021_v23 = vrot.slane %v5981_v49, %v3304_v25 }
 0x134   :  { %v807_v11 = vmul.f32 %v6020_v37, %v3886_v44  ;;  %v772_v6 = vadd.f32 %v765_v36, %v730_v46  ;;  %v810_v60 = vadd.f32 %v803_v14, %v768_v20  ;;  %v6022_v62 = vrot.slane %v5984_v13, %v3304_v25 }
 0x135   :  { %v843_v42 = vmul.f32 %v6021_v23, %v3965_v51  ;;  %v6023_v34 = vrot.slane %v5988_v55, %v3304_v25  ;;  %v811_v43 = vadd.f32 %v804_v8, %v769_v29  ;;  %v812_v38 = vadd.f32 %v805_v24, %v770_v28 }
 0x136   :  { %v844_v59 = vmul.f32 %v6022_v62, %v3965_v51  ;;  %2974 = vtanh.f32 %v1175_v35  ;;  %v6024_v56 = vrot.slane %v5991_v22, %v3304_v25  ;;  %v6025_v0 = vrot.slane %v5981_v49, %v3306_v26  ;;  %v2967_v37 = vpop.eup %2966 }
 0x137   :  { %v845_v57 = vmul.f32 %v6023_v34, %v3965_v51  ;;  %v850_v36 = vadd.f32 %v843_v42, %v808_v61  ;;  %v6026_v20 = vrot.slane %v5993_v58, %v3304_v25  ;;  %v6027_v35 = vrot.slane %v5984_v13, %v3306_v26 }
 0x138   :  { %v846_v3 = vmul.f32 %v6024_v56, %v3965_v51  ;;  %v885_v46 = vmul.f32 %v6025_v0, %v4011_v53  ;;  %v813_v28 = vadd.f32 %v806_v54, %v771_v19  ;;  %v851_v18 = vadd.f32 %v844_v59, %v809_v2 }
 0x139   :  { %v847_v14 = vmul.f32 %v6026_v20, %v3965_v51  ;;  %v886_v29 = vmul.f32 %v6027_v35, %v4011_v53  ;;  %v6028_v8 = vrot.slane %v5998_v10, %v3304_v25  ;;  %v6029_v49 = vrot.slane %v5988_v55, %v3306_v26 }
 0x13a   :  { %v814_v61 = vadd.f32 %v807_v11, %v772_v6  ;;  %v852_v52 = vadd.f32 %v845_v57, %v810_v60  ;;  %v6030_v13 = vrot.slane %v5991_v22, %v3306_v26  ;;  %v6031_v54 = vrot.slane %v5993_v58, %v3306_v26  ;;  %v2969_v22 = vpop.eup %2968 }
 0x13b   :  { %v848_v40 = vmul.f32 %v6028_v8, %v3965_v51  ;;  %v887_v24 = vmul.f32 %v6029_v49, %v4011_v53  ;;  %v853_v2 = vadd.f32 %v846_v3, %v811_v43  ;;  %v854_v42 = vadd.f32 %v847_v14, %v812_v38  ;;  %v2971_v57 = vpop.eup %2970  ;;  %v6035_v3 = vld [vmem:[#allocation24_spill] sm:$0xff]  ;;  %v6039_v14 = vld [vmem:[#allocation26_spill] sm:$0xff] }
 0x13c   :  { %v888_v23 = vmul.f32 %v6030_v13, %v4011_v53  ;;  %v889_v19 = vmul.f32 %v6031_v54, %v4011_v53  ;;  %v4609_v62 = vadd.f32 %v4390_v31, %v4343_v5  ;;  %2976 = vtanh.f32 %v1176_v39  ;;  %v6043_v8 = vld [vmem:[#allocation28_spill] sm:$0xff] }
 0x13d   :  { %v6032_v55 = vrot.slane %v6002_v45, %v3304_v25  ;;  %v892_v6 = vadd.f32 %v885_v46, %v850_v36  ;;  %2978 = vtanh.f32 %v1177_v12  ;;  %v6033_v58 = vrot.slane %v5998_v10, %v3306_v26  ;;  %v2973_v36 = vpop.eup %2972 }
 0x13e   :  { %v855_v59 = vadd.f32 %v848_v40, %v813_v28  ;;  %v893_v34 = vadd.f32 %v886_v29, %v851_v18  ;;  %v636_v5 = vmul.f32 %v4426_v41, %v4353_v4  ;;  %v6034_v39 = vrot.slane %v6002_v45, %v3306_v26  ;;  %v6037_v41 = vld [vmem:[#allocation25_spill] sm:$0xff] }
 0x13f   :  { %v849_v11 = vmul.f32 %v6032_v55, %v3965_v51  ;;  %v890_v60 = vmul.f32 %v6033_v58, %v4011_v53  ;;  %v894_v38 = vadd.f32 %v887_v24, %v852_v52  ;;  %v4627_v12 = vadd.f32 %v4401_v9, %v4345_v1  ;;  %v6041_v9 = vld [vmem:[#allocation27_spill] sm:$0xff]  ;;  %v6045_v24 = vld [vmem:[#allocation29_spill] sm:$0xff] }
 0x140   :  { %v891_v31 = vmul.f32 %v6034_v39, %v4011_v53  ;;  %v895_v56 = vadd.f32 %v888_v23, %v853_v2  ;;  %v896_v10 = vadd.f32 %v889_v19, %v854_v42  ;;  %v6036_v0 = vrot.slane %v6035_v3, %v3286_v16  ;;  %v2975_v13 = vpop.eup %2974  ;;  %v6047_v42 = vld [vmem:[#allocation30_spill] sm:$0xff] }
 0x141   :  { %v856_v43 = vadd.f32 %v849_v11, %v814_v61  ;;  %2980 = vtanh.f32 %v892_v6  ;;  %v6038_v45 = vrot.slane %v6037_v41, %v3286_v16  ;;  %v6040_v35 = vrot.slane %v6039_v14, %v3286_v16  ;;  %v6049_v6 = vld [vmem:[#allocation31_spill] sm:$0xff] }
 0x142   :  { %v1797_v46 = vmul.f32 %v6036_v0, %v3828_v30  ;;  %v6042_v29 = vrot.slane %v6041_v9, %v3286_v16  ;;  %v897_v18 = vadd.f32 %v890_v60, %v855_v59  ;;  %2982 = vtanh.f32 %v893_v34 }
 0x143   :  { %v1798_v20 = vmul.f32 %v6038_v45, %v3828_v30  ;;  %v1799_v1 = vmul.f32 %v6040_v35, %v3828_v30  ;;  %v6044_v40 = vrot.slane %v6043_v8, %v3286_v16  ;;  %v6046_v61 = vrot.slane %v6045_v24, %v3286_v16 }
 0x144   :  { %v1800_v28 = vmul.f32 %v6042_v29, %v3828_v30  ;;  %v637_v23 = vmul.f32 %v4432_v15, %v4353_v4  ;;  %v4657_v54 = vadd.f32 %v4414_v27, %v4347_v7  ;;  %v898_v19 = vadd.f32 %v891_v31, %v856_v43  ;;  %v1187_v29 = vpop.permute.xlu0 %1186 }
 0x145   :  { %v1801_v49 = vmul.f32 %v6044_v40, %v3828_v30  ;;  %v1802_v52 = vmul.f32 %v6046_v61, %v3828_v30  ;;  %2984 = vtanh.f32 %v894_v38  ;;  %v4660_v2 = vadd.f32 %v636_v5, %v4349_v48 }
 0x146   :  { %2986 = vtanh.f32 %v895_v56  ;;  %v6048_v55 = vrot.slane %v6047_v42, %v3286_v16  ;;  %v6050_v58 = vrot.slane %v6049_v6, %v3286_v16  ;;  %v6051_v4 = vrot.slane %v6049_v6, %v3296_v21  ;;  %v2977_v56 = vpop.eup %2976 }
 0x147   :  { %2988 = vtanh.f32 %v896_v10  ;;  %v6052_v27 = vrot.slane %v6049_v6, %v3288_v17  ;;  %v6053_v15 = vrot.slane %v6049_v6, %v3304_v25  ;;  %v6054_v34 = vrot.slane %v6049_v6, %v3306_v26 }
 0x148   :  { %v1803_v11 = vmul.f32 %v6048_v55, %v3828_v30  ;;  %v1840_v60 = vadd.f32 %v6050_v58, %v1797_v46  ;;  %v1841_v7 = vadd.f32 %v6051_v4, %v1798_v20  ;;  %2990 = vtanh.f32 %v897_v18 }
 0x149   :  { %v1842_v48 = vadd.f32 %v6052_v27, %v1799_v1  ;;  %v1843_v59 = vadd.f32 %v6053_v15, %v1800_v28  ;;  %v1844_v5 = vadd.f32 %v6054_v34, %v1801_v49  ;;  %v6055_v39 = vrot.slane %v6049_v6, %v3318_v32  ;;  %v2979_v1 = vpop.eup %2978 }
 0x14a   :  { %v6056_v43 = vrot.slane %v6035_v3, %v3296_v21  ;;  %2992 = vtanh.f32 %v898_v19  ;;  %v6057_v10 = vrot.slane %v6037_v41, %v3296_v21  ;;  %v6058_v46 = vrot.slane %v6039_v14, %v3296_v21 }
 0x14b   :  { %v1845_v31 = vadd.f32 %v6055_v39, %v1802_v52  ;;  %v6059_v20 = vrot.slane %v6041_v9, %v3296_v21  ;;  %v6060_v28 = vrot.slane %v6049_v6, %v3320_v33  ;;  %v6061_v40 = vrot.slane %v6043_v8, %v3296_v21 }
 0x14c   :  { %v1875_v38 = vmul.f32 %v6056_v43, %v3888_v47  ;;  %v1876_v0 = vmul.f32 %v6057_v10, %v3888_v47  ;;  %v1877_v45 = vmul.f32 %v6058_v46, %v3888_v47  ;;  %v6062_v61 = vrot.slane %v6045_v24, %v3296_v21  ;;  %v2981_v43 = vpop.eup %2980 }
 0x14d   :  { %v1878_v35 = vmul.f32 %v6059_v20, %v3888_v47  ;;  %v1846_v18 = vadd.f32 %v6060_v28, %v1803_v11  ;;  %v1879_v49 = vmul.f32 %v6061_v40, %v3888_v47  ;;  %v6063_v19 = vrot.slane %v6047_v42, %v3296_v21  ;;  %v908_v40 = vpop.permute.xlu1 %907 }
 0x14e   :  { %v1880_v52 = vmul.f32 %v6062_v61, %v3888_v47  ;;  %v4716_v58 = vadd.f32 %v637_v23, %v4351_v50  ;;  %v4718_v6 = vmul.f32 %v2967_v37, %v1187_v29  ;;  %v4720_v11 = vmul.f32 %v2969_v22, %v1187_v29  ;;  %v2983_v23 = vpop.eup %2982 }
 0x14f   :  { %v1881_v55 = vmul.f32 %v6063_v19, %v3888_v47  ;;  %v4722_v4 = vmul.f32 %v2971_v57, %v1187_v29  ;;  %v4724_v27 = vmul.f32 %v2973_v36, %v1187_v29  ;;  %v4726_v15 = vmul.f32 %v2975_v13, %v1187_v29  ;;  %v2985_v13 = vpop.eup %2984 }
 0x150   :  { %v4728_v34 = vmul.f32 %v2977_v56, %v1187_v29  ;;  %v1882_v39 = vadd.f32 %v1875_v38, %v1840_v60  ;;  %v4730_v10 = vmul.f32 %v2979_v1, %v1187_v29  ;;  %v1883_v46 = vadd.f32 %v1876_v0, %v1841_v7  ;;  %v2987_v0 = vpop.eup %2986 }
 0x151   :  { %v1884_v20 = vadd.f32 %v1877_v45, %v1842_v48  ;;  %v1885_v50 = vadd.f32 %v1878_v35, %v1843_v59  ;;  %v1886_v37 = vadd.f32 %v1879_v49, %v1844_v5  ;;  %v1887_v28 = vadd.f32 %v1880_v52, %v1845_v31  ;;  %v2989_v61 = vpop.eup %2988 }
 0x152   :  { %6064 = vst [vmem:[#allocation16_spill] sm:$0xff] %v4728_v34  ;;  %6065 = vst [vmem:[#allocation17_spill] sm:$0xff] %v4730_v10  ;;  %v1888_v22 = vadd.f32 %v1881_v55, %v1846_v18  ;;  %v6066_v57 = vrot.slane %v6035_v3, %v3288_v17  ;;  %v6067_v60 = vrot.slane %v6037_v41, %v3288_v17 }
 0x153   :  { %v6068_v7 = vrot.slane %v6039_v14, %v3288_v17  ;;  %v6069_v59 = vrot.slane %v6041_v9, %v3288_v17  ;;  %v6070_v31 = vrot.slane %v6043_v8, %v3288_v17  ;;  %v910_v45 = vmul.f32 %v2981_v43, %v908_v40 }
 0x154   :  { %v1917_v36 = vmul.f32 %v6066_v57, %v3886_v44  ;;  %v1918_v38 = vmul.f32 %v6067_v60, %v3886_v44  ;;  %v6071_v35 = vrot.slane %v6045_v24, %v3288_v17  ;;  %v6072_v29 = vrot.slane %v6047_v42, %v3288_v17  ;;  %v2991_v60 = vpop.eup %2990 }
 0x155   :  { %v1919_v48 = vmul.f32 %v6068_v7, %v3886_v44  ;;  %v1920_v5 = vmul.f32 %v6069_v59, %v3886_v44  ;;  %v1921_v56 = vmul.f32 %v6070_v31, %v3886_v44  ;;  %v911_v52 = vmul.f32 %v2983_v23, %v908_v40  ;;  %v2993_v10 = vpop.eup %2992  ;;  %v6075_v23 = vld [vmem:[#allocation15_spill] sm:$0xff] }
 0x156   :  { %v1922_v1 = vmul.f32 %v6071_v35, %v3886_v44  ;;  %v1923_v18 = vmul.f32 %v6072_v29, %v3886_v44  ;;  %v1924_v49 = vadd.f32 %v1917_v36, %v1882_v39  ;;  %v1925_v19 = vadd.f32 %v1918_v38, %v1883_v46 }
 0x157   :  { %v1926_v55 = vadd.f32 %v1919_v48, %v1884_v20  ;;  %v1927_v57 = vadd.f32 %v1920_v5, %v1885_v50  ;;  %v912_v7 = vmul.f32 %v2985_v13, %v908_v40  ;;  %v1928_v59 = vadd.f32 %v1921_v56, %v1886_v37 }
 0x158   :  { %v1929_v43 = vadd.f32 %v1922_v1, %v1887_v28  ;;  %v1930_v31 = vadd.f32 %v1923_v18, %v1888_v22  ;;  %v913_v34 = vmul.f32 %v2987_v0, %v908_v40  ;;  %v4761_v35 = vadd.f32 %v910_v45, %v4403_v63 }
 0x159   :  { %v6073_v29 = vrot.slane %v6035_v3, %v3304_v25  ;;  %v6074_v46 = vrot.slane %v6037_v41, %v3304_v25  ;;  %v914_v50 = vmul.f32 %v2989_v61, %v908_v40  ;;  %v4772_v37 = vadd.f32 %v911_v52, %v6075_v23 }
 0x15a   :  { %v6076_v28 = vrot.slane %v6039_v14, %v3304_v25  ;;  %v6077_v22 = vrot.slane %v6041_v9, %v3304_v25  ;;  %v6078_v13 = vrot.slane %v6043_v8, %v3304_v25  ;;  %v6079_v48 = vrot.slane %v6045_v24, %v3304_v25 }
 0x15b   :  { %v1959_v39 = vmul.f32 %v6073_v29, %v3965_v51  ;;  %v1960_v20 = vmul.f32 %v6074_v46, %v3965_v51  ;;  %v6080_v0 = vrot.slane %v6035_v3, %v3306_v26  ;;  %v915_v1 = vmul.f32 %v2991_v60, %v908_v40 }
 0x15c   :  { %v1961_v63 = vmul.f32 %v6076_v28, %v3965_v51  ;;  %v1962_v36 = vmul.f32 %v6077_v22, %v3965_v51  ;;  %v1963_v38 = vmul.f32 %v6078_v13, %v3965_v51  ;;  %v1964_v5 = vmul.f32 %v6079_v48, %v3965_v51 }
 0x15d   :  { %v1966_v56 = vadd.f32 %v1959_v39, %v1924_v49  ;;  %v2001_v45 = vmul.f32 %v6080_v0, %v4011_v53  ;;  %v916_v18 = vmul.f32 %v2993_v10, %v908_v40  ;;  %v6081_v61 = vrot.slane %v6047_v42, %v3304_v25 }
 0x15e   :  { %v1967_v29 = vadd.f32 %v1960_v20, %v1925_v19  ;;  %v1968_v46 = vadd.f32 %v1961_v63, %v1926_v55  ;;  %v1969_v23 = vadd.f32 %v1962_v36, %v1927_v57  ;;  %v1970_v28 = vadd.f32 %v1963_v38, %v1928_v59 }
 0x15f   :  { %v1965_v52 = vmul.f32 %v6081_v61, %v3965_v51  ;;  %v6082_v49 = vrot.slane %v6037_v41, %v3306_v26  ;;  %v1971_v22 = vadd.f32 %v1964_v5, %v1929_v43  ;;  %v6083_v3 = vrot.slane %v6039_v14, %v3306_v26 }
 0x160   :  { %v6084_v40 = vrot.slane %v6041_v9, %v3306_v26  ;;  %v6085_v19 = vrot.slane %v6043_v8, %v3306_v26  ;;  %v6086_v41 = vrot.slane %v6045_v24, %v3306_v26  ;;  %v6087_v14 = vrot.slane %v6047_v42, %v3306_v26  ;;  %v6088_v42 = vld [vmem:[#allocation32_spill] sm:$0xff] }
 0x161   :  { %v2002_v39 = vmul.f32 %v6082_v49, %v4011_v53  ;;  %v2003_v10 = vmul.f32 %v6083_v3, %v4011_v53  ;;  %v1972_v57 = vadd.f32 %v1965_v52, %v1930_v31  ;;  %v2008_v20 = vadd.f32 %v2001_v45, %v1966_v56  ;;  %v6093_v56 = vld [vmem:[#allocation34_spill] sm:$0xff] }
 0x162   :  { %v2004_v60 = vmul.f32 %v6084_v40, %v4011_v53  ;;  %v2005_v55 = vmul.f32 %v6085_v19, %v4011_v53  ;;  %v2006_v59 = vmul.f32 %v6086_v41, %v4011_v53  ;;  %v2007_v43 = vmul.f32 %v6087_v14, %v4011_v53  ;;  %v6103_v40 = vld [vmem:[#allocation37_spill] sm:$0xff]  ;;  %v6106_v41 = vld [vmem:[#allocation39_spill] sm:$0xff] }
 0x163   :  { %v4823_v9 = vadd.f32 %v912_v7, %v4609_v62  ;;  %v4826_v63 = vadd.f32 %v913_v34, %v4627_v12  ;;  %v4829_v8 = vadd.f32 %v914_v50, %v4657_v54  ;;  %v4832_v31 = vadd.f32 %v915_v1, %v4660_v2  ;;  %v6091_v2 = vld [vmem:[#allocation33_spill] sm:$0xff] }
 0x164   :  { %v4835_v24 = vadd.f32 %v916_v18, %v4716_v58  ;;  %v2009_v36 = vadd.f32 %v2002_v39, %v1967_v29  ;;  %v6089_v13 = vrot.slane %v6088_v42, %v3288_v17  ;;  %v6090_v62 = vrot.slane %v6088_v42, %v3286_v16  ;;  %v6097_v29 = vld [vmem:[#allocation35_spill] sm:$0xff] }
 0x165   :  { %v2010_v34 = vadd.f32 %v2003_v10, %v1968_v46  ;;  %v2011_v54 = vadd.f32 %v2004_v60, %v1969_v23  ;;  %v2012_v7 = vadd.f32 %v2005_v55, %v1970_v28  ;;  %v6092_v50 = vrot.slane %v6091_v2, %v3286_v16  ;;  %v6099_v28 = vld [vmem:[#allocation36_spill] sm:$0xff] }
 0x166   :  { %v1359_v38 = vmul.f32 %v6089_v13, %v3886_v44  ;;  %v1239_v12 = vmul.f32 %v6090_v62, %v3828_v30  ;;  %v2013_v48 = vadd.f32 %v2006_v59, %v1971_v22  ;;  %v2014_v5 = vadd.f32 %v2007_v43, %v1972_v57  ;;  %v6101_v22 = vld [vmem:[#allocation38_spill] sm:$0xff] }
 0x167   :  { %v1240_v58 = vmul.f32 %v6092_v50, %v3828_v30  ;;  %2994 = vtanh.f32 %v2008_v20  ;;  %v6094_v0 = vrot.slane %v6093_v56, %v3286_v16  ;;  %v6095_v1 = vrot.slane %v6091_v2, %v3288_v17 }
 0x168   :  { %v6096_v61 = vrot.slane %v6093_v56, %v3288_v17  ;;  %v6098_v46 = vrot.slane %v6097_v29, %v3286_v16  ;;  %v6100_v49 = vrot.slane %v6099_v28, %v3286_v16  ;;  %2996 = vtanh.f32 %v2009_v36 }
 0x169   :  { %v1241_v45 = vmul.f32 %v6094_v0, %v3828_v30  ;;  %v1360_v18 = vmul.f32 %v6095_v1, %v3886_v44  ;;  %v6102_v3 = vrot.slane %v6101_v22, %v3286_v16  ;;  %v6104_v60 = vrot.slane %v6103_v40, %v3286_v16 }
 0x16a   :  { %v1361_v52 = vmul.f32 %v6096_v61, %v3886_v44  ;;  %v1242_v23 = vmul.f32 %v6098_v46, %v3828_v30  ;;  %v1243_v39 = vmul.f32 %v6100_v49, %v3828_v30  ;;  %v6105_v55 = vrot.slane %v6088_v42, %v3296_v21 }
 0x16b   :  { %v1244_v10 = vmul.f32 %v6102_v3, %v3828_v30  ;;  %v1282_v19 = vadd.f32 %v6104_v60, %v1239_v12  ;;  %2998 = vtanh.f32 %v2010_v34  ;;  %v6107_v59 = vrot.slane %v6106_v41, %v3286_v16 }
 0x16c   :  { %v1317_v57 = vmul.f32 %v6105_v55, %v3888_v47  ;;  %v6108_v43 = vrot.slane %v6103_v40, %v3296_v21  ;;  %v6109_v36 = vrot.slane %v6091_v2, %v3296_v21  ;;  %3000 = vtanh.f32 %v2011_v54 }
 0x16d   :  { %v1245_v14 = vmul.f32 %v6107_v59, %v3828_v30  ;;  %v6110_v62 = vrot.slane %v6097_v29, %v3288_v17  ;;  %v6111_v34 = vrot.slane %v6103_v40, %v3288_v17  ;;  %v6112_v0 = vrot.slane %v6093_v56, %v3296_v21 }
 0x16e   :  { %v1283_v20 = vadd.f32 %v6108_v43, %v1240_v58  ;;  %v1318_v13 = vmul.f32 %v6109_v36, %v3888_v47  ;;  %3002 = vtanh.f32 %v2012_v7  ;;  %v6113_v1 = vrot.slane %v6103_v40, %v3304_v25 }
 0x16f   :  { %v1362_v12 = vmul.f32 %v6110_v62, %v3886_v44  ;;  %v1284_v50 = vadd.f32 %v6111_v34, %v1241_v45  ;;  %v1319_v58 = vmul.f32 %v6112_v0, %v3888_v47  ;;  %v6114_v54 = vrot.slane %v6103_v40, %v3306_v26 }
 0x170   :  { %v1285_v61 = vadd.f32 %v6113_v1, %v1242_v23  ;;  %v6115_v49 = vrot.slane %v6097_v29, %v3296_v21  ;;  %v6116_v45 = vrot.slane %v6103_v40, %v3318_v32  ;;  %v6117_v7 = vrot.slane %v6099_v28, %v3296_v21 }
 0x171   :  { %v1286_v46 = vadd.f32 %v6114_v54, %v1243_v39  ;;  %v6118_v23 = vrot.slane %v6101_v22, %v3296_v21  ;;  %v1324_v39 = vadd.f32 %v1317_v57, %v1282_v19  ;;  %3004 = vtanh.f32 %v2013_v48 }
 0x172   :  { %v1320_v3 = vmul.f32 %v6115_v49, %v3888_v47  ;;  %v1287_v60 = vadd.f32 %v6116_v45, %v1244_v10  ;;  %v1321_v55 = vmul.f32 %v6117_v7, %v3888_v47  ;;  %v6119_v43 = vrot.slane %v6103_v40, %v3320_v33  ;;  %v2995_v45 = vpop.eup %2994 }
 0x173   :  { %v1322_v59 = vmul.f32 %v6118_v23, %v3888_v47  ;;  %v6120_v10 = vrot.slane %v6106_v41, %v3296_v21  ;;  %v1325_v34 = vadd.f32 %v1318_v13, %v1283_v20  ;;  %3006 = vtanh.f32 %v2014_v5 }
 0x174   :  { %v1288_v36 = vadd.f32 %v6119_v43, %v1245_v14  ;;  %v6121_v0 = vrot.slane %v6099_v28, %v3288_v17  ;;  %v6122_v48 = vrot.slane %v6101_v22, %v3288_v17  ;;  %v1326_v57 = vadd.f32 %v1319_v58, %v1284_v50 }
 0x175   :  { %v1323_v62 = vmul.f32 %v6120_v10, %v3888_v47  ;;  %v6123_v40 = vrot.slane %v6106_v41, %v3288_v17  ;;  %v6124_v5 = vrot.slane %v6088_v42, %v3304_v25  ;;  %v6125_v13 = vrot.slane %v6091_v2, %v3304_v25 }
 0x176   :  { %v1363_v1 = vmul.f32 %v6121_v0, %v3886_v44  ;;  %v1364_v19 = vmul.f32 %v6122_v48, %v3886_v44  ;;  %v1327_v49 = vadd.f32 %v1320_v3, %v1285_v61  ;;  %v6126_v50 = vrot.slane %v6093_v56, %v3304_v25 }
 0x177   :  { %v1365_v14 = vmul.f32 %v6123_v40, %v3886_v44  ;;  %v1401_v20 = vmul.f32 %v6124_v5, %v3965_v51  ;;  %v1402_v54 = vmul.f32 %v6125_v13, %v3965_v51  ;;  %v1328_v7 = vadd.f32 %v1321_v55, %v1286_v46  ;;  %v2997_v5 = vpop.eup %2996 }
 0x178   :  { %v1403_v58 = vmul.f32 %v6126_v50, %v3965_v51  ;;  %v1329_v23 = vadd.f32 %v1322_v59, %v1287_v60  ;;  %v1366_v43 = vadd.f32 %v1359_v38, %v1324_v39  ;;  %v6127_v10 = vrot.slane %v6097_v29, %v3304_v25  ;;  %v2999_v50 = vpop.eup %2998 }
 0x179   :  { %v6128_v48 = vrot.slane %v6099_v28, %v3304_v25  ;;  %v1330_v61 = vadd.f32 %v1323_v62, %v1288_v36  ;;  %v1367_v3 = vadd.f32 %v1360_v18, %v1325_v34  ;;  %v6129_v13 = vrot.slane %v6101_v22, %v3304_v25 }
 0x17a   :  { %v1404_v0 = vmul.f32 %v6127_v10, %v3965_v51  ;;  %v6130_v38 = vrot.slane %v6106_v41, %v3304_v25  ;;  %v6131_v55 = vrot.slane %v6088_v42, %v3306_v26  ;;  %v1368_v39 = vadd.f32 %v1361_v52, %v1326_v57  ;;  %v3001_v42 = vpop.eup %3000 }
 0x17b   :  { %v1405_v40 = vmul.f32 %v6128_v48, %v3965_v51  ;;  %v1406_v46 = vmul.f32 %v6129_v13, %v3965_v51  ;;  %v6132_v18 = vrot.slane %v6091_v2, %v3306_v26  ;;  %v6133_v62 = vrot.slane %v6093_v56, %v3306_v26 }
 0x17c   :  { %v1407_v60 = vmul.f32 %v6130_v38, %v3965_v51  ;;  %v1443_v59 = vmul.f32 %v6131_v55, %v4011_v53  ;;  %v6134_v10 = vrot.slane %v6097_v29, %v3306_v26  ;;  %v1369_v13 = vadd.f32 %v1362_v12, %v1327_v49 }
 0x17d   :  { %v1444_v36 = vmul.f32 %v6132_v18, %v4011_v53  ;;  %v1445_v34 = vmul.f32 %v6133_v62, %v4011_v53  ;;  %v6135_v52 = vrot.slane %v6099_v28, %v3306_v26  ;;  %v1370_v38 = vadd.f32 %v1363_v1, %v1328_v7  ;;  %v3003_v18 = vpop.eup %3002 }
 0x17e   :  { %v1446_v48 = vmul.f32 %v6134_v10, %v4011_v53  ;;  %v1371_v2 = vadd.f32 %v1364_v19, %v1329_v23  ;;  %v1408_v55 = vadd.f32 %v1401_v20, %v1366_v43  ;;  %v6136_v56 = vrot.slane %v6101_v22, %v3306_v26  ;;  %v3005_v20 = vpop.eup %3004 }
 0x17f   :  { %v1447_v57 = vmul.f32 %v6135_v52, %v4011_v53  ;;  %v6137_v29 = vrot.slane %v6106_v41, %v3306_v26  ;;  %v1372_v49 = vadd.f32 %v1365_v14, %v1330_v61  ;;  %v1409_v10 = vadd.f32 %v1402_v54, %v1367_v3  ;;  %v2024_v54 = vpop.permute.xlu0 %2023 }
 0x180   :  { %v1448_v62 = vmul.f32 %v6136_v56, %v4011_v53  ;;  %v5000_v28 = vadd.f32 %v4718_v6, %v4761_v35  ;;  %v5004_v1 = vadd.f32 %v4720_v11, %v4772_v37  ;;  %v5008_v19 = vadd.f32 %v4722_v4, %v4823_v9  ;;  %v6138_v6 = vld [vmem:[#allocation16_spill] sm:$0xff]  ;;  %v3007_v37 = vpop.eup %3006  ;;  %v6140_v4 = vld [vmem:[#allocation17_spill] sm:$0xff] }
 0x181   :  { %v1449_v12 = vmul.f32 %v6137_v29, %v4011_v53  ;;  %v1410_v22 = vadd.f32 %v1403_v58, %v1368_v39  ;;  %v5012_v41 = vadd.f32 %v4724_v27, %v4826_v63  ;;  %v5016_v14 = vadd.f32 %v4726_v15, %v4829_v8  ;;  %v2326_v39 = vld [vmem:[#allocation8 + $0x38] sm:$0xff] }
 0x182   :  { %v5020_v35 = vadd.f32 %v6138_v6, %v4832_v31  ;;  %v1411_v11 = vadd.f32 %v1404_v0, %v1369_v13  ;;  %v5024_v9 = vadd.f32 %v6140_v4, %v4835_v24  ;;  %v1412_v58 = vadd.f32 %v1405_v40, %v1370_v38  ;;  %v6155_v38 = vld [vmem:[#allocation43_spill] sm:$0xff] }
 0x183   :  { %v1413_v7 = vadd.f32 %v1406_v46, %v1371_v2  ;;  %v1450_v23 = vadd.f32 %v1443_v59, %v1408_v55  ;;  %v5026_v27 = vmul.f32 %v2995_v45, %v2024_v54  ;;  %v5028_v63 = vmul.f32 %v2997_v5, %v2024_v54  ;;  %v6149_v46 = vld [vmem:[#allocation40_spill] sm:$0xff] }
 0x184   :  { %6139 = vst [vmem:[#allocation18_spill] sm:$0xff] %v5020_v35  ;;  %6141 = vst [vmem:[#allocation19_spill] sm:$0xff] %v5024_v9  ;;  %v1414_v15 = vadd.f32 %v1407_v60, %v1372_v49  ;;  %v1451_v8 = vadd.f32 %v1444_v36, %v1409_v10  ;;  %v5030_v43 = vmul.f32 %v2999_v50, %v2024_v54  ;;  %v6151_v50 = vld [vmem:[#allocation41_spill] sm:$0xff]  ;;  %v6157_v55 = vld [vmem:[#allocation44_spill] sm:$0xff] }
 0x185   :  { %6142 = vst [vmem:[#allocation20_spill] sm:$0xff] %v5026_v27  ;;  %6143 = vst [vmem:[#allocation21_spill] sm:$0xff] %v5028_v63  ;;  %v5032_v31 = vmul.f32 %v3001_v42, %v2024_v54  ;;  %v5034_v0 = vmul.f32 %v3003_v18, %v2024_v54  ;;  %v1452_v61 = vadd.f32 %v1445_v34, %v1410_v22  ;;  %3008 = vtanh.f32 %v1450_v23  ;;  %v6153_v42 = vld [vmem:[#allocation42_spill] sm:$0xff] }
 0x186   :  { %6144 = vst [vmem:[#allocation22_spill] sm:$0xff] %v5030_v43  ;;  %v5036_v3 = vmul.f32 %v3005_v20, %v2024_v54  ;;  %v5038_v24 = vmul.f32 %v3007_v37, %v2024_v54  ;;  %v1453_v40 = vadd.f32 %v1446_v48, %v1411_v11  ;;  %v6150_v45 = vrot.slane %v6149_v46, %v3286_v16  ;;  %v6161_v49 = vld [vmem:[#allocation46_spill] sm:$0xff] }
 0x187   :  { %6145 = vst [vmem:[#allocation23_spill] sm:$0xff] %v5032_v31  ;;  %6146 = vst [vmem:[#allocation24_spill] sm:$0xff] %v5034_v0  ;;  %v1454_v59 = vadd.f32 %v1447_v57, %v1412_v58  ;;  %v1455_v60 = vadd.f32 %v1448_v62, %v1413_v7  ;;  %v6152_v36 = vrot.slane %v6151_v50, %v3286_v16  ;;  %3010 = vtanh.f32 %v1451_v8  ;;  %v6159_v62 = vld [vmem:[#allocation45_spill] sm:$0xff]  ;;  %v5093_v31 = vpop.permute.xlu1 %1465 }
 0x188   :  { %6147 = vst [vmem:[#allocation25_spill] sm:$0xff] %v5036_v3  ;;  %6148 = vst [vmem:[#allocation26_spill] sm:$0xff] %v5038_v24  ;;  %v2355_v5 = vmul.f32 %v6150_v45, %v3828_v30  ;;  %v1456_v34 = vadd.f32 %v1449_v12, %v1414_v15  ;;  %v6154_v48 = vrot.slane %v6153_v42, %v3286_v16  ;;  %3012 = vtanh.f32 %v1452_v61 }
 0x189   :  { %v2356_v13 = vmul.f32 %v6152_v36, %v3828_v30  ;;  %v6156_v2 = vrot.slane %v6155_v38, %v3286_v16  ;;  %v6158_v18 = vrot.slane %v6157_v55, %v3286_v16  ;;  %v6160_v29 = vrot.slane %v6159_v62, %v3286_v16 }
 0x18a   :  { %v2357_v52 = vmul.f32 %v6154_v48, %v3828_v30  ;;  %v6162_v10 = vrot.slane %v6161_v49, %v3286_v16  ;;  %3014 = vtanh.f32 %v1453_v40  ;;  %v2366_v20 = vrot.slane %v2326_v39, %v3286_v16 }
 0x18b   :  { %v2358_v57 = vmul.f32 %v6156_v2, %v3828_v30  ;;  %v2359_v56 = vmul.f32 %v6158_v18, %v3828_v30  ;;  %v2360_v12 = vmul.f32 %v6160_v29, %v3828_v30  ;;  %v2370_v6 = vrot.slane %v2326_v39, %v3296_v21 }
 0x18c   :  { %v2361_v22 = vmul.f32 %v6162_v10, %v3828_v30  ;;  %v2374_v11 = vrot.slane %v2326_v39, %v3288_v17  ;;  %v2378_v37 = vrot.slane %v2326_v39, %v3304_v25  ;;  %v2382_v54 = vrot.slane %v2326_v39, %v3306_v26 }
 0x18d   :  { %v2386_v4 = vrot.slane %v2326_v39, %v3318_v32  ;;  %v2408_v58 = vrot.slane %v6149_v46, %v3296_v21  ;;  %3016 = vtanh.f32 %v1454_v59  ;;  %v2412_v7 = vrot.slane %v6151_v50, %v3296_v21 }
 0x18e   :  { %v2416_v23 = vrot.slane %v6153_v42, %v3296_v21  ;;  %v2420_v15 = vrot.slane %v6155_v38, %v3296_v21  ;;  %v2390_v8 = vrot.slane %v2326_v39, %v3320_v33  ;;  %v2424_v61 = vrot.slane %v6157_v55, %v3296_v21 }
 0x18f   :  { %v2428_v40 = vrot.slane %v6159_v62, %v3296_v21  ;;  %v2432_v45 = vrot.slane %v6161_v49, %v3296_v21  ;;  %3018 = vtanh.f32 %v1455_v60  ;;  %v2398_v59 = vadd.f32 %v2366_v20, %v2355_v5  ;;  %v3009_v0 = vpop.eup %3008 }
 0x190   :  { %v2399_v36 = vadd.f32 %v2370_v6, %v2356_v13  ;;  %v2400_v48 = vadd.f32 %v2374_v11, %v2357_v52  ;;  %3020 = vtanh.f32 %v1456_v34  ;;  %v2401_v2 = vadd.f32 %v2378_v37, %v2358_v57 }
 0x191   :  { %v2402_v18 = vadd.f32 %v2382_v54, %v2359_v56  ;;  %v2433_v29 = vmul.f32 %v2408_v58, %v3888_v47  ;;  %v2403_v10 = vadd.f32 %v2386_v4, %v2360_v12  ;;  %v2434_v39 = vmul.f32 %v2412_v7, %v3888_v47  ;;  %v3011_v34 = vpop.eup %3010 }
 0x192   :  { %v2435_v24 = vmul.f32 %v2416_v23, %v3888_v47  ;;  %v2436_v3 = vmul.f32 %v2420_v15, %v3888_v47  ;;  %v2404_v43 = vadd.f32 %v2390_v8, %v2361_v22  ;;  %v2437_v5 = vmul.f32 %v2424_v61, %v3888_v47  ;;  %v3013_v22 = vpop.eup %3012 }
 0x193   :  { %v2438_v60 = vmul.f32 %v2428_v40, %v3888_v47  ;;  %v2439_v13 = vmul.f32 %v2432_v45, %v3888_v47  ;;  %v2450_v52 = vrot.slane %v6149_v46, %v3288_v17  ;;  %v2454_v57 = vrot.slane %v6151_v50, %v3288_v17 }
 0x194   :  { %v2458_v56 = vrot.slane %v6153_v42, %v3288_v17  ;;  %v2462_v12 = vrot.slane %v6155_v38, %v3288_v17  ;;  %v2440_v20 = vadd.f32 %v2433_v29, %v2398_v59  ;;  %v2466_v6 = vrot.slane %v6157_v55, %v3288_v17  ;;  %v5112_v54 = vpop.eup %3014 }
 0x195   :  { %v2470_v11 = vrot.slane %v6159_v62, %v3288_v17  ;;  %v2474_v37 = vrot.slane %v6161_v49, %v3288_v17  ;;  %v5115_v4 = vmul.f32 %v3009_v0, %v5093_v31  ;;  %v2441_v58 = vadd.f32 %v2434_v39, %v2399_v36 }
 0x196   :  { %v2442_v7 = vadd.f32 %v2435_v24, %v2400_v48  ;;  %v2443_v23 = vadd.f32 %v2436_v3, %v2401_v2  ;;  %v5118_v15 = vmul.f32 %v3011_v34, %v5093_v31  ;;  %v2444_v8 = vadd.f32 %v2437_v5, %v2402_v18 }
 0x197   :  { %v2445_v61 = vadd.f32 %v2438_v60, %v2403_v10  ;;  %v2446_v40 = vadd.f32 %v2439_v13, %v2404_v43  ;;  %v3017_v45 = vpop.eup %3016  ;;  %v2475_v59 = vmul.f32 %v2450_v52, %v3886_v44  ;;  %v2476_v29 = vmul.f32 %v2454_v57, %v3886_v44 }
 0x198   :  { %v2477_v63 = vmul.f32 %v2458_v56, %v3886_v44  ;;  %v2478_v27 = vmul.f32 %v2462_v12, %v3886_v44  ;;  %v2479_v0 = vmul.f32 %v2466_v6, %v3886_v44  ;;  %v2480_v24 = vmul.f32 %v2470_v11, %v3886_v44  ;;  %v3078_v12 = vld [vmem:[#allocation7 + $0x1c8] sm:$0x1f] }
 0x199   :  { %v2481_v3 = vmul.f32 %v2474_v37, %v3886_v44  ;;  %v2492_v36 = vrot.slane %v6149_v46, %v3304_v25  ;;  %v3019_v48 = vpop.eup %3018  ;;  %v2482_v43 = vadd.f32 %v2475_v59, %v2440_v20  ;;  %v2483_v2 = vadd.f32 %v2476_v29, %v2441_v58 }
 0x19a   :  { %v2496_v18 = vrot.slane %v6151_v50, %v3304_v25  ;;  %v2500_v10 = vrot.slane %v6153_v42, %v3304_v25  ;;  %v5133_v39 = vpop.eup %3020  ;;  %v2484_v5 = vadd.f32 %v2477_v63, %v2442_v7  ;;  %v2485_v60 = vadd.f32 %v2478_v27, %v2443_v23  ;;  %v3079_v63 = vld [vmem:[#allocation7 + $0x1d0] sm:$0x1f] }
 0x19b   :  { %v2504_v13 = vrot.slane %v6155_v38, %v3304_v25  ;;  %v2534_v34 = vrot.slane %v6149_v46, %v3306_v26  ;;  %v2486_v52 = vadd.f32 %v2479_v0, %v2444_v8  ;;  %v2487_v57 = vadd.f32 %v2480_v24, %v2445_v61 }
 0x19c   :  { %v2488_v56 = vadd.f32 %v2481_v3, %v2446_v40  ;;  %v2538_v20 = vrot.slane %v3078_v12, %v3306_v26  ;;  %v2508_v50 = vrot.slane %v6157_v55, %v3304_v25  ;;  %v2512_v42 = vrot.slane %v6159_v62, %v3304_v25 }
 0x19d   :  { %v2517_v27 = vmul.f32 %v2492_v36, %v3965_v51  ;;  %v2542_v6 = vrot.slane %v3079_v63, %v3306_v26  ;;  %v2516_v46 = vrot.slane %v6161_v49, %v3304_v25  ;;  %v2518_v11 = vmul.f32 %v2496_v18, %v3965_v51  ;;  %v5193_v63 = vld [vmem:[#allocation7 + $0x120] sm:$0x1f] }
 0x19e   :  { %v2519_v37 = vmul.f32 %v2500_v10, %v3965_v51  ;;  %v2546_v58 = vrot.slane %v6155_v38, %v3306_v26  ;;  %v2520_v7 = vmul.f32 %v2504_v13, %v3965_v51  ;;  %v2550_v8 = vrot.slane %v6157_v55, %v3306_v26 }
 0x19f   :  { %v2524_v23 = vadd.f32 %v2517_v27, %v2482_v43  ;;  %v2559_v61 = vmul.f32 %v2534_v34, %v4011_v53  ;;  %v2525_v40 = vadd.f32 %v2518_v11, %v2483_v2  ;;  %v2554_v59 = vrot.slane %v6159_v62, %v3306_v26  ;;  %v5191_v27 = vld [vmem:[#allocation7 + $0x118] sm:$0x1f]  ;;  %v5209_v11 = vld [vmem:[#allocation7 + $0x140] sm:$0x1f] }
 0x1a0   :  { %v2558_v29 = vrot.slane %v6161_v49, %v3306_v26  ;;  %v2560_v0 = vmul.f32 %v2538_v20, %v4011_v53  ;;  %v2521_v24 = vmul.f32 %v2508_v50, %v3965_v51  ;;  %v2522_v38 = vmul.f32 %v2512_v42, %v3965_v51 }
 0x1a1   :  { %v2526_v3 = vadd.f32 %v2519_v37, %v2484_v5  ;;  %v2561_v36 = vmul.f32 %v2542_v6, %v4011_v53  ;;  %v1470_v55 = vmul.f32 %v3013_v22, %v5093_v31  ;;  %v2523_v43 = vmul.f32 %v2516_v46, %v3965_v51  ;;  %v5205_v6 = vld [vmem:[#allocation7 + $0x130] sm:$0x1f]  ;;  %v5207_v46 = vld [vmem:[#allocation7 + $0x138] sm:$0x1f] }
 0x1a2   :  { %v2527_v2 = vadd.f32 %v2520_v7, %v2485_v60  ;;  %v2562_v18 = vmul.f32 %v2546_v58, %v4011_v53  ;;  %v2528_v62 = vadd.f32 %v2521_v24, %v2486_v52  ;;  %v2529_v10 = vadd.f32 %v2522_v38, %v2487_v57  ;;  %v5213_v58 = vld [vmem:[#allocation7 + $0x148] sm:$0x1f] }
 0x1a3   :  { %v2563_v49 = vmul.f32 %v2550_v8, %v4011_v53  ;;  %v2566_v13 = vadd.f32 %v2559_v61, %v2524_v23  ;;  %v2530_v34 = vadd.f32 %v2523_v43, %v2488_v56  ;;  %v2564_v12 = vmul.f32 %v2554_v59, %v4011_v53 }
 0x1a4   :  { %v2565_v20 = vmul.f32 %v2558_v29, %v4011_v53  ;;  %v2567_v5 = vadd.f32 %v2560_v0, %v2525_v40  ;;  %v5172_v50 = vmul.f32 %v5112_v54, %v5093_v31  ;;  %v5176_v22 = vadd.f32 %v5115_v4, %v5000_v28  ;;  %v5195_v4 = vld [vmem:[#allocation7 + $0x128] sm:$0x1f] }
 0x1a5   :  { %v5180_v60 = vadd.f32 %v5118_v15, %v5004_v1  ;;  %v2568_v52 = vadd.f32 %v2561_v36, %v2526_v3  ;;  %v5183_v57 = vmul.f32 %v3017_v45, %v5093_v31  ;;  %v5186_v56 = vmul.f32 %v3019_v48, %v5093_v31  ;;  %v5197_v1 = vld [vmem:[#allocation8 + $0x23] sm:$0xff] }
 0x1a6   :  { %6163 = vst [vmem:[#allocation27_spill] sm:$0xff] %v5176_v22  ;;  %v5189_v42 = vadd.f32 %v1470_v55, %v5008_v19  ;;  %v2569_v54 = vadd.f32 %v2562_v18, %v2527_v2  ;;  %v2570_v28 = vadd.f32 %v2563_v49, %v2528_v62  ;;  %3022 = vtanh.f32 %v2566_v13 }
 0x1a7   :  { %6164 = vst [vmem:[#allocation28_spill] sm:$0xff] %v5180_v60  ;;  %6165 = vst [vmem:[#allocation29_spill] sm:$0xff] %v5183_v57  ;;  %v1493_v15 = vrot.slane %v5191_v27, %v3286_v16  ;;  %v1497_v45 = vrot.slane %v5193_v63, %v3286_v16  ;;  %v2571_v48 = vadd.f32 %v2564_v12, %v2529_v10  ;;  %3024 = vtanh.f32 %v2567_v5 }
 0x1a8   :  { %6166 = vst [vmem:[#allocation30_spill] sm:$0xff] %v5186_v56  ;;  %6167 = vst [vmem:[#allocation31_spill] sm:$0xff] %v5189_v42  ;;  %v5203_v19 = vadd.f32 %v2565_v20, %v2530_v34  ;;  %v1501_v37 = vrot.slane %v5195_v4, %v3286_v16  ;;  %3026 = vtanh.f32 %v2568_v52  ;;  %v1505_v7 = vrot.slane %v5205_v6, %v3286_v16 }
 0x1a9   :  { %v1509_v23 = vrot.slane %v5207_v46, %v3286_v16  ;;  %v1513_v8 = vrot.slane %v5209_v11, %v3286_v16  ;;  %3028 = vtanh.f32 %v2569_v54  ;;  %v1517_v61 = vrot.slane %v5213_v58, %v3286_v16 }
 0x1aa   :  { %v1529_v40 = vrot.slane %v5197_v1, %v3286_v16  ;;  %v1533_v59 = vrot.slane %v5197_v1, %v3296_v21  ;;  %3030 = vtanh.f32 %v2570_v28  ;;  %v1537_v29 = vrot.slane %v5197_v1, %v3288_v17 }
 0x1ab   :  { %v1541_v0 = vrot.slane %v5197_v1, %v3304_v25  ;;  %v1545_v24 = vrot.slane %v5197_v1, %v3306_v26  ;;  %3032 = vtanh.f32 %v2571_v48  ;;  %v1549_v38 = vrot.slane %v5197_v1, %v3318_v32 }
 0x1ac   :  { %v1553_v3 = vrot.slane %v5197_v1, %v3320_v33  ;;  %v1571_v36 = vrot.slane %v5191_v27, %v3296_v21  ;;  %v1575_v55 = vrot.slane %v5193_v63, %v3296_v21  ;;  %v1579_v43 = vrot.slane %v5195_v4, %v3296_v21 }
 0x1ad   :  { %v1583_v2 = vrot.slane %v5205_v6, %v3296_v21  ;;  %v1613_v18 = vrot.slane %v5191_v27, %v3288_v17  ;;  %v1587_v62 = vrot.slane %v5207_v46, %v3296_v21  ;;  %v1617_v10 = vrot.slane %v5193_v63, %v3288_v17 }
 0x1ae   :  { %v1518_v49 = vmul.f32 %v1493_v15, %v3828_v30  ;;  %v1519_v13 = vmul.f32 %v1497_v45, %v3828_v30  ;;  %v1591_v34 = vrot.slane %v5209_v11, %v3296_v21  ;;  %v1595_v12 = vrot.slane %v5213_v58, %v3296_v21 }
 0x1af   :  { %v1621_v20 = vrot.slane %v5195_v4, %v3288_v17  ;;  %v1520_v5 = vmul.f32 %v1501_v37, %v3828_v30  ;;  %v1625_v52 = vrot.slane %v5205_v6, %v3288_v17  ;;  %v1629_v54 = vrot.slane %v5207_v46, %v3288_v17 }
 0x1b0   :  { %v1633_v28 = vrot.slane %v5209_v11, %v3288_v17  ;;  %v1521_v1 = vmul.f32 %v1505_v7, %v3828_v30  ;;  %v5267_v15 = vpop.eup %3022  ;;  %v1638_v48 = vmul.f32 %v1613_v18, %v3886_v44  ;;  %v1561_v42 = vadd.f32 %v1529_v40, %v1518_v49 }
 0x1b1   :  { %6168 = vst [vmem:[#allocation15_spill] sm:$0xff] %v5267_v15  ;;  %v1596_v37 = vmul.f32 %v1571_v36, %v3888_v47  ;;  %v5273_v60 = vpop.eup %3024  ;;  %v1639_v22 = vmul.f32 %v1617_v10, %v3886_v44  ;;  %v1522_v9 = vmul.f32 %v1509_v23, %v3828_v30  ;;  %v1562_v56 = vadd.f32 %v1533_v59, %v1519_v13 }
 0x1b2   :  { %6169 = vst [vmem:[#allocation32_spill] sm:$0xff] %v5273_v60  ;;  %v1597_v35 = vmul.f32 %v1575_v55, %v3888_v47  ;;  %v5278_v7 = vpop.eup %3026  ;;  %v1640_v15 = vmul.f32 %v1621_v20, %v3886_v44  ;;  %v1523_v45 = vmul.f32 %v1513_v8, %v3828_v30  ;;  %v1563_v57 = vadd.f32 %v1537_v29, %v1520_v5 }
 0x1b3   :  { %6170 = vst [vmem:[#allocation33_spill] sm:$0xff] %v5278_v7  ;;  %v1598_v40 = vmul.f32 %v1579_v43, %v3888_v47  ;;  %v5283_v18 = vpop.eup %3028  ;;  %v1641_v36 = vmul.f32 %v1625_v52, %v3886_v44  ;;  %v1655_v10 = vrot.slane %v5191_v27, %v3304_v25  ;;  %v1564_v23 = vadd.f32 %v1541_v0, %v1521_v1 }
 0x1b4   :  { %6171 = vst [vmem:[#allocation34_spill] sm:$0xff] %v5283_v18  ;;  %v1599_v59 = vmul.f32 %v1583_v2, %v3888_v47  ;;  %v5289_v55 = vpop.eup %3030  ;;  %v1642_v49 = vmul.f32 %v1629_v54, %v3886_v44  ;;  %v1643_v13 = vmul.f32 %v1633_v28, %v3886_v44  ;;  %v1659_v8 = vrot.slane %v5193_v63, %v3304_v25 }
 0x1b5   :  { %6172 = vst [vmem:[#allocation35_spill] sm:$0xff] %v5289_v55  ;;  %v1603_v29 = vadd.f32 %v1596_v37, %v1561_v42  ;;  %v5295_v43 = vpop.eup %3032  ;;  %v1524_v20 = vmul.f32 %v1517_v61, %v3828_v30  ;;  %v1565_v5 = vadd.f32 %v1545_v24, %v1522_v9  ;;  %v1600_v52 = vmul.f32 %v1587_v62, %v3888_v47 }
 0x1b6   :  { %6173 = vst [vmem:[#allocation36_spill] sm:$0xff] %v5295_v43  ;;  %v1604_v0 = vadd.f32 %v1597_v35, %v1562_v56  ;;  %v1663_v2 = vrot.slane %v5195_v4, %v3304_v25  ;;  %v1566_v1 = vadd.f32 %v1549_v38, %v1523_v45  ;;  %v1601_v54 = vmul.f32 %v1591_v34, %v3888_v47 }
 0x1b7   :  { %v1605_v55 = vadd.f32 %v1598_v40, %v1563_v57  ;;  %v1667_v28 = vrot.slane %v5205_v6, %v3304_v25  ;;  %v1671_v42 = vrot.slane %v5207_v46, %v3304_v25  ;;  %v1675_v61 = vrot.slane %v5209_v11, %v3304_v25 }
 0x1b8   :  { %v1606_v9 = vadd.f32 %v1599_v59, %v1564_v23  ;;  %v1679_v35 = vrot.slane %v5213_v58, %v3304_v25  ;;  %v1697_v56 = vrot.slane %v5191_v27, %v3306_v26  ;;  %v1701_v24 = vrot.slane %v5193_v63, %v3306_v26 }
 0x1b9   :  { %v1645_v57 = vadd.f32 %v1638_v48, %v1603_v29  ;;  %v1567_v38 = vadd.f32 %v1553_v3, %v1524_v20  ;;  %v1602_v62 = vmul.f32 %v1595_v12, %v3888_v47  ;;  %v1607_v34 = vadd.f32 %v1600_v52, %v1565_v5 }
 0x1ba   :  { %v1646_v45 = vadd.f32 %v1639_v22, %v1604_v0  ;;  %v1680_v37 = vmul.f32 %v1655_v10, %v3965_v51  ;;  %v1705_v40 = vrot.slane %v5195_v4, %v3306_v26  ;;  %v1608_v23 = vadd.f32 %v1601_v54, %v1566_v1 }
 0x1bb   :  { %v1647_v59 = vadd.f32 %v1640_v15, %v1605_v55  ;;  %v1681_v43 = vmul.f32 %v1659_v8, %v3965_v51  ;;  %v1682_v27 = vmul.f32 %v1663_v2, %v3965_v51  ;;  %v1709_v63 = vrot.slane %v5205_v6, %v3306_v26 }
 0x1bc   :  { %v1648_v48 = vadd.f32 %v1641_v36, %v1606_v9  ;;  %v1683_v3 = vmul.f32 %v1667_v28, %v3965_v51  ;;  %v1713_v22 = vrot.slane %v5207_v46, %v3306_v26  ;;  %v1722_v12 = vmul.f32 %v1697_v56, %v4011_v53 }
 0x1bd   :  { %v1687_v10 = vadd.f32 %v1680_v37, %v1645_v57  ;;  %v1723_v4 = vmul.f32 %v1701_v24, %v4011_v53  ;;  %v1609_v29 = vadd.f32 %v1602_v62, %v1567_v38  ;;  %v1649_v15 = vadd.f32 %v1642_v49, %v1607_v34  ;;  %v5343_v57 = vld [vmem:[#allocation7 + $0x1f8] sm:$0x1f] }
 0x1be   :  { %v1688_v55 = vadd.f32 %v1681_v43, %v1646_v45  ;;  %v1717_v8 = vrot.slane %v5209_v11, %v3306_v26  ;;  %v1724_v20 = vmul.f32 %v1705_v40, %v4011_v53  ;;  %v1650_v6 = vadd.f32 %v1643_v13, %v1608_v23  ;;  %v5362_v40 = vld [vmem:[#allocation7 + $0x218] sm:$0x1f] }
 0x1bf   :  { %v1689_v36 = vadd.f32 %v1682_v27, %v1647_v59  ;;  %v6174_v5 = vrot.slane %v5213_v58, %v3288_v17  ;;  %v1684_v52 = vmul.f32 %v1671_v42, %v3965_v51  ;;  %v1725_v0 = vmul.f32 %v1709_v63, %v4011_v53  ;;  %v5366_v63 = vld [vmem:[#allocation7 + $0x220] sm:$0x1f] }
 0x1c0   :  { %v1690_v2 = vadd.f32 %v1683_v3, %v1648_v48  ;;  %3034 = vtanh.f32 %v5203_v19  ;;  %v1685_v49 = vmul.f32 %v1675_v61, %v3965_v51  ;;  %v1721_v11 = vrot.slane %v5213_v58, %v3306_v26  ;;  %v5345_v19 = vld [vmem:[#allocation7 + $0x200] sm:$0x1f]  ;;  %v5347_v61 = vld [vmem:[#allocation7 + $0x208] sm:$0x1f]  ;;  %v5349_v58 = vld [vmem:[#allocation7 + $0x210] sm:$0x1f] }
 0x1c1   :  { %v1644_v46 = vmul.f32 %v6174_v5, %v3886_v44  ;;  %v1729_v43 = vadd.f32 %v1722_v12, %v1687_v10  ;;  %v1726_v13 = vmul.f32 %v1713_v22, %v4011_v53  ;;  %v1691_v54 = vadd.f32 %v1684_v52, %v1649_v15  ;;  %6176 = vst [vmem:[#allocation37_spill] sm:$0xff] %v5366_v63  ;;  %v5368_v48 = vld [vmem:[#allocation7 + $0x228] sm:$0x1f]  ;;  %v2605_v3 = vld [vmem:[#allocation8 + $0x3f] sm:$0xff] }
 0x1c2   :  { %v1730_v28 = vadd.f32 %v1723_v4, %v1688_v55  ;;  %v1686_v9 = vmul.f32 %v1679_v35, %v3965_v51  ;;  %v1727_v42 = vmul.f32 %v1717_v8, %v4011_v53  ;;  %v1692_v56 = vadd.f32 %v1685_v49, %v1650_v6 }
 0x1c3   :  { %v1651_v1 = vadd.f32 %v1644_v46, %v1609_v29  ;;  %v1731_v24 = vadd.f32 %v1724_v20, %v1689_v36  ;;  %v1732_v38 = vadd.f32 %v1725_v0, %v1690_v2  ;;  %v2609_v62 = vrot.slane %v5343_v57, %v3286_v16 }
 0x1c4   :  { %v2613_v34 = vrot.slane %v5345_v19, %v3286_v16  ;;  %v2617_v35 = vrot.slane %v5347_v61, %v3286_v16  ;;  %v5359_v45 = vadd.f32 %v5172_v50, %v5012_v41  ;;  %v1728_v37 = vmul.f32 %v1721_v11, %v4011_v53 }
 0x1c5   :  { %3036 = vtanh.f32 %v1729_v43  ;;  %v2621_v23 = vrot.slane %v5349_v58, %v3286_v16  ;;  %v1693_v59 = vadd.f32 %v1686_v9, %v1651_v1  ;;  %v1733_v27 = vadd.f32 %v1726_v13, %v1691_v54 }
 0x1c6   :  { %6175 = vst [vmem:[#allocation38_spill] sm:$0xff] %v5359_v45  ;;  %3038 = vtanh.f32 %v1730_v28  ;;  %v2625_v41 = vrot.slane %v5362_v40, %v3286_v16  ;;  %v5372_v50 = vadd.f32 %v1727_v42, %v1692_v56  ;;  %v2629_v22 = vrot.slane %v5366_v63, %v3286_v16 }
 0x1c7   :  { %3040 = vtanh.f32 %v1731_v24  ;;  %v2633_v12 = vrot.slane %v5368_v48, %v3286_v16  ;;  %v2634_v10 = vmul.f32 %v2609_v62, %v3828_v30  ;;  %v2635_v4 = vmul.f32 %v2613_v34, %v3828_v30 }
 0x1c8   :  { %3042 = vtanh.f32 %v1732_v38  ;;  %v2636_v29 = vmul.f32 %v2617_v35, %v3828_v30  ;;  %v2637_v15 = vmul.f32 %v2621_v23, %v3828_v30  ;;  %v2645_v55 = vrot.slane %v2605_v3, %v3286_v16 }
 0x1c9   :  { %v2649_v8 = vrot.slane %v2605_v3, %v3296_v21  ;;  %v2687_v20 = vrot.slane %v5343_v57, %v3296_v21  ;;  %v2638_v6 = vmul.f32 %v2625_v41, %v3828_v30  ;;  %v2653_v36 = vrot.slane %v2605_v3, %v3288_v17 }
 0x1ca   :  { %v2657_v5 = vrot.slane %v2605_v3, %v3304_v25  ;;  %v2691_v46 = vrot.slane %v5345_v19, %v3296_v21  ;;  %v5391_v52 = vpop.eup %3034  ;;  %v2639_v0 = vmul.f32 %v2629_v22, %v3828_v30  ;;  %v2661_v2 = vrot.slane %v2605_v3, %v3306_v26 }
 0x1cb   :  { %6177 = vst [vmem:[#allocation39_spill] sm:$0xff] %v5391_v52  ;;  %v2695_v49 = vrot.slane %v5347_v61, %v3296_v21  ;;  %v2699_v11 = vrot.slane %v5349_v58, %v3296_v21  ;;  %v2640_v43 = vmul.f32 %v2633_v12, %v3828_v30  ;;  %v2665_v13 = vrot.slane %v2605_v3, %v3318_v32 }
 0x1cc   :  { %v2703_v1 = vrot.slane %v5362_v40, %v3296_v21  ;;  %v2707_v54 = vrot.slane %v5366_v63, %v3296_v21  ;;  %v2669_v28 = vrot.slane %v2605_v3, %v3320_v33  ;;  %v2677_v9 = vadd.f32 %v2645_v55, %v2634_v10 }
 0x1cd   :  { %v2678_v42 = vadd.f32 %v2649_v8, %v2635_v4  ;;  %v2712_v56 = vmul.f32 %v2687_v20, %v3888_v47  ;;  %v2679_v24 = vadd.f32 %v2653_v36, %v2636_v29  ;;  %v2680_v38 = vadd.f32 %v2657_v5, %v2637_v15 }
 0x1ce   :  { %v2711_v62 = vrot.slane %v5368_v48, %v3296_v21  ;;  %v2713_v34 = vmul.f32 %v2691_v46, %v3888_v47  ;;  %v2681_v23 = vadd.f32 %v2661_v2, %v2638_v6  ;;  %v2714_v41 = vmul.f32 %v2695_v49, %v3888_v47 }
 0x1cf   :  { %v5410_v35 = vpop.eup %3036  ;;  %v2715_v22 = vmul.f32 %v2699_v11, %v3888_v47  ;;  %v2729_v3 = vrot.slane %v5343_v57, %v3288_v17  ;;  %v2682_v10 = vadd.f32 %v2665_v13, %v2639_v0  ;;  %v2716_v4 = vmul.f32 %v2703_v1, %v3888_v47 }
 0x1d0   :  { %6178 = vst [vmem:[#allocation16_spill] sm:$0xff] %v5410_v35  ;;  %v5416_v12 = vpop.eup %3038  ;;  %v2717_v29 = vmul.f32 %v2707_v54, %v3888_v47  ;;  %v2733_v15 = vrot.slane %v5345_v19, %v3288_v17  ;;  %v1735_v8 = vadd.f32 %v1728_v37, %v1693_v59  ;;  %3044 = vtanh.f32 %v1733_v27 }
 0x1d1   :  { %6179 = vst [vmem:[#allocation17_spill] sm:$0xff] %v5416_v12  ;;  %v5422_v55 = vpop.eup %3040  ;;  %v2719_v20 = vadd.f32 %v2712_v56, %v2677_v9  ;;  %v2737_v6 = vrot.slane %v5347_v61, %v3288_v17  ;;  %v2683_v5 = vadd.f32 %v2669_v28, %v2640_v43  ;;  %v2718_v46 = vmul.f32 %v2711_v62, %v3888_v47 }
 0x1d2   :  { %6180 = vst [vmem:[#allocation40_spill] sm:$0xff] %v5422_v55  ;;  %v5426_v36 = vpop.eup %3042  ;;  %v2720_v0 = vadd.f32 %v2713_v34, %v2678_v42  ;;  %v2741_v2 = vrot.slane %v5349_v58, %v3288_v17  ;;  %v2721_v49 = vadd.f32 %v2714_v41, %v2679_v24  ;;  %v2722_v11 = vadd.f32 %v2715_v22, %v2680_v38 }
 0x1d3   :  { %6181 = vst [vmem:[#allocation41_spill] sm:$0xff] %v5426_v36  ;;  %v2754_v13 = vmul.f32 %v2729_v3, %v3886_v44  ;;  %v2771_v37 = vrot.slane %v5343_v57, %v3304_v25  ;;  %v2723_v59 = vadd.f32 %v2716_v4, %v2681_v23  ;;  %v2724_v27 = vadd.f32 %v2717_v29, %v2682_v10 }
 0x1d4   :  { %v2755_v1 = vmul.f32 %v2733_v15, %v3886_v44  ;;  %v2775_v43 = vrot.slane %v5345_v19, %v3304_v25  ;;  %v2756_v54 = vmul.f32 %v2737_v6, %v3886_v44  ;;  %v2779_v9 = vrot.slane %v5347_v61, %v3304_v25 }
 0x1d5   :  { %v2761_v28 = vadd.f32 %v2754_v13, %v2719_v20  ;;  %v2813_v42 = vrot.slane %v5343_v57, %v3306_v26  ;;  %v2745_v56 = vrot.slane %v5362_v40, %v3288_v17  ;;  %v2757_v24 = vmul.f32 %v2741_v2, %v3886_v44 }
 0x1d6   :  { %v2762_v38 = vadd.f32 %v2755_v1, %v2720_v0  ;;  %v2817_v62 = vrot.slane %v5345_v19, %v3306_v26  ;;  %v2763_v34 = vadd.f32 %v2756_v54, %v2721_v49  ;;  %v2783_v23 = vrot.slane %v5349_v58, %v3304_v25 }
 0x1d7   :  { %v2796_v41 = vmul.f32 %v2771_v37, %v3965_v51  ;;  %v2821_v22 = vrot.slane %v5347_v61, %v3306_v26  ;;  %v2749_v57 = vrot.slane %v5366_v63, %v3288_v17  ;;  %v2753_v3 = vrot.slane %v5368_v48, %v3288_v17 }
 0x1d8   :  { %v2764_v10 = vadd.f32 %v2757_v24, %v2722_v11  ;;  %v2797_v4 = vmul.f32 %v2775_v43, %v3965_v51  ;;  %v2798_v19 = vmul.f32 %v2779_v9, %v3965_v51  ;;  %v2825_v15 = vrot.slane %v5349_v58, %v3306_v26 }
 0x1d9   :  { %v2803_v29 = vadd.f32 %v2796_v41, %v2761_v28  ;;  %v2838_v20 = vmul.f32 %v2813_v42, %v4011_v53  ;;  %v2758_v6 = vmul.f32 %v2745_v56, %v3886_v44  ;;  %v2787_v61 = vrot.slane %v5362_v40, %v3304_v25 }
 0x1da   :  { %v2804_v0 = vadd.f32 %v2797_v4, %v2762_v38  ;;  %v2839_v2 = vmul.f32 %v2817_v62, %v4011_v53  ;;  %v5465_v49 = vpop.eup %3044  ;;  %v2725_v11 = vadd.f32 %v2718_v46, %v2683_v5  ;;  %v2799_v13 = vmul.f32 %v2783_v23, %v3965_v51 }
 0x1db   :  { %6182 = vst [vmem:[#allocation42_spill] sm:$0xff] %v5465_v49  ;;  %v2805_v37 = vadd.f32 %v2798_v19, %v2763_v34  ;;  %v2840_v1 = vmul.f32 %v2821_v22, %v4011_v53  ;;  %3046 = vtanh.f32 %v5372_v50  ;;  %v2759_v58 = vmul.f32 %v2749_v57, %v3886_v44  ;;  %v5503_v57 = vld [vmem:[#allocation7 + $0x198] sm:$0x1f]  ;;  %v5511_v19 = vld [vmem:[#allocation7 + $0x1a8] sm:$0x1f] }
 0x1dc   :  { %v2765_v43 = vadd.f32 %v2758_v6, %v2723_v59  ;;  %v2791_v54 = vrot.slane %v5366_v63, %v3304_v25  ;;  %v2760_v28 = vmul.f32 %v2753_v3, %v3886_v44  ;;  %v2806_v9 = vadd.f32 %v2799_v13, %v2764_v10  ;;  %v5505_v3 = vld [vmem:[#allocation7 + $0x1a0] sm:$0x1f] }
 0x1dd   :  { %v2841_v42 = vmul.f32 %v2825_v15, %v4011_v53  ;;  %v2845_v56 = vadd.f32 %v2838_v20, %v2803_v29  ;;  %v5477_v5 = vmul.f32 %v5133_v39, %v5093_v31  ;;  %3048 = vtanh.f32 %v1735_v8  ;;  %v5495_v8 = vld [vmem:[#allocation7 + $0x188] sm:$0x1f]  ;;  %v5513_v29 = vld [vmem:[#allocation7 + $0x1b0] sm:$0x1f]  ;;  %v5515_v15 = vld [vmem:[#allocation7 + $0x1b8] sm:$0x1f] }
 0x1de   :  { %v2800_v46 = vmul.f32 %v2787_v61, %v3965_v51  ;;  %v2846_v50 = vadd.f32 %v2839_v2, %v2804_v0  ;;  %v5480_v24 = vadd.f32 %v2759_v58, %v2724_v27  ;;  %v5482_v59 = vadd.f32 %v2760_v28, %v2725_v11  ;;  %v5497_v27 = vld [vmem:[#allocation7 + $0x190] sm:$0x1f]  ;;  %v5507_v10 = vld [vmem:[#allocation8 + $0x31] sm:$0xff] }
 0x1df   :  { %6183 = vst [vmem:[#allocation43_spill] sm:$0xff] %v5477_v5  ;;  %v2847_v62 = vadd.f32 %v2840_v1, %v2805_v37  ;;  %v5487_v34 = vmul.f32 %v2791_v54, %v3965_v51  ;;  %v5501_v22 = vadd.f32 %v2841_v42, %v2806_v9  ;;  %3050 = vtanh.f32 %v2845_v56 }
 0x1e0   :  { %6184 = vst [vmem:[#allocation44_spill] sm:$0xff] %v5482_v59  ;;  %v5489_v23 = vadd.f32 %v2800_v46, %v2765_v43  ;;  %3052 = vtanh.f32 %v2846_v50  ;;  %v2171_v9 = vrot.slane %v5495_v8, %v3288_v17  ;;  %v2129_v56 = vrot.slane %v5495_v8, %v3296_v21 }
 0x1e1   :  { %3054 = vtanh.f32 %v2847_v62  ;;  %v2133_v46 = vrot.slane %v5497_v27, %v3296_v21  ;;  %v2137_v50 = vrot.slane %v5503_v57, %v3296_v21  ;;  %v2141_v62 = vrot.slane %v5505_v3, %v3296_v21 }
 0x1e2   :  { %6185 = vst [vmem:[#allocation45_spill] sm:$0xff] %v5489_v23  ;;  %v2145_v41 = vrot.slane %v5511_v19, %v3296_v21  ;;  %v2175_v39 = vrot.slane %v5497_v27, %v3288_v17  ;;  %v2179_v38 = vrot.slane %v5503_v57, %v3288_v17  ;;  %v2183_v31 = vrot.slane %v5505_v3, %v3288_v17 }
 0x1e3   :  { %v2149_v54 = vrot.slane %v5513_v29, %v3296_v21  ;;  %v2153_v43 = vrot.slane %v5515_v15, %v3296_v21  ;;  %v2187_v58 = vrot.slane %v5511_v19, %v3288_v17  ;;  %v2191_v1 = vrot.slane %v5513_v29, %v3288_v17 }
 0x1e4   :  { %v2195_v37 = vrot.slane %v5515_v15, %v3288_v17  ;;  %v5576_v13 = vmul.f32 %v2171_v9, %v3886_v44  ;;  %v2213_v11 = vrot.slane %v5495_v8, %v3304_v25  ;;  %v2217_v2 = vrot.slane %v5497_v27, %v3304_v25 }
 0x1e5   :  { %v5545_v42 = vpop.eup %3046  ;;  %v2221_v0 = vrot.slane %v5503_v57, %v3304_v25  ;;  %v2225_v61 = vrot.slane %v5505_v3, %v3304_v25  ;;  %v2229_v6 = vrot.slane %v5511_v19, %v3304_v25  ;;  %v2233_v20 = vrot.slane %v5513_v29, %v3304_v25 }
 0x1e6   :  { %6186 = vst [vmem:[#allocation46_spill] sm:$0xff] %v5545_v42  ;;  %v2197_v4 = vmul.f32 %v2175_v39, %v3886_v44  ;;  %v2198_v52 = vmul.f32 %v2179_v38, %v3886_v44  ;;  %v2237_v45 = vrot.slane %v5515_v15, %v3304_v25  ;;  %v2200_v18 = vmul.f32 %v2187_v58, %v3886_v44 }
 0x1e7   :  { %v5563_v28 = vpop.eup %3048  ;;  %v2255_v7 = vrot.slane %v5495_v8, %v3306_v26  ;;  %v2259_v49 = vrot.slane %v5497_v27, %v3306_v26  ;;  %v2263_v39 = vrot.slane %v5503_v57, %v3306_v26  ;;  %v2201_v38 = vmul.f32 %v2191_v1, %v3886_v44 }
 0x1e8   :  { %6187 = vst [vmem:[#allocation47_spill] sm:$0xff] %v5563_v28  ;;  %v2199_v28 = vmul.f32 %v2183_v31, %v3886_v44  ;;  %v2202_v31 = vmul.f32 %v2195_v37, %v3886_v44  ;;  %v2238_v60 = vmul.f32 %v2213_v11, %v3965_v51  ;;  %v2240_v58 = vmul.f32 %v2221_v0, %v3965_v51 }
 0x1e9   :  { %v5590_v9 = vpop.eup %3050  ;;  %v2241_v36 = vmul.f32 %v2225_v61, %v3965_v51  ;;  %v2242_v55 = vmul.f32 %v2229_v6, %v3965_v51  ;;  %v2243_v12 = vmul.f32 %v2233_v20, %v3965_v51  ;;  %v2244_v5 = vmul.f32 %v2237_v45, %v3965_v51 }
 0x1ea   :  { %6188 = vst [vmem:[#allocation48_spill] sm:$0xff] %v5590_v9  ;;  %v5597_v42 = vpop.eup %3052  ;;  %v2271_v44 = vrot.slane %v5511_v19, %v3306_v26  ;;  %v2275_v11 = vrot.slane %v5513_v29, %v3306_v26  ;;  %v2279_v0 = vrot.slane %v5515_v15, %v3306_v26  ;;  %v2280_v61 = vmul.f32 %v2255_v7, %v4011_v53 }
 0x1eb   :  { %6189 = vst [vmem:[#allocation49_spill] sm:$0xff] %v5597_v42  ;;  %v5606_v9 = vpop.eup %3054  ;;  %v2239_v42 = vmul.f32 %v2217_v2, %v3965_v51  ;;  %v2281_v6 = vmul.f32 %v2259_v49, %v4011_v53  ;;  %v2282_v20 = vmul.f32 %v2263_v39, %v4011_v53  ;;  %v6191_v45 = vrot.slane %v5495_v8, %v3286_v16 }
 0x1ec   :  { %6190 = vst [vmem:[#allocation50_spill] sm:$0xff] %v5606_v9  ;;  %v2267_v9 = vrot.slane %v5505_v3, %v3306_v26  ;;  %v6192_v37 = vrot.slane %v5497_v27, %v3286_v16  ;;  %v6193_v23 = vrot.slane %v5503_v57, %v3286_v16  ;;  %v6194_v7 = vrot.slane %v5505_v3, %v3286_v16 }
 0x1ed   :  { %v2076_v2 = vmul.f32 %v6191_v45, %v3828_v30  ;;  %v6195_v8 = vrot.slane %v5511_v19, %v3286_v16  ;;  %v6196_v27 = vrot.slane %v5513_v29, %v3286_v16  ;;  %v6197_v57 = vrot.slane %v5515_v15, %v3286_v16 }
 0x1ee   :  { %v2077_v1 = vmul.f32 %v6192_v37, %v3828_v30  ;;  %v2078_v35 = vmul.f32 %v6193_v23, %v3828_v30  ;;  %v2079_v49 = vmul.f32 %v6194_v7, %v3828_v30  ;;  %v2154_v37 = vmul.f32 %v2129_v56, %v3888_v47 }
 0x1ef   :  { %v2080_v39 = vmul.f32 %v6195_v8, %v3828_v30  ;;  %v2081_v45 = vmul.f32 %v6196_v27, %v3828_v30  ;;  %v2082_v23 = vmul.f32 %v6197_v57, %v3828_v30  ;;  %v6198_v3 = vrot.slane %v5507_v10, %v3286_v16 }
 0x1f0   :  { %v6199_v19 = vrot.slane %v5507_v10, %v3296_v21  ;;  %v6200_v59 = vrot.slane %v5507_v10, %v3288_v17  ;;  %v6201_v27 = vrot.slane %v5507_v10, %v3304_v25  ;;  %v6202_v30 = vrot.slane %v5507_v10, %v3306_v26 }
 0x1f1   :  { %v2119_v7 = vadd.f32 %v6198_v3, %v2076_v2  ;;  %v6203_v16 = vrot.slane %v5507_v10, %v3318_v32  ;;  %v6204_v21 = vrot.slane %v5507_v10, %v3320_v33  ;;  %v2156_v17 = vmul.f32 %v2137_v50, %v3888_v47 }
 0x1f2   :  { %v2120_v8 = vadd.f32 %v6199_v19, %v2077_v1  ;;  %v2121_v29 = vadd.f32 %v6200_v59, %v2078_v35  ;;  %v2122_v63 = vadd.f32 %v6201_v27, %v2079_v49  ;;  %v2123_v15 = vadd.f32 %v6202_v30, %v2080_v39 }
 0x1f3   :  { %v2124_v56 = vadd.f32 %v6203_v16, %v2081_v45  ;;  %v2125_v2 = vadd.f32 %v6204_v21, %v2082_v23  ;;  %v2155_v1 = vmul.f32 %v2133_v46, %v3888_v47  ;;  %v2157_v35 = vmul.f32 %v2141_v62, %v3888_v47  ;;  %v6215_v21 = vld [vmem:[#allocation45_spill] sm:$0xff] }
 0x1f4   :  { %v2158_v59 = vmul.f32 %v2145_v41, %v3888_v47  ;;  %v2159_v49 = vmul.f32 %v2149_v54, %v3888_v47  ;;  %v2283_v39 = vmul.f32 %v2267_v9, %v4011_v53  ;;  %v2160_v57 = vmul.f32 %v2153_v43, %v3888_v47 }
 0x1f5   :  { %v2161_v32 = vadd.f32 %v2154_v37, %v2119_v7  ;;  %v2162_v45 = vadd.f32 %v2155_v1, %v2120_v8  ;;  %v2163_v3 = vadd.f32 %v2156_v17, %v2121_v29  ;;  %v2164_v19 = vadd.f32 %v2157_v35, %v2122_v63  ;;  %v6216_v1 = vld [vmem:[#allocation19_spill] sm:$0xff] }
 0x1f6   :  { %v2165_v33 = vadd.f32 %v2158_v59, %v2123_v15  ;;  %v2166_v10 = vadd.f32 %v2159_v49, %v2124_v56  ;;  %v2284_v46 = vmul.f32 %v2271_v44, %v4011_v53  ;;  %v2167_v23 = vadd.f32 %v2160_v57, %v2125_v2  ;;  %v6217_v17 = vld [vmem:[#allocation43_spill] sm:$0xff] }
 0x1f7   :  { %v2203_v50 = vadd.f32 %v5576_v13, %v2161_v32  ;;  %v2204_v62 = vadd.f32 %v2197_v4, %v2162_v45  ;;  %v2205_v27 = vadd.f32 %v2198_v52, %v2163_v3  ;;  %v2206_v41 = vadd.f32 %v2199_v28, %v2164_v19  ;;  %v6218_v59 = vld [vmem:[#allocation15_spill] sm:$0xff]  ;;  %v6222_v3 = vld [vmem:[#allocation41_spill] sm:$0xff] }
 0x1f8   :  { %v2207_v30 = vadd.f32 %v2200_v18, %v2165_v33  ;;  %v2208_v54 = vadd.f32 %v2201_v38, %v2166_v10  ;;  %v2285_v9 = vmul.f32 %v2275_v11, %v4011_v53  ;;  %v2209_v16 = vadd.f32 %v2202_v31, %v2167_v23  ;;  %v6208_v38 = vld [vmem:[#allocation37_spill] sm:$0xff]  ;;  %v6223_v33 = vld [vmem:[#allocation28_spill] sm:$0xff] }
 0x1f9   :  { %v2245_v47 = vadd.f32 %v2238_v60, %v2203_v50  ;;  %v2246_v43 = vadd.f32 %v2239_v42, %v2204_v62  ;;  %v2247_v37 = vadd.f32 %v2240_v58, %v2205_v27  ;;  %v2248_v7 = vadd.f32 %v2241_v36, %v2206_v41  ;;  %v6206_v60 = vld [vmem:[#allocation29_spill] sm:$0xff]  ;;  %v1745_v36 = vpop.permute.xlu1 %1744  ;;  %v2582_v42 = vpop.permute.xlu0 %2581  ;;  %v6224_v23 = vld [vmem:[#allocation32_spill] sm:$0xff]  ;;  %v6225_v62 = vld [vmem:[#allocation42_spill] sm:$0xff] }
 0x1fa   :  { %v2249_v63 = vadd.f32 %v2242_v55, %v2207_v30  ;;  %v2250_v8 = vadd.f32 %v2243_v12, %v2208_v54  ;;  %v2286_v29 = vmul.f32 %v2279_v0, %v4011_v53  ;;  %v2251_v44 = vadd.f32 %v2244_v5, %v2209_v16  ;;  %v6226_v41 = vld [vmem:[#allocation31_spill] sm:$0xff]  ;;  %v6227_v54 = vld [vmem:[#allocation33_spill] sm:$0xff]  ;;  %v6228_v16 = vld [vmem:[#allocation34_spill] sm:$0xff] }
 0x1fb   :  { %v2287_v15 = vadd.f32 %v2280_v61, %v2245_v47  ;;  %v2288_v56 = vadd.f32 %v2281_v6, %v2246_v43  ;;  %v6205_v52 = vrot.slane %v5362_v40, %v3306_v26  ;;  %3056 = vtanh.f32 %v5501_v22  ;;  %v6212_v61 = vld [vmem:[#allocation18_spill] sm:$0xff] }
 0x1fc   :  { %v2289_v4 = vadd.f32 %v2282_v20, %v2247_v37  ;;  %v2290_v13 = vadd.f32 %v2283_v39, %v2248_v7  ;;  %v1479_v28 = vadd.f32 %v6206_v60, %v5016_v14  ;;  %v6207_v12 = vrot.slane %v5368_v48, %v3304_v25  ;;  %v6210_v14 = vld [vmem:[#allocation44_spill] sm:$0xff]  ;;  %v6213_v6 = vld [vmem:[#allocation30_spill] sm:$0xff]  ;;  %v6219_v39 = vld [vmem:[#allocation17_spill] sm:$0xff] }
 0x1fd   :  { %v2842_v18 = vmul.f32 %v6205_v52, %v4011_v53  ;;  %v2291_v5 = vadd.f32 %v2284_v46, %v2249_v63  ;;  %3058 = vtanh.f32 %v2287_v15  ;;  %v2808_v40 = vadd.f32 %v5487_v34, %v5480_v24  ;;  %v6214_v24 = vld [vmem:[#allocation16_spill] sm:$0xff]  ;;  %v6229_v43 = vld [vmem:[#allocation46_spill] sm:$0xff]  ;;  %v2861_v52 = vpop.permute.xlu0 %2860  ;;  %v6233_v60 = vld [vmem:[#allocation35_spill] sm:$0xff] }
 0x1fe   :  { %v2802_v55 = vmul.f32 %v6207_v12, %v3965_v51  ;;  %v6209_v22 = vrot.slane %v6208_v38, %v3306_v26  ;;  %v2292_v58 = vadd.f32 %v2285_v9, %v2250_v8  ;;  %3060 = vtanh.f32 %v2288_v56  ;;  %v6230_v7 = vld [vmem:[#allocation38_spill] sm:$0xff]  ;;  %v2303_v8 = vpop.permute.xlu1 %2302 }
 0x1ff   :  { %v6211_v25 = vrot.slane %v5368_v48, %v3306_v26  ;;  %v2293_v0 = vadd.f32 %v2286_v29, %v2251_v44  ;;  %3062 = vtanh.f32 %v2289_v4  ;;  %v1480_v20 = vadd.f32 %v6213_v6, %v6212_v61  ;;  %v6220_v26 = vld [vmem:[#allocation40_spill] sm:$0xff]  ;;  %v6221_v48 = vld [vmem:[#allocation27_spill] sm:$0xff] }
 0x200   :  { %v2843_v31 = vmul.f32 %v6209_v22, %v4011_v53  ;;  %v2809_v11 = vadd.f32 %v2802_v55, %v6210_v14  ;;  %v1747_v34 = vmul.f32 %v6214_v24, %v1745_v36  ;;  %v2849_v2 = vadd.f32 %v2842_v18, %v6215_v21  ;;  %v6231_v44 = vld [vmem:[#allocation47_spill] sm:$0xff]  ;;  %v6232_v18 = vld [vmem:[#allocation20_spill] sm:$0xff]  ;;  %v6236_v14 = vld [vmem:[#allocation22_spill] sm:$0xff] }
 0x201   :  { %v2844_v51 = vmul.f32 %v6211_v25, %v4011_v53  ;;  %3064 = vtanh.f32 %v2290_v13  ;;  %v1481_v35 = vadd.f32 %v6217_v17, %v6216_v1  ;;  %v2584_v49 = vmul.f32 %v6218_v59, %v2582_v42  ;;  %v6235_v22 = vld [vmem:[#allocation36_spill] sm:$0xff]  ;;  %v6239_v6 = vld [vmem:[#allocation23_spill] sm:$0xff] }
 0x202   :  { %v1748_v57 = vmul.f32 %v6219_v39, %v1745_v36  ;;  %3066 = vtanh.f32 %v2291_v5  ;;  %v1749_v53 = vmul.f32 %v6220_v26, %v1745_v36  ;;  %v1754_v32 = vadd.f32 %v1747_v34, %v6221_v48  ;;  %v6234_v5 = vld [vmem:[#allocation21_spill] sm:$0xff]  ;;  %v6241_v1 = vld [vmem:[#allocation24_spill] sm:$0xff] }
 0x203   :  { %v2850_v45 = vadd.f32 %v2843_v31, %v2808_v40  ;;  %3068 = vtanh.f32 %v2292_v58  ;;  %v1750_v19 = vmul.f32 %v6222_v3, %v1745_v36  ;;  %v2851_v46 = vadd.f32 %v2844_v51, %v2809_v11  ;;  %v6244_v3 = vld [vmem:[#allocation26_spill] sm:$0xff] }
 0x204   :  { %v1755_v10 = vadd.f32 %v1748_v57, %v6223_v33  ;;  %3070 = vtanh.f32 %v2293_v0  ;;  %v2585_v50 = vmul.f32 %v6224_v23, %v2582_v42  ;;  %v1751_v27 = vmul.f32 %v6225_v62, %v1745_v36  ;;  %v6238_v0 = vld [vmem:[#allocation48_spill] sm:$0xff] }
 0x205   :  { %v1756_v30 = vadd.f32 %v1749_v53, %v6226_v41  ;;  %3072 = vtanh.f32 %v2849_v2  ;;  %v2586_v9 = vmul.f32 %v6227_v54, %v2582_v42  ;;  %v2587_v47 = vmul.f32 %v6228_v16, %v2582_v42  ;;  %v3057_v29 = vpop.eup %3056  ;;  %v6243_v53 = vld [vmem:[#allocation25_spill] sm:$0xff] }
 0x206   :  { %v1752_v37 = vmul.f32 %v6229_v43, %v1745_v36  ;;  %v1757_v63 = vadd.f32 %v1750_v19, %v6230_v7  ;;  %v1753_v15 = vmul.f32 %v6231_v44, %v1745_v36  ;;  %v1758_v56 = vadd.f32 %v1751_v27, %v1479_v28  ;;  %v6237_v28 = vld [vmem:[#allocation39_spill] sm:$0xff] }
 0x207   :  { %3074 = vtanh.f32 %v2850_v45  ;;  %v2033_v4 = vadd.f32 %v6232_v18, %v1754_v32  ;;  %v3059_v13 = vpop.eup %3058  ;;  %v2588_v12 = vmul.f32 %v6233_v60, %v2582_v42  ;;  %v2034_v40 = vadd.f32 %v6234_v5, %v1755_v10 }
 0x208   :  { %v1759_v55 = vadd.f32 %v1752_v37, %v1480_v20  ;;  %3076 = vtanh.f32 %v2851_v46  ;;  %v3061_v38 = vpop.eup %3060  ;;  %v2589_v31 = vmul.f32 %v6235_v22, %v2582_v42  ;;  %v1760_v58 = vadd.f32 %v1753_v15, %v1481_v35  ;;  %v6240_v20 = vld [vmem:[#allocation49_spill] sm:$0xff]  ;;  %v6242_v35 = vld [vmem:[#allocation50_spill] sm:$0xff] }
 0x209   :  { %v2035_v11 = vadd.f32 %v6236_v14, %v1756_v30  ;;  %v2305_v25 = vmul.f32 %v3059_v13, %v2303_v8  ;;  %v3063_v36 = vpop.eup %3062  ;;  %v2590_v51 = vmul.f32 %v6237_v28, %v2582_v42  ;;  %v2863_v61 = vmul.f32 %v6238_v0, %v2861_v52  ;;  %v71_v30 = vpop.xlane.xlu1 %70 }
 0x20a   :  { %v2036_v24 = vadd.f32 %v6239_v6, %v1757_v63  ;;  %v2306_v34 = vmul.f32 %v3061_v38, %v2303_v8  ;;  %v2864_v2 = vmul.f32 %v6240_v20, %v2861_v52  ;;  %v2037_v17 = vadd.f32 %v6241_v1, %v1758_v56 }
 0x20b   :  { %v3065_v21 = vpop.eup %3064  ;;  %v2307_v59 = vmul.f32 %v3063_v36, %v2303_v8  ;;  %v2312_v39 = vadd.f32 %v2305_v25, %v2033_v4  ;;  %v2865_v26 = vmul.f32 %v6242_v35, %v2861_v52  ;;  %v2038_v48 = vadd.f32 %v6243_v53, %v1759_v55 }
 0x20c   :  { %v3067_v57 = vpop.eup %3066  ;;  %v2308_v32 = vmul.f32 %v3065_v21, %v2303_v8  ;;  %v2313_v45 = vadd.f32 %v2306_v34, %v2034_v40  ;;  %v2039_v19 = vadd.f32 %v6244_v3, %v1760_v58  ;;  %v2866_v62 = vmul.f32 %v3057_v29, %v2861_v52 }
 0x20d   :  { %v3069_v42 = vpop.eup %3068  ;;  %v2309_v33 = vmul.f32 %v3067_v57, %v2303_v8  ;;  %v2314_v10 = vadd.f32 %v2307_v59, %v2035_v11  ;;  %v2591_v46 = vadd.f32 %v2584_v49, %v2312_v39 }
 0x20e   :  { %v3071_v23 = vpop.eup %3070  ;;  %v2310_v27 = vmul.f32 %v3069_v42, %v2303_v8  ;;  %v2315_v41 = vadd.f32 %v2308_v32, %v2036_v24  ;;  %v2592_v54 = vadd.f32 %v2585_v50, %v2313_v45 }
 0x20f   :  { %v3073_v16 = vpop.eup %3072  ;;  %v2311_v43 = vmul.f32 %v3071_v23, %v2303_v8  ;;  %v2316_v37 = vadd.f32 %v2309_v33, %v2037_v17  ;;  %v2593_v7 = vadd.f32 %v2586_v9, %v2314_v10  ;;  %v2870_v63 = vadd.f32 %v2863_v61, %v2591_v46 }
 0x210   :  { %v2867_v44 = vmul.f32 %v3073_v16, %v2861_v52  ;;  %v2317_v15 = vadd.f32 %v2310_v27, %v2038_v48  ;;  %v2594_v56 = vadd.f32 %v2587_v47, %v2315_v41  ;;  %v2871_v18 = vadd.f32 %v2864_v2, %v2592_v54 }
 0x211   :  { %v3075_v4 = vpop.eup %3074  ;;  %v2318_v13 = vadd.f32 %v2311_v43, %v2039_v19  ;;  %v2595_v60 = vadd.f32 %v2588_v12, %v2316_v37  ;;  %v2872_v55 = vadd.f32 %v2865_v26, %v2593_v7  ;;  %v2877_v49 = vadd.f32 %v2870_v63, %v71_v30 }
 0x212   :  { %v3077_v5 = vpop.eup %3076  ;;  %v2868_v29 = vmul.f32 %v3075_v4, %v2861_v52  ;;  %v2596_v40 = vadd.f32 %v2589_v31, %v2317_v15  ;;  %v2873_v38 = vadd.f32 %v2866_v62, %v2594_v56  ;;  %v2878_v22 = vadd.f32 %v2871_v18, %v71_v30 }
 0x213   :  { %v2869_v50 = vmul.f32 %v3077_v5, %v2861_v52  ;;  %v2597_v58 = vadd.f32 %v2590_v51, %v2318_v13  ;;  %v2874_v8 = vadd.f32 %v2867_v44, %v2595_v60  ;;  %v2879_v14 = vadd.f32 %v2872_v55, %v71_v30  ;;  %2884 = vst [vmem:[#allocation10] sm:$0xff] %v2877_v49 }
 0x214   :  { %v2875_v9 = vadd.f32 %v2868_v29, %v2596_v40  ;;  %v2880_v11 = vadd.f32 %v2873_v38, %v71_v30  ;;  %2885 = vst [vmem:[#allocation10 + $0x8] sm:$0xff] %v2878_v22 }
 0x215   :  { %v2876_v47 = vadd.f32 %v2869_v50, %v2597_v58  ;;  %v2881_v25 = vadd.f32 %v2874_v8, %v71_v30  ;;  %2886 = vst [vmem:[#allocation10 + $0x10] sm:$0xff] %v2879_v14 }
 0x216   :  { %v2882_v12 = vadd.f32 %v2875_v9, %v71_v30  ;;  %2887 = vst [vmem:[#allocation10 + $0x18] sm:$0xff] %v2880_v11 }
 0x217   :  { %v2883_v36 = vadd.f32 %v2876_v47, %v71_v30  ;;  %2888 = vst [vmem:[#allocation10 + $0x20] sm:$0xff] %v2881_v25 }
 0x218   :  { %2889 = vst [vmem:[#allocation10 + $0x28] sm:$0xff] %v2882_v12 }
 0x219   :  { %2890 = vst [vmem:[#allocation10 + $0x30] sm:$0xff] %v2883_v36 }
 0x21a   :  { %3179 = shalt.err (!%p3176_p8)
}
 0x21b   :  { %s3180_s11 = scalar_lea.hbm %s5760_s4, 896 }
 0x21c   :  { %p3181_p9 = scmp.ne.s32.totalorder %s5760_s4, %s3180_s11  ;;  %p3184_p10 = scmp.lt.u32.totalorder %s3180_s11, %s5760_s4 }
 0x21e   :  { %p3186_p11 = pnand %p3184_p10, %p3181_p9 }
 0x220   :  { %3189 = shalt.err (!%p3186_p11)
}
 0x221   :  { %2900 = dma.vmem_to_hbm [thread:$0]  %s2898_s8, 896, %s5760_s4, [#allocation4]  }
 0x222   :  { %3196 = dma.done.wait [#allocation4], 896  }
 0x223   :  { %3197 = vsyncadd [#allocation4], 4294966400 }
 0x224   :  { %2904 = vsyncpa [#allocation3], 1 }
 0x225   :  { %2905 = vsyncpa [#allocation6], 1 }
 0x226   :  { %2906 = vsyncpa [#allocation9], 1 }
 0x227   :  { %2907 = vsyncpa [#allocation4], 1 }

</bundles_post_ra>
